<compile_context>
chip_gen: v5e
topology: v5e:2x2
jax: 0.10.0
libtpu: 0.0.40
codegen_flags: <defaults>
</compile_context>

<pallas_src>
import jax
import jax.numpy as jnp
from jax.experimental import pallas as pl
from jax.experimental.pallas import tpu as pltpu


# ----------------------------------------------------------------------------
# Fused Pallas kernel
# ----------------------------------------------------------------------------
def _make_fused_lstm_kernel(n_layers, seq_len, hidden_dim):
    H = hidden_dim

    def kernel(*refs):
        # refs = [x, (w_ih, w_hh, b) * n_layers, w_fc, b_fc, out]
        x_ref = refs[0]                           # (B, T, D_in)    VMEM
        layer_refs = refs[1:1 + 3 * n_layers]
        w_fc_ref = refs[1 + 3 * n_layers]         # (H, O)
        b_fc_ref = refs[2 + 3 * n_layers]         # (1, O)
        out_ref = refs[3 + 3 * n_layers]          # (B, O)

        B = x_ref.shape[0]

        # Weights loaded once; they stay VMEM/vreg resident for the whole call.
        # Note: on v6e/v7x these could be bf16-cast for the MXU at larger H/B;
        # kept f32 here (v5e-safe, bit-exact vs the f32 reference).
        w_ih = [layer_refs[3 * l + 0][...] for l in range(n_layers)]
        w_hh = [layer_refs[3 * l + 1][...] for l in range(n_layers)]
        bias = [jnp.broadcast_to(layer_refs[3 * l + 2][...], (B, 4 * H))
                for l in range(n_layers)]

        # h/c carried purely as values (registers / VMEM spill) — never HBM.
        hs = [jnp.zeros((B, H), jnp.float32) for _ in range(n_layers)]
        cs = [jnp.zeros((B, H), jnp.float32) for _ in range(n_layers)]

        # Fully unrolled time loop: zero per-step pipeline/grid overhead and
        # full LLO scheduling visibility.
        for t in range(seq_len):
            inp = x_ref[:, t, :].astype(jnp.float32)             # (B, D)
            for l in range(n_layers):
                gates = (
                    jnp.dot(inp, w_ih[l], preferred_element_type=jnp.float32)
                    + jnp.dot(hs[l], w_hh[l], preferred_element_type=jnp.float32)
                    + bias[l]
                )                                                # (B, 4H) lane-dense
                # Two full-tile EUP passes over the lane-dense (B, 4H) tile,
                # then static lane slices (cheaper than 4 activations on
                # padded (B, H) sub-slices).
                sig = jax.nn.sigmoid(gates)
                tnh = jnp.tanh(gates)
                i_g = sig[:, 0 * H:1 * H]
                f_g = sig[:, 1 * H:2 * H]
                o_g = sig[:, 3 * H:4 * H]
                g_g = tnh[:, 2 * H:3 * H]

                c_new = f_g * cs[l] + i_g * g_g
                h_new = o_g * jnp.tanh(c_new)
                cs[l] = c_new
                hs[l] = h_new
                inp = h_new
                # TODO(synk): nn.LSTM inter-layer dropout (p=0.5) is
                # training-mode only; inference forward is a no-op, skipped.

        # FC head fused in: only the (B, O) result leaves the kernel.
        out = (
            jnp.dot(hs[-1], w_fc_ref[...], preferred_element_type=jnp.float32)
            + b_fc_ref[...]
        )
        out_ref[...] = out.astype(out_ref.dtype)

    return kernel


# ----------------------------------------------------------------------------
# Wrapper
# ----------------------------------------------------------------------------
def lstm_single_forward(x_btd, lstm_params, fc_params):
    """Forward pass of LSTM_Single.

    x_btd: (B, T, inp_dim), batch_first like torch.
    lstm_params: list of (w_ih (D,4H), w_hh (H,4H), b (1,4H)) per layer.
    fc_params: (w_fc_t (H, out_dim), b_fc (1, out_dim)).
    Returns (B, out_dim) == self.fc(hidden[-1]).
    """
    B, T, _ = x_btd.shape
    n_layers = len(lstm_params)
    H = lstm_params[0][1].shape[0]
    w_fc_t, b_fc = fc_params
    O = w_fc_t.shape[1]

    flat_weights = []
    for (w_ih, w_hh, b) in lstm_params:
        flat_weights += [w_ih, w_hh, b]
    inputs = [x_btd] + flat_weights + [w_fc_t, b_fc]

    kernel = _make_fused_lstm_kernel(n_layers, T, H)
    vmem_spec = pl.BlockSpec(memory_space=pltpu.MemorySpace.VMEM)
    return pl.pallas_call(
        kernel,
        out_shape=jax.ShapeDtypeStruct((B, O), x_btd.dtype),
        in_specs=[vmem_spec] * len(inputs),
        out_specs=vmem_spec,
    )(*inputs)


# ----------------------------------------------------------------------------
# Pure-JAX reference (for correctness check)
# ----------------------------------------------------------------------------
def lstm_single_reference(x_btd, lstm_params, fc_params):
    x = jnp.transpose(x_btd, (1, 0, 2))          # (T, B, D)
    for (w_ih, w_hh, b) in lstm_params:
        B = x.shape[1]
        H = w_hh.shape[0]

        def step(carry, x_t, w_ih=w_ih, w_hh=w_hh, b=b, H=H):
            h, c = carry
            gates = x_t @ w_ih + h @ w_hh + b[0]
            i = jax.nn.sigmoid(gates[:, 0 * H:1 * H])
            f = jax.nn.sigmoid(gates[:, 1 * H:2 * H])
            g = jnp.tanh(gates[:, 2 * H:3 * H])
            o = jax.nn.sigmoid(gates[:, 3 * H:4 * H])
            c_new = f * c + i * g
            h_new = o * jnp.tanh(c_new)
            return (h_new, c_new), h_new

        init = (jnp.zeros((B, H), jnp.float32), jnp.zeros((B, H), jnp.float32))
        _, x = jax.lax.scan(step, init, x)
    hidden_last = x[-1]
    w_fc_t, b_fc = fc_params
    return hidden_last @ w_fc_t + b_fc[0]


# ----------------------------------------------------------------------------
# Deterministic parameter init (mimics torch uniform(-1/sqrt(H), 1/sqrt(H)))
# ----------------------------------------------------------------------------
def init_params(key, inp_dim, out_dim, hidden_dim, n_layers):
    k = 1.0 / jnp.sqrt(hidden_dim)
    lstm_params = []
    d_in = inp_dim
    for _ in range(n_layers):
        key, k1, k2, k3, k4 = jax.random.split(key, 5)
        w_ih = jax.random.uniform(k1, (d_in, 4 * hidden_dim), jnp.float32, -k, k)
        w_hh = jax.random.uniform(k2, (hidden_dim, 4 * hidden_dim), jnp.float32, -k, k)
        b_ih = jax.random.uniform(k3, (4 * hidden_dim,), jnp.float32, -k, k)
        b_hh = jax.random.uniform(k4, (4 * hidden_dim,), jnp.float32, -k, k)
        lstm_params.append((w_ih, w_hh, (b_ih + b_hh)[None, :]))
        d_in = hidden_dim
    key, k5, k6 = jax.random.split(key, 3)
    kf = 1.0 / jnp.sqrt(hidden_dim)
    w_fc_t = jax.random.uniform(k5, (hidden_dim, out_dim), jnp.float32, -kf, kf)
    b_fc = jax.random.uniform(k6, (1, out_dim), jnp.float32, -kf, kf)
    return lstm_params, (w_fc_t, b_fc)


# ----------------------------------------------------------------------------
if __name__ == "__main__":
    # Batch raised to 8 (fills the 8 sublanes); still small & module-consistent.
    B, T = 8, 8
    INP_DIM, OUT_DIM = 16, 8
    HIDDEN, N_LAYERS = 32, 3

    key = jax.random.PRNGKey(0)
    key, kx = jax.random.split(key)
    x = jax.random.normal(kx, (B, T, INP_DIM), dtype=jnp.float32)

    lstm_params, fc_params = init_params(key, INP_DIM, OUT_DIM, HIDDEN, N_LAYERS)

    out = jax.block_until_ready(lstm_single_forward(x, lstm_params, fc_params))
    ref = jax.block_until_ready(lstm_single_reference(x, lstm_params, fc_params))

    assert out.shape == (B, OUT_DIM), out.shape
    err = jnp.max(jnp.abs(out - ref))
    assert jnp.allclose(out, ref, atol=1e-4, rtol=1e-4), f"max abs err {err}"

    print("KERNEL_OK")
</pallas_src>

<mosaic_0001>
module attributes {stable_mosaic.version = 11 : i64} {
  func.func @kernel(%arg0: memref<8x8x16xf32, #tpu.memory_space<vmem>>, %arg1: memref<16x128xf32, #tpu.memory_space<vmem>>, %arg2: memref<32x128xf32, #tpu.memory_space<vmem>>, %arg3: memref<1x128xf32, #tpu.memory_space<vmem>>, %arg4: memref<32x128xf32, #tpu.memory_space<vmem>>, %arg5: memref<32x128xf32, #tpu.memory_space<vmem>>, %arg6: memref<1x128xf32, #tpu.memory_space<vmem>>, %arg7: memref<32x128xf32, #tpu.memory_space<vmem>>, %arg8: memref<32x128xf32, #tpu.memory_space<vmem>>, %arg9: memref<1x128xf32, #tpu.memory_space<vmem>>, %arg10: memref<32x8xf32, #tpu.memory_space<vmem>>, %arg11: memref<1x8xf32, #tpu.memory_space<vmem>>, %arg12: memref<8x8xf32, #tpu.memory_space<vmem>>) attributes {dimension_semantics = [], scalar_prefetch = 0 : i64, scratch_operands = 0 : i64, tpu.core_type = #tpu.core_type<tc>} {
    %c0 = arith.constant 0 : index
    %c0_0 = arith.constant 0 : index
    %0 = vector.load %arg1[%c0, %c0_0] : memref<16x128xf32, #tpu.memory_space<vmem>>, vector<16x128xf32>
    %c0_1 = arith.constant 0 : index
    %c0_2 = arith.constant 0 : index
    %1 = vector.load %arg4[%c0_1, %c0_2] : memref<32x128xf32, #tpu.memory_space<vmem>>, vector<32x128xf32>
    %c0_3 = arith.constant 0 : index
    %c0_4 = arith.constant 0 : index
    %2 = vector.load %arg7[%c0_3, %c0_4] : memref<32x128xf32, #tpu.memory_space<vmem>>, vector<32x128xf32>
    %c0_5 = arith.constant 0 : index
    %c0_6 = arith.constant 0 : index
    %3 = vector.load %arg2[%c0_5, %c0_6] : memref<32x128xf32, #tpu.memory_space<vmem>>, vector<32x128xf32>
    %c0_7 = arith.constant 0 : index
    %c0_8 = arith.constant 0 : index
    %4 = vector.load %arg5[%c0_7, %c0_8] : memref<32x128xf32, #tpu.memory_space<vmem>>, vector<32x128xf32>
    %c0_9 = arith.constant 0 : index
    %c0_10 = arith.constant 0 : index
    %5 = vector.load %arg8[%c0_9, %c0_10] : memref<32x128xf32, #tpu.memory_space<vmem>>, vector<32x128xf32>
    %c0_11 = arith.constant 0 : index
    %c0_12 = arith.constant 0 : index
    %6 = vector.load %arg3[%c0_11, %c0_12] : memref<1x128xf32, #tpu.memory_space<vmem>>, vector<1x128xf32>
    %7 = vector.shape_cast %6 : vector<1x128xf32> to vector<1x128xf32>
    %8 = vector.broadcast %7 : vector<1x128xf32> to vector<8x128xf32>
    %c0_13 = arith.constant 0 : index
    %c0_14 = arith.constant 0 : index
    %9 = vector.load %arg6[%c0_13, %c0_14] : memref<1x128xf32, #tpu.memory_space<vmem>>, vector<1x128xf32>
    %10 = vector.shape_cast %9 : vector<1x128xf32> to vector<1x128xf32>
    %11 = vector.broadcast %10 : vector<1x128xf32> to vector<8x128xf32>
    %c0_15 = arith.constant 0 : index
    %c0_16 = arith.constant 0 : index
    %12 = vector.load %arg9[%c0_15, %c0_16] : memref<1x128xf32, #tpu.memory_space<vmem>>, vector<1x128xf32>
    %13 = vector.shape_cast %12 : vector<1x128xf32> to vector<1x128xf32>
    %14 = vector.broadcast %13 : vector<1x128xf32> to vector<8x128xf32>
    %cst = arith.constant 0.000000e+00 : f32
    %15 = vector.broadcast %cst : f32 to vector<8x32xf32>
    %cst_17 = arith.constant 0.000000e+00 : f32
    %16 = vector.broadcast %cst_17 : f32 to vector<8x32xf32>
    %cst_18 = arith.constant 0.000000e+00 : f32
    %17 = vector.broadcast %cst_18 : f32 to vector<8x32xf32>
    %cst_19 = arith.constant 0.000000e+00 : f32
    %18 = vector.broadcast %cst_19 : f32 to vector<8x32xf32>
    %cst_20 = arith.constant 0.000000e+00 : f32
    %19 = vector.broadcast %cst_20 : f32 to vector<8x32xf32>
    %cst_21 = arith.constant 0.000000e+00 : f32
    %20 = vector.broadcast %cst_21 : f32 to vector<8x32xf32>
    %c0_22 = arith.constant 0 : index
    %c0_23 = arith.constant 0 : index
    %c0_24 = arith.constant 0 : index
    %21 = vector.load %arg0[%c0_22, %c0_23, %c0_24] : memref<8x8x16xf32, #tpu.memory_space<vmem>>, vector<8x1x16xf32>
    %22 = vector.shape_cast %21 : vector<8x1x16xf32> to vector<8x16xf32>
    %cst_25 = arith.constant dense<0.000000e+00> : vector<8x128xf32>
    %23 = tpu.matmul %22, %0, %cst_25 {dimension_numbers = #tpu.dot_dimension_numbers<[1], [0], [0], [1], [0, 0, 1, 1], [], []>} : vector<8x16xf32>, vector<16x128xf32>, vector<8x128xf32> -> vector<8x128xf32>
    %cst_26 = arith.constant dense<0.000000e+00> : vector<8x128xf32>
    %24 = tpu.matmul %15, %3, %cst_26 {dimension_numbers = #tpu.dot_dimension_numbers<[1], [0], [0], [1], [0, 0, 1, 1], [], []>} : vector<8x32xf32>, vector<32x128xf32>, vector<8x128xf32> -> vector<8x128xf32>
    %25 = arith.addf %23, %24 : vector<8x128xf32>
    %26 = arith.addf %25, %8 : vector<8x128xf32>
    %27 = arith.negf %26 : vector<8x128xf32>
    %28 = math.exp %27 : vector<8x128xf32>
    %cst_27 = arith.constant 1.000000e+00 : f32
    %29 = vector.broadcast %cst_27 : f32 to vector<8x128xf32>
    %30 = arith.addf %29, %28 : vector<8x128xf32>
    %31 = arith.divf %29, %30 : vector<8x128xf32>
    %32 = math.tanh %26 : vector<8x128xf32>
    %33 = vector.extract_strided_slice %31 {offsets = [0, 0], sizes = [8, 32], strides = [1, 1]} : vector<8x128xf32> to vector<8x32xf32>
    %34 = vector.extract_strided_slice %31 {offsets = [0, 32], sizes = [8, 32], strides = [1, 1]} : vector<8x128xf32> to vector<8x32xf32>
    %35 = vector.extract_strided_slice %31 {offsets = [0, 96], sizes = [8, 32], strides = [1, 1]} : vector<8x128xf32> to vector<8x32xf32>
    %36 = vector.extract_strided_slice %32 {offsets = [0, 64], sizes = [8, 32], strides = [1, 1]} : vector<8x128xf32> to vector<8x32xf32>
    %37 = arith.mulf %34, %18 : vector<8x32xf32>
    %38 = arith.mulf %33, %36 : vector<8x32xf32>
    %39 = arith.addf %37, %38 : vector<8x32xf32>
    %40 = math.tanh %39 : vector<8x32xf32>
    %41 = arith.mulf %35, %40 : vector<8x32xf32>
    %cst_28 = arith.constant dense<0.000000e+00> : vector<8x128xf32>
    %42 = tpu.matmul %41, %1, %cst_28 {dimension_numbers = #tpu.dot_dimension_numbers<[1], [0], [0], [1], [0, 0, 1, 1], [], []>} : vector<8x32xf32>, vector<32x128xf32>, vector<8x128xf32> -> vector<8x128xf32>
    %cst_29 = arith.constant dense<0.000000e+00> : vector<8x128xf32>
    %43 = tpu.matmul %16, %4, %cst_29 {dimension_numbers = #tpu.dot_dimension_numbers<[1], [0], [0], [1], [0, 0, 1, 1], [], []>} : vector<8x32xf32>, vector<32x128xf32>, vector<8x128xf32> -> vector<8x128xf32>
    %44 = arith.addf %42, %43 : vector<8x128xf32>
    %45 = arith.addf %44, %11 : vector<8x128xf32>
    %46 = arith.negf %45 : vector<8x128xf32>
    %47 = math.exp %46 : vector<8x128xf32>
    %cst_30 = arith.constant 1.000000e+00 : f32
    %48 = vector.broadcast %cst_30 : f32 to vector<8x128xf32>
    %49 = arith.addf %48, %47 : vector<8x128xf32>
    %50 = arith.divf %48, %49 : vector<8x128xf32>
    %51 = math.tanh %45 : vector<8x128xf32>
    %52 = vector.extract_strided_slice %50 {offsets = [0, 0], sizes = [8, 32], strides = [1, 1]} : vector<8x128xf32> to vector<8x32xf32>
    %53 = vector.extract_strided_slice %50 {offsets = [0, 32], sizes = [8, 32], strides = [1, 1]} : vector<8x128xf32> to vector<8x32xf32>
    %54 = vector.extract_strided_slice %50 {offsets = [0, 96], sizes = [8, 32], strides = [1, 1]} : vector<8x128xf32> to vector<8x32xf32>
    %55 = vector.extract_strided_slice %51 {offsets = [0, 64], sizes = [8, 32], strides = [1, 1]} : vector<8x128xf32> to vector<8x32xf32>
    %56 = arith.mulf %53, %19 : vector<8x32xf32>
    %57 = arith.mulf %52, %55 : vector<8x32xf32>
    %58 = arith.addf %56, %57 : vector<8x32xf32>
    %59 = math.tanh %58 : vector<8x32xf32>
    %60 = arith.mulf %54, %59 : vector<8x32xf32>
    %cst_31 = arith.constant dense<0.000000e+00> : vector<8x128xf32>
    %61 = tpu.matmul %60, %2, %cst_31 {dimension_numbers = #tpu.dot_dimension_numbers<[1], [0], [0], [1], [0, 0, 1, 1], [], []>} : vector<8x32xf32>, vector<32x128xf32>, vector<8x128xf32> -> vector<8x128xf32>
    %cst_32 = arith.constant dense<0.000000e+00> : vector<8x128xf32>
    %62 = tpu.matmul %17, %5, %cst_32 {dimension_numbers = #tpu.dot_dimension_numbers<[1], [0], [0], [1], [0, 0, 1, 1], [], []>} : vector<8x32xf32>, vector<32x128xf32>, vector<8x128xf32> -> vector<8x128xf32>
    %63 = arith.addf %61, %62 : vector<8x128xf32>
    %64 = arith.addf %63, %14 : vector<8x128xf32>
    %65 = arith.negf %64 : vector<8x128xf32>
    %66 = math.exp %65 : vector<8x128xf32>
    %cst_33 = arith.constant 1.000000e+00 : f32
    %67 = vector.broadcast %cst_33 : f32 to vector<8x128xf32>
    %68 = arith.addf %67, %66 : vector<8x128xf32>
    %69 = arith.divf %67, %68 : vector<8x128xf32>
    %70 = math.tanh %64 : vector<8x128xf32>
    %71 = vector.extract_strided_slice %69 {offsets = [0, 0], sizes = [8, 32], strides = [1, 1]} : vector<8x128xf32> to vector<8x32xf32>
    %72 = vector.extract_strided_slice %69 {offsets = [0, 32], sizes = [8, 32], strides = [1, 1]} : vector<8x128xf32> to vector<8x32xf32>
    %73 = vector.extract_strided_slice %69 {offsets = [0, 96], sizes = [8, 32], strides = [1, 1]} : vector<8x128xf32> to vector<8x32xf32>
    %74 = vector.extract_strided_slice %70 {offsets = [0, 64], sizes = [8, 32], strides = [1, 1]} : vector<8x128xf32> to vector<8x32xf32>
    %75 = arith.mulf %72, %20 : vector<8x32xf32>
    %76 = arith.mulf %71, %74 : vector<8x32xf32>
    %77 = arith.addf %75, %76 : vector<8x32xf32>
    %78 = math.tanh %77 : vector<8x32xf32>
    %79 = arith.mulf %73, %78 : vector<8x32xf32>
    %c0_34 = arith.constant 0 : index
    %c1 = arith.constant 1 : index
    %c0_35 = arith.constant 0 : index
    %80 = vector.load %arg0[%c0_34, %c1, %c0_35] : memref<8x8x16xf32, #tpu.memory_space<vmem>>, vector<8x1x16xf32>
    %81 = vector.shape_cast %80 : vector<8x1x16xf32> to vector<8x16xf32>
    %cst_36 = arith.constant dense<0.000000e+00> : vector<8x128xf32>
    %82 = tpu.matmul %81, %0, %cst_36 {dimension_numbers = #tpu.dot_dimension_numbers<[1], [0], [0], [1], [0, 0, 1, 1], [], []>} : vector<8x16xf32>, vector<16x128xf32>, vector<8x128xf32> -> vector<8x128xf32>
    %cst_37 = arith.constant dense<0.000000e+00> : vector<8x128xf32>
    %83 = tpu.matmul %41, %3, %cst_37 {dimension_numbers = #tpu.dot_dimension_numbers<[1], [0], [0], [1], [0, 0, 1, 1], [], []>} : vector<8x32xf32>, vector<32x128xf32>, vector<8x128xf32> -> vector<8x128xf32>
    %84 = arith.addf %82, %83 : vector<8x128xf32>
    %85 = arith.addf %84, %8 : vector<8x128xf32>
    %86 = arith.negf %85 : vector<8x128xf32>
    %87 = math.exp %86 : vector<8x128xf32>
    %cst_38 = arith.constant 1.000000e+00 : f32
    %88 = vector.broadcast %cst_38 : f32 to vector<8x128xf32>
    %89 = arith.addf %88, %87 : vector<8x128xf32>
    %90 = arith.divf %88, %89 : vector<8x128xf32>
    %91 = math.tanh %85 : vector<8x128xf32>
    %92 = vector.extract_strided_slice %90 {offsets = [0, 0], sizes = [8, 32], strides = [1, 1]} : vector<8x128xf32> to vector<8x32xf32>
    %93 = vector.extract_strided_slice %90 {offsets = [0, 32], sizes = [8, 32], strides = [1, 1]} : vector<8x128xf32> to vector<8x32xf32>
    %94 = vector.extract_strided_slice %90 {offsets = [0, 96], sizes = [8, 32], strides = [1, 1]} : vector<8x128xf32> to vector<8x32xf32>
    %95 = vector.extract_strided_slice %91 {offsets = [0, 64], sizes = [8, 32], strides = [1, 1]} : vector<8x128xf32> to vector<8x32xf32>
    %96 = arith.mulf %93, %39 : vector<8x32xf32>
    %97 = arith.mulf %92, %95 : vector<8x32xf32>
    %98 = arith.addf %96, %97 : vector<8x32xf32>
    %99 = math.tanh %98 : vector<8x32xf32>
    %100 = arith.mulf %94, %99 : vector<8x32xf32>
    %cst_39 = arith.constant dense<0.000000e+00> : vector<8x128xf32>
    %101 = tpu.matmul %100, %1, %cst_39 {dimension_numbers = #tpu.dot_dimension_numbers<[1], [0], [0], [1], [0, 0, 1, 1], [], []>} : vector<8x32xf32>, vector<32x128xf32>, vector<8x128xf32> -> vector<8x128xf32>
    %cst_40 = arith.constant dense<0.000000e+00> : vector<8x128xf32>
    %102 = tpu.matmul %60, %4, %cst_40 {dimension_numbers = #tpu.dot_dimension_numbers<[1], [0], [0], [1], [0, 0, 1, 1], [], []>} : vector<8x32xf32>, vector<32x128xf32>, vector<8x128xf32> -> vector<8x128xf32>
    %103 = arith.addf %101, %102 : vector<8x128xf32>
    %104 = arith.addf %103, %11 : vector<8x128xf32>
    %105 = arith.negf %104 : vector<8x128xf32>
    %106 = math.exp %105 : vector<8x128xf32>
    %cst_41 = arith.constant 1.000000e+00 : f32
    %107 = vector.broadcast %cst_41 : f32 to vector<8x128xf32>
    %108 = arith.addf %107, %106 : vector<8x128xf32>
    %109 = arith.divf %107, %108 : vector<8x128xf32>
    %110 = math.tanh %104 : vector<8x128xf32>
    %111 = vector.extract_strided_slice %109 {offsets = [0, 0], sizes = [8, 32], strides = [1, 1]} : vector<8x128xf32> to vector<8x32xf32>
    %112 = vector.extract_strided_slice %109 {offsets = [0, 32], sizes = [8, 32], strides = [1, 1]} : vector<8x128xf32> to vector<8x32xf32>
    %113 = vector.extract_strided_slice %109 {offsets = [0, 96], sizes = [8, 32], strides = [1, 1]} : vector<8x128xf32> to vector<8x32xf32>
    %114 = vector.extract_strided_slice %110 {offsets = [0, 64], sizes = [8, 32], strides = [1, 1]} : vector<8x128xf32> to vector<8x32xf32>
    %115 = arith.mulf %112, %58 : vector<8x32xf32>
    %116 = arith.mulf %111, %114 : vector<8x32xf32>
    %117 = arith.addf %115, %116 : vector<8x32xf32>
    %118 = math.tanh %117 : vector<8x32xf32>
    %119 = arith.mulf %113, %118 : vector<8x32xf32>
    %cst_42 = arith.constant dense<0.000000e+00> : vector<8x128xf32>
    %120 = tpu.matmul %119, %2, %cst_42 {dimension_numbers = #tpu.dot_dimension_numbers<[1], [0], [0], [1], [0, 0, 1, 1], [], []>} : vector<8x32xf32>, vector<32x128xf32>, vector<8x128xf32> -> vector<8x128xf32>
    %cst_43 = arith.constant dense<0.000000e+00> : vector<8x128xf32>
    %121 = tpu.matmul %79, %5, %cst_43 {dimension_numbers = #tpu.dot_dimension_numbers<[1], [0], [0], [1], [0, 0, 1, 1], [], []>} : vector<8x32xf32>, vector<32x128xf32>, vector<8x128xf32> -> vector<8x128xf32>
    %122 = arith.addf %120, %121 : vector<8x128xf32>
    %123 = arith.addf %122, %14 : vector<8x128xf32>
    %124 = arith.negf %123 : vector<8x128xf32>
    %125 = math.exp %124 : vector<8x128xf32>
    %cst_44 = arith.constant 1.000000e+00 : f32
    %126 = vector.broadcast %cst_44 : f32 to vector<8x128xf32>
    %127 = arith.addf %126, %125 : vector<8x128xf32>
    %128 = arith.divf %126, %127 : vector<8x128xf32>
    %129 = math.tanh %123 : vector<8x128xf32>
    %130 = vector.extract_strided_slice %128 {offsets = [0, 0], sizes = [8, 32], strides = [1, 1]} : vector<8x128xf32> to vector<8x32xf32>
    %131 = vector.extract_strided_slice %128 {offsets = [0, 32], sizes = [8, 32], strides = [1, 1]} : vector<8x128xf32> to vector<8x32xf32>
    %132 = vector.extract_strided_slice %128 {offsets = [0, 96], sizes = [8, 32], strides = [1, 1]} : vector<8x128xf32> to vector<8x32xf32>
    %133 = vector.extract_strided_slice %129 {offsets = [0, 64], sizes = [8, 32], strides = [1, 1]} : vector<8x128xf32> to vector<8x32xf32>
    %134 = arith.mulf %131, %77 : vector<8x32xf32>
    %135 = arith.mulf %130, %133 : vector<8x32xf32>
    %136 = arith.addf %134, %135 : vector<8x32xf32>
    %137 = math.tanh %136 : vector<8x32xf32>
    %138 = arith.mulf %132, %137 : vector<8x32xf32>
    %c0_45 = arith.constant 0 : index
    %c2 = arith.constant 2 : index
    %c0_46 = arith.constant 0 : index
    %139 = vector.load %arg0[%c0_45, %c2, %c0_46] : memref<8x8x16xf32, #tpu.memory_space<vmem>>, vector<8x1x16xf32>
    %140 = vector.shape_cast %139 : vector<8x1x16xf32> to vector<8x16xf32>
    %cst_47 = arith.constant dense<0.000000e+00> : vector<8x128xf32>
    %141 = tpu.matmul %140, %0, %cst_47 {dimension_numbers = #tpu.dot_dimension_numbers<[1], [0], [0], [1], [0, 0, 1, 1], [], []>} : vector<8x16xf32>, vector<16x128xf32>, vector<8x128xf32> -> vector<8x128xf32>
    %cst_48 = arith.constant dense<0.000000e+00> : vector<8x128xf32>
    %142 = tpu.matmul %100, %3, %cst_48 {dimension_numbers = #tpu.dot_dimension_numbers<[1], [0], [0], [1], [0, 0, 1, 1], [], []>} : vector<8x32xf32>, vector<32x128xf32>, vector<8x128xf32> -> vector<8x128xf32>
    %143 = arith.addf %141, %142 : vector<8x128xf32>
    %144 = arith.addf %143, %8 : vector<8x128xf32>
    %145 = arith.negf %144 : vector<8x128xf32>
    %146 = math.exp %145 : vector<8x128xf32>
    %cst_49 = arith.constant 1.000000e+00 : f32
    %147 = vector.broadcast %cst_49 : f32 to vector<8x128xf32>
    %148 = arith.addf %147, %146 : vector<8x128xf32>
    %149 = arith.divf %147, %148 : vector<8x128xf32>
    %150 = math.tanh %144 : vector<8x128xf32>
    %151 = vector.extract_strided_slice %149 {offsets = [0, 0], sizes = [8, 32], strides = [1, 1]} : vector<8x128xf32> to vector<8x32xf32>
    %152 = vector.extract_strided_slice %149 {offsets = [0, 32], sizes = [8, 32], strides = [1, 1]} : vector<8x128xf32> to vector<8x32xf32>
    %153 = vector.extract_strided_slice %149 {offsets = [0, 96], sizes = [8, 32], strides = [1, 1]} : vector<8x128xf32> to vector<8x32xf32>
    %154 = vector.extract_strided_slice %150 {offsets = [0, 64], sizes = [8, 32], strides = [1, 1]} : vector<8x128xf32> to vector<8x32xf32>
    %155 = arith.mulf %152, %98 : vector<8x32xf32>
    %156 = arith.mulf %151, %154 : vector<8x32xf32>
    %157 = arith.addf %155, %156 : vector<8x32xf32>
    %158 = math.tanh %157 : vector<8x32xf32>
    %159 = arith.mulf %153, %158 : vector<8x32xf32>
    %cst_50 = arith.constant dense<0.000000e+00> : vector<8x128xf32>
    %160 = tpu.matmul %159, %1, %cst_50 {dimension_numbers = #tpu.dot_dimension_numbers<[1], [0], [0], [1], [0, 0, 1, 1], [], []>} : vector<8x32xf32>, vector<32x128xf32>, vector<8x128xf32> -> vector<8x128xf32>
    %cst_51 = arith.constant dense<0.000000e+00> : vector<8x128xf32>
    %161 = tpu.matmul %119, %4, %cst_51 {dimension_numbers = #tpu.dot_dimension_numbers<[1], [0], [0], [1], [0, 0, 1, 1], [], []>} : vector<8x32xf32>, vector<32x128xf32>, vector<8x128xf32> -> vector<8x128xf32>
    %162 = arith.addf %160, %161 : vector<8x128xf32>
    %163 = arith.addf %162, %11 : vector<8x128xf32>
    %164 = arith.negf %163 : vector<8x128xf32>
    %165 = math.exp %164 : vector<8x128xf32>
    %cst_52 = arith.constant 1.000000e+00 : f32
    %166 = vector.broadcast %cst_52 : f32 to vector<8x128xf32>
    %167 = arith.addf %166, %165 : vector<8x128xf32>
    %168 = arith.divf %166, %167 : vector<8x128xf32>
    %169 = math.tanh %163 : vector<8x128xf32>
    %170 = vector.extract_strided_slice %168 {offsets = [0, 0], sizes = [8, 32], strides = [1, 1]} : vector<8x128xf32> to vector<8x32xf32>
    %171 = vector.extract_strided_slice %168 {offsets = [0, 32], sizes = [8, 32], strides = [1, 1]} : vector<8x128xf32> to vector<8x32xf32>
    %172 = vector.extract_strided_slice %168 {offsets = [0, 96], sizes = [8, 32], strides = [1, 1]} : vector<8x128xf32> to vector<8x32xf32>
    %173 = vector.extract_strided_slice %169 {offsets = [0, 64], sizes = [8, 32], strides = [1, 1]} : vector<8x128xf32> to vector<8x32xf32>
    %174 = arith.mulf %171, %117 : vector<8x32xf32>
    %175 = arith.mulf %170, %173 : vector<8x32xf32>
    %176 = arith.addf %174, %175 : vector<8x32xf32>
    %177 = math.tanh %176 : vector<8x32xf32>
    %178 = arith.mulf %172, %177 : vector<8x32xf32>
    %cst_53 = arith.constant dense<0.000000e+00> : vector<8x128xf32>
    %179 = tpu.matmul %178, %2, %cst_53 {dimension_numbers = #tpu.dot_dimension_numbers<[1], [0], [0], [1], [0, 0, 1, 1], [], []>} : vector<8x32xf32>, vector<32x128xf32>, vector<8x128xf32> -> vector<8x128xf32>
    %cst_54 = arith.constant dense<0.000000e+00> : vector<8x128xf32>
    %180 = tpu.matmul %138, %5, %cst_54 {dimension_numbers = #tpu.dot_dimension_numbers<[1], [0], [0], [1], [0, 0, 1, 1], [], []>} : vector<8x32xf32>, vector<32x128xf32>, vector<8x128xf32> -> vector<8x128xf32>
    %181 = arith.addf %179, %180 : vector<8x128xf32>
    %182 = arith.addf %181, %14 : vector<8x128xf32>
    %183 = arith.negf %182 : vector<8x128xf32>
    %184 = math.exp %183 : vector<8x128xf32>
    %cst_55 = arith.constant 1.000000e+00 : f32
    %185 = vector.broadcast %cst_55 : f32 to vector<8x128xf32>
    %186 = arith.addf %185, %184 : vector<8x128xf32>
    %187 = arith.divf %185, %186 : vector<8x128xf32>
    %188 = math.tanh %182 : vector<8x128xf32>
    %189 = vector.extract_strided_slice %187 {offsets = [0, 0], sizes = [8, 32], strides = [1, 1]} : vector<8x128xf32> to vector<8x32xf32>
    %190 = vector.extract_strided_slice %187 {offsets = [0, 32], sizes = [8, 32], strides = [1, 1]} : vector<8x128xf32> to vector<8x32xf32>
    %191 = vector.extract_strided_slice %187 {offsets = [0, 96], sizes = [8, 32], strides = [1, 1]} : vector<8x128xf32> to vector<8x32xf32>
    %192 = vector.extract_strided_slice %188 {offsets = [0, 64], sizes = [8, 32], strides = [1, 1]} : vector<8x128xf32> to vector<8x32xf32>
    %193 = arith.mulf %190, %136 : vector<8x32xf32>
    %194 = arith.mulf %189, %192 : vector<8x32xf32>
    %195 = arith.addf %193, %194 : vector<8x32xf32>
    %196 = math.tanh %195 : vector<8x32xf32>
    %197 = arith.mulf %191, %196 : vector<8x32xf32>
    %c0_56 = arith.constant 0 : index
    %c3 = arith.constant 3 : index
    %c0_57 = arith.constant 0 : index
    %198 = vector.load %arg0[%c0_56, %c3, %c0_57] : memref<8x8x16xf32, #tpu.memory_space<vmem>>, vector<8x1x16xf32>
    %199 = vector.shape_cast %198 : vector<8x1x16xf32> to vector<8x16xf32>
    %cst_58 = arith.constant dense<0.000000e+00> : vector<8x128xf32>
    %200 = tpu.matmul %199, %0, %cst_58 {dimension_numbers = #tpu.dot_dimension_numbers<[1], [0], [0], [1], [0, 0, 1, 1], [], []>} : vector<8x16xf32>, vector<16x128xf32>, vector<8x128xf32> -> vector<8x128xf32>
    %cst_59 = arith.constant dense<0.000000e+00> : vector<8x128xf32>
    %201 = tpu.matmul %159, %3, %cst_59 {dimension_numbers = #tpu.dot_dimension_numbers<[1], [0], [0], [1], [0, 0, 1, 1], [], []>} : vector<8x32xf32>, vector<32x128xf32>, vector<8x128xf32> -> vector<8x128xf32>
    %202 = arith.addf %200, %201 : vector<8x128xf32>
    %203 = arith.addf %202, %8 : vector<8x128xf32>
    %204 = arith.negf %203 : vector<8x128xf32>
    %205 = math.exp %204 : vector<8x128xf32>
    %cst_60 = arith.constant 1.000000e+00 : f32
    %206 = vector.broadcast %cst_60 : f32 to vector<8x128xf32>
    %207 = arith.addf %206, %205 : vector<8x128xf32>
    %208 = arith.divf %206, %207 : vector<8x128xf32>
    %209 = math.tanh %203 : vector<8x128xf32>
    %210 = vector.extract_strided_slice %208 {offsets = [0, 0], sizes = [8, 32], strides = [1, 1]} : vector<8x128xf32> to vector<8x32xf32>
    %211 = vector.extract_strided_slice %208 {offsets = [0, 32], sizes = [8, 32], strides = [1, 1]} : vector<8x128xf32> to vector<8x32xf32>
    %212 = vector.extract_strided_slice %208 {offsets = [0, 96], sizes = [8, 32], strides = [1, 1]} : vector<8x128xf32> to vector<8x32xf32>
    %213 = vector.extract_strided_slice %209 {offsets = [0, 64], sizes = [8, 32], strides = [1, 1]} : vector<8x128xf32> to vector<8x32xf32>
    %214 = arith.mulf %211, %157 : vector<8x32xf32>
    %215 = arith.mulf %210, %213 : vector<8x32xf32>
    %216 = arith.addf %214, %215 : vector<8x32xf32>
    %217 = math.tanh %216 : vector<8x32xf32>
    %218 = arith.mulf %212, %217 : vector<8x32xf32>
    %cst_61 = arith.constant dense<0.000000e+00> : vector<8x128xf32>
    %219 = tpu.matmul %218, %1, %cst_61 {dimension_numbers = #tpu.dot_dimension_numbers<[1], [0], [0], [1], [0, 0, 1, 1], [], []>} : vector<8x32xf32>, vector<32x128xf32>, vector<8x128xf32> -> vector<8x128xf32>
    %cst_62 = arith.constant dense<0.000000e+00> : vector<8x128xf32>
    %220 = tpu.matmul %178, %4, %cst_62 {dimension_numbers = #tpu.dot_dimension_numbers<[1], [0], [0], [1], [0, 0, 1, 1], [], []>} : vector<8x32xf32>, vector<32x128xf32>, vector<8x128xf32> -> vector<8x128xf32>
    %221 = arith.addf %219, %220 : vector<8x128xf32>
    %222 = arith.addf %221, %11 : vector<8x128xf32>
    %223 = arith.negf %222 : vector<8x128xf32>
    %224 = math.exp %223 : vector<8x128xf32>
    %cst_63 = arith.constant 1.000000e+00 : f32
    %225 = vector.broadcast %cst_63 : f32 to vector<8x128xf32>
    %226 = arith.addf %225, %224 : vector<8x128xf32>
    %227 = arith.divf %225, %226 : vector<8x128xf32>
    %228 = math.tanh %222 : vector<8x128xf32>
    %229 = vector.extract_strided_slice %227 {offsets = [0, 0], sizes = [8, 32], strides = [1, 1]} : vector<8x128xf32> to vector<8x32xf32>
    %230 = vector.extract_strided_slice %227 {offsets = [0, 32], sizes = [8, 32], strides = [1, 1]} : vector<8x128xf32> to vector<8x32xf32>
    %231 = vector.extract_strided_slice %227 {offsets = [0, 96], sizes = [8, 32], strides = [1, 1]} : vector<8x128xf32> to vector<8x32xf32>
    %232 = vector.extract_strided_slice %228 {offsets = [0, 64], sizes = [8, 32], strides = [1, 1]} : vector<8x128xf32> to vector<8x32xf32>
    %233 = arith.mulf %230, %176 : vector<8x32xf32>
    %234 = arith.mulf %229, %232 : vector<8x32xf32>
    %235 = arith.addf %233, %234 : vector<8x32xf32>
    %236 = math.tanh %235 : vector<8x32xf32>
    %237 = arith.mulf %231, %236 : vector<8x32xf32>
    %cst_64 = arith.constant dense<0.000000e+00> : vector<8x128xf32>
    %238 = tpu.matmul %237, %2, %cst_64 {dimension_numbers = #tpu.dot_dimension_numbers<[1], [0], [0], [1], [0, 0, 1, 1], [], []>} : vector<8x32xf32>, vector<32x128xf32>, vector<8x128xf32> -> vector<8x128xf32>
    %cst_65 = arith.constant dense<0.000000e+00> : vector<8x128xf32>
    %239 = tpu.matmul %197, %5, %cst_65 {dimension_numbers = #tpu.dot_dimension_numbers<[1], [0], [0], [1], [0, 0, 1, 1], [], []>} : vector<8x32xf32>, vector<32x128xf32>, vector<8x128xf32> -> vector<8x128xf32>
    %240 = arith.addf %238, %239 : vector<8x128xf32>
    %241 = arith.addf %240, %14 : vector<8x128xf32>
    %242 = arith.negf %241 : vector<8x128xf32>
    %243 = math.exp %242 : vector<8x128xf32>
    %cst_66 = arith.constant 1.000000e+00 : f32
    %244 = vector.broadcast %cst_66 : f32 to vector<8x128xf32>
    %245 = arith.addf %244, %243 : vector<8x128xf32>
    %246 = arith.divf %244, %245 : vector<8x128xf32>
    %247 = math.tanh %241 : vector<8x128xf32>
    %248 = vector.extract_strided_slice %246 {offsets = [0, 0], sizes = [8, 32], strides = [1, 1]} : vector<8x128xf32> to vector<8x32xf32>
    %249 = vector.extract_strided_slice %246 {offsets = [0, 32], sizes = [8, 32], strides = [1, 1]} : vector<8x128xf32> to vector<8x32xf32>
    %250 = vector.extract_strided_slice %246 {offsets = [0, 96], sizes = [8, 32], strides = [1, 1]} : vector<8x128xf32> to vector<8x32xf32>
    %251 = vector.extract_strided_slice %247 {offsets = [0, 64], sizes = [8, 32], strides = [1, 1]} : vector<8x128xf32> to vector<8x32xf32>
    %252 = arith.mulf %249, %195 : vector<8x32xf32>
    %253 = arith.mulf %248, %251 : vector<8x32xf32>
    %254 = arith.addf %252, %253 : vector<8x32xf32>
    %255 = math.tanh %254 : vector<8x32xf32>
    %256 = arith.mulf %250, %255 : vector<8x32xf32>
    %c0_67 = arith.constant 0 : index
    %c4 = arith.constant 4 : index
    %c0_68 = arith.constant 0 : index
    %257 = vector.load %arg0[%c0_67, %c4, %c0_68] : memref<8x8x16xf32, #tpu.memory_space<vmem>>, vector<8x1x16xf32>
    %258 = vector.shape_cast %257 : vector<8x1x16xf32> to vector<8x16xf32>
    %cst_69 = arith.constant dense<0.000000e+00> : vector<8x128xf32>
    %259 = tpu.matmul %258, %0, %cst_69 {dimension_numbers = #tpu.dot_dimension_numbers<[1], [0], [0], [1], [0, 0, 1, 1], [], []>} : vector<8x16xf32>, vector<16x128xf32>, vector<8x128xf32> -> vector<8x128xf32>
    %cst_70 = arith.constant dense<0.000000e+00> : vector<8x128xf32>
    %260 = tpu.matmul %218, %3, %cst_70 {dimension_numbers = #tpu.dot_dimension_numbers<[1], [0], [0], [1], [0, 0, 1, 1], [], []>} : vector<8x32xf32>, vector<32x128xf32>, vector<8x128xf32> -> vector<8x128xf32>
    %261 = arith.addf %259, %260 : vector<8x128xf32>
    %262 = arith.addf %261, %8 : vector<8x128xf32>
    %263 = arith.negf %262 : vector<8x128xf32>
    %264 = math.exp %263 : vector<8x128xf32>
    %cst_71 = arith.constant 1.000000e+00 : f32
    %265 = vector.broadcast %cst_71 : f32 to vector<8x128xf32>
    %266 = arith.addf %265, %264 : vector<8x128xf32>
    %267 = arith.divf %265, %266 : vector<8x128xf32>
    %268 = math.tanh %262 : vector<8x128xf32>
    %269 = vector.extract_strided_slice %267 {offsets = [0, 0], sizes = [8, 32], strides = [1, 1]} : vector<8x128xf32> to vector<8x32xf32>
    %270 = vector.extract_strided_slice %267 {offsets = [0, 32], sizes = [8, 32], strides = [1, 1]} : vector<8x128xf32> to vector<8x32xf32>
    %271 = vector.extract_strided_slice %267 {offsets = [0, 96], sizes = [8, 32], strides = [1, 1]} : vector<8x128xf32> to vector<8x32xf32>
    %272 = vector.extract_strided_slice %268 {offsets = [0, 64], sizes = [8, 32], strides = [1, 1]} : vector<8x128xf32> to vector<8x32xf32>
    %273 = arith.mulf %270, %216 : vector<8x32xf32>
    %274 = arith.mulf %269, %272 : vector<8x32xf32>
    %275 = arith.addf %273, %274 : vector<8x32xf32>
    %276 = math.tanh %275 : vector<8x32xf32>
    %277 = arith.mulf %271, %276 : vector<8x32xf32>
    %cst_72 = arith.constant dense<0.000000e+00> : vector<8x128xf32>
    %278 = tpu.matmul %277, %1, %cst_72 {dimension_numbers = #tpu.dot_dimension_numbers<[1], [0], [0], [1], [0, 0, 1, 1], [], []>} : vector<8x32xf32>, vector<32x128xf32>, vector<8x128xf32> -> vector<8x128xf32>
    %cst_73 = arith.constant dense<0.000000e+00> : vector<8x128xf32>
    %279 = tpu.matmul %237, %4, %cst_73 {dimension_numbers = #tpu.dot_dimension_numbers<[1], [0], [0], [1], [0, 0, 1, 1], [], []>} : vector<8x32xf32>, vector<32x128xf32>, vector<8x128xf32> -> vector<8x128xf32>
    %280 = arith.addf %278, %279 : vector<8x128xf32>
    %281 = arith.addf %280, %11 : vector<8x128xf32>
    %282 = arith.negf %281 : vector<8x128xf32>
    %283 = math.exp %282 : vector<8x128xf32>
    %cst_74 = arith.constant 1.000000e+00 : f32
    %284 = vector.broadcast %cst_74 : f32 to vector<8x128xf32>
    %285 = arith.addf %284, %283 : vector<8x128xf32>
    %286 = arith.divf %284, %285 : vector<8x128xf32>
    %287 = math.tanh %281 : vector<8x128xf32>
    %288 = vector.extract_strided_slice %286 {offsets = [0, 0], sizes = [8, 32], strides = [1, 1]} : vector<8x128xf32> to vector<8x32xf32>
    %289 = vector.extract_strided_slice %286 {offsets = [0, 32], sizes = [8, 32], strides = [1, 1]} : vector<8x128xf32> to vector<8x32xf32>
    %290 = vector.extract_strided_slice %286 {offsets = [0, 96], sizes = [8, 32], strides = [1, 1]} : vector<8x128xf32> to vector<8x32xf32>
    %291 = vector.extract_strided_slice %287 {offsets = [0, 64], sizes = [8, 32], strides = [1, 1]} : vector<8x128xf32> to vector<8x32xf32>
    %292 = arith.mulf %289, %235 : vector<8x32xf32>
    %293 = arith.mulf %288, %291 : vector<8x32xf32>
    %294 = arith.addf %292, %293 : vector<8x32xf32>
    %295 = math.tanh %294 : vector<8x32xf32>
    %296 = arith.mulf %290, %295 : vector<8x32xf32>
    %cst_75 = arith.constant dense<0.000000e+00> : vector<8x128xf32>
    %297 = tpu.matmul %296, %2, %cst_75 {dimension_numbers = #tpu.dot_dimension_numbers<[1], [0], [0], [1], [0, 0, 1, 1], [], []>} : vector<8x32xf32>, vector<32x128xf32>, vector<8x128xf32> -> vector<8x128xf32>
    %cst_76 = arith.constant dense<0.000000e+00> : vector<8x128xf32>
    %298 = tpu.matmul %256, %5, %cst_76 {dimension_numbers = #tpu.dot_dimension_numbers<[1], [0], [0], [1], [0, 0, 1, 1], [], []>} : vector<8x32xf32>, vector<32x128xf32>, vector<8x128xf32> -> vector<8x128xf32>
    %299 = arith.addf %297, %298 : vector<8x128xf32>
    %300 = arith.addf %299, %14 : vector<8x128xf32>
    %301 = arith.negf %300 : vector<8x128xf32>
    %302 = math.exp %301 : vector<8x128xf32>
    %cst_77 = arith.constant 1.000000e+00 : f32
    %303 = vector.broadcast %cst_77 : f32 to vector<8x128xf32>
    %304 = arith.addf %303, %302 : vector<8x128xf32>
    %305 = arith.divf %303, %304 : vector<8x128xf32>
    %306 = math.tanh %300 : vector<8x128xf32>
    %307 = vector.extract_strided_slice %305 {offsets = [0, 0], sizes = [8, 32], strides = [1, 1]} : vector<8x128xf32> to vector<8x32xf32>
    %308 = vector.extract_strided_slice %305 {offsets = [0, 32], sizes = [8, 32], strides = [1, 1]} : vector<8x128xf32> to vector<8x32xf32>
    %309 = vector.extract_strided_slice %305 {offsets = [0, 96], sizes = [8, 32], strides = [1, 1]} : vector<8x128xf32> to vector<8x32xf32>
    %310 = vector.extract_strided_slice %306 {offsets = [0, 64], sizes = [8, 32], strides = [1, 1]} : vector<8x128xf32> to vector<8x32xf32>
    %311 = arith.mulf %308, %254 : vector<8x32xf32>
    %312 = arith.mulf %307, %310 : vector<8x32xf32>
    %313 = arith.addf %311, %312 : vector<8x32xf32>
    %314 = math.tanh %313 : vector<8x32xf32>
    %315 = arith.mulf %309, %314 : vector<8x32xf32>
    %c0_78 = arith.constant 0 : index
    %c5 = arith.constant 5 : index
    %c0_79 = arith.constant 0 : index
    %316 = vector.load %arg0[%c0_78, %c5, %c0_79] : memref<8x8x16xf32, #tpu.memory_space<vmem>>, vector<8x1x16xf32>
    %317 = vector.shape_cast %316 : vector<8x1x16xf32> to vector<8x16xf32>
    %cst_80 = arith.constant dense<0.000000e+00> : vector<8x128xf32>
    %318 = tpu.matmul %317, %0, %cst_80 {dimension_numbers = #tpu.dot_dimension_numbers<[1], [0], [0], [1], [0, 0, 1, 1], [], []>} : vector<8x16xf32>, vector<16x128xf32>, vector<8x128xf32> -> vector<8x128xf32>
    %cst_81 = arith.constant dense<0.000000e+00> : vector<8x128xf32>
    %319 = tpu.matmul %277, %3, %cst_81 {dimension_numbers = #tpu.dot_dimension_numbers<[1], [0], [0], [1], [0, 0, 1, 1], [], []>} : vector<8x32xf32>, vector<32x128xf32>, vector<8x128xf32> -> vector<8x128xf32>
    %320 = arith.addf %318, %319 : vector<8x128xf32>
    %321 = arith.addf %320, %8 : vector<8x128xf32>
    %322 = arith.negf %321 : vector<8x128xf32>
    %323 = math.exp %322 : vector<8x128xf32>
    %cst_82 = arith.constant 1.000000e+00 : f32
    %324 = vector.broadcast %cst_82 : f32 to vector<8x128xf32>
    %325 = arith.addf %324, %323 : vector<8x128xf32>
    %326 = arith.divf %324, %325 : vector<8x128xf32>
    %327 = math.tanh %321 : vector<8x128xf32>
    %328 = vector.extract_strided_slice %326 {offsets = [0, 0], sizes = [8, 32], strides = [1, 1]} : vector<8x128xf32> to vector<8x32xf32>
    %329 = vector.extract_strided_slice %326 {offsets = [0, 32], sizes = [8, 32], strides = [1, 1]} : vector<8x128xf32> to vector<8x32xf32>
    %330 = vector.extract_strided_slice %326 {offsets = [0, 96], sizes = [8, 32], strides = [1, 1]} : vector<8x128xf32> to vector<8x32xf32>
    %331 = vector.extract_strided_slice %327 {offsets = [0, 64], sizes = [8, 32], strides = [1, 1]} : vector<8x128xf32> to vector<8x32xf32>
    %332 = arith.mulf %329, %275 : vector<8x32xf32>
    %333 = arith.mulf %328, %331 : vector<8x32xf32>
    %334 = arith.addf %332, %333 : vector<8x32xf32>
    %335 = math.tanh %334 : vector<8x32xf32>
    %336 = arith.mulf %330, %335 : vector<8x32xf32>
    %cst_83 = arith.constant dense<0.000000e+00> : vector<8x128xf32>
    %337 = tpu.matmul %336, %1, %cst_83 {dimension_numbers = #tpu.dot_dimension_numbers<[1], [0], [0], [1], [0, 0, 1, 1], [], []>} : vector<8x32xf32>, vector<32x128xf32>, vector<8x128xf32> -> vector<8x128xf32>
    %cst_84 = arith.constant dense<0.000000e+00> : vector<8x128xf32>
    %338 = tpu.matmul %296, %4, %cst_84 {dimension_numbers = #tpu.dot_dimension_numbers<[1], [0], [0], [1], [0, 0, 1, 1], [], []>} : vector<8x32xf32>, vector<32x128xf32>, vector<8x128xf32> -> vector<8x128xf32>
    %339 = arith.addf %337, %338 : vector<8x128xf32>
    %340 = arith.addf %339, %11 : vector<8x128xf32>
    %341 = arith.negf %340 : vector<8x128xf32>
    %342 = math.exp %341 : vector<8x128xf32>
    %cst_85 = arith.constant 1.000000e+00 : f32
    %343 = vector.broadcast %cst_85 : f32 to vector<8x128xf32>
    %344 = arith.addf %343, %342 : vector<8x128xf32>
    %345 = arith.divf %343, %344 : vector<8x128xf32>
    %346 = math.tanh %340 : vector<8x128xf32>
    %347 = vector.extract_strided_slice %345 {offsets = [0, 0], sizes = [8, 32], strides = [1, 1]} : vector<8x128xf32> to vector<8x32xf32>
    %348 = vector.extract_strided_slice %345 {offsets = [0, 32], sizes = [8, 32], strides = [1, 1]} : vector<8x128xf32> to vector<8x32xf32>
    %349 = vector.extract_strided_slice %345 {offsets = [0, 96], sizes = [8, 32], strides = [1, 1]} : vector<8x128xf32> to vector<8x32xf32>
    %350 = vector.extract_strided_slice %346 {offsets = [0, 64], sizes = [8, 32], strides = [1, 1]} : vector<8x128xf32> to vector<8x32xf32>
    %351 = arith.mulf %348, %294 : vector<8x32xf32>
    %352 = arith.mulf %347, %350 : vector<8x32xf32>
    %353 = arith.addf %351, %352 : vector<8x32xf32>
    %354 = math.tanh %353 : vector<8x32xf32>
    %355 = arith.mulf %349, %354 : vector<8x32xf32>
    %cst_86 = arith.constant dense<0.000000e+00> : vector<8x128xf32>
    %356 = tpu.matmul %355, %2, %cst_86 {dimension_numbers = #tpu.dot_dimension_numbers<[1], [0], [0], [1], [0, 0, 1, 1], [], []>} : vector<8x32xf32>, vector<32x128xf32>, vector<8x128xf32> -> vector<8x128xf32>
    %cst_87 = arith.constant dense<0.000000e+00> : vector<8x128xf32>
    %357 = tpu.matmul %315, %5, %cst_87 {dimension_numbers = #tpu.dot_dimension_numbers<[1], [0], [0], [1], [0, 0, 1, 1], [], []>} : vector<8x32xf32>, vector<32x128xf32>, vector<8x128xf32> -> vector<8x128xf32>
    %358 = arith.addf %356, %357 : vector<8x128xf32>
    %359 = arith.addf %358, %14 : vector<8x128xf32>
    %360 = arith.negf %359 : vector<8x128xf32>
    %361 = math.exp %360 : vector<8x128xf32>
    %cst_88 = arith.constant 1.000000e+00 : f32
    %362 = vector.broadcast %cst_88 : f32 to vector<8x128xf32>
    %363 = arith.addf %362, %361 : vector<8x128xf32>
    %364 = arith.divf %362, %363 : vector<8x128xf32>
    %365 = math.tanh %359 : vector<8x128xf32>
    %366 = vector.extract_strided_slice %364 {offsets = [0, 0], sizes = [8, 32], strides = [1, 1]} : vector<8x128xf32> to vector<8x32xf32>
    %367 = vector.extract_strided_slice %364 {offsets = [0, 32], sizes = [8, 32], strides = [1, 1]} : vector<8x128xf32> to vector<8x32xf32>
    %368 = vector.extract_strided_slice %364 {offsets = [0, 96], sizes = [8, 32], strides = [1, 1]} : vector<8x128xf32> to vector<8x32xf32>
    %369 = vector.extract_strided_slice %365 {offsets = [0, 64], sizes = [8, 32], strides = [1, 1]} : vector<8x128xf32> to vector<8x32xf32>
    %370 = arith.mulf %367, %313 : vector<8x32xf32>
    %371 = arith.mulf %366, %369 : vector<8x32xf32>
    %372 = arith.addf %370, %371 : vector<8x32xf32>
    %373 = math.tanh %372 : vector<8x32xf32>
    %374 = arith.mulf %368, %373 : vector<8x32xf32>
    %c0_89 = arith.constant 0 : index
    %c6 = arith.constant 6 : index
    %c0_90 = arith.constant 0 : index
    %375 = vector.load %arg0[%c0_89, %c6, %c0_90] : memref<8x8x16xf32, #tpu.memory_space<vmem>>, vector<8x1x16xf32>
    %376 = vector.shape_cast %375 : vector<8x1x16xf32> to vector<8x16xf32>
    %cst_91 = arith.constant dense<0.000000e+00> : vector<8x128xf32>
    %377 = tpu.matmul %376, %0, %cst_91 {dimension_numbers = #tpu.dot_dimension_numbers<[1], [0], [0], [1], [0, 0, 1, 1], [], []>} : vector<8x16xf32>, vector<16x128xf32>, vector<8x128xf32> -> vector<8x128xf32>
    %cst_92 = arith.constant dense<0.000000e+00> : vector<8x128xf32>
    %378 = tpu.matmul %336, %3, %cst_92 {dimension_numbers = #tpu.dot_dimension_numbers<[1], [0], [0], [1], [0, 0, 1, 1], [], []>} : vector<8x32xf32>, vector<32x128xf32>, vector<8x128xf32> -> vector<8x128xf32>
    %379 = arith.addf %377, %378 : vector<8x128xf32>
    %380 = arith.addf %379, %8 : vector<8x128xf32>
    %381 = arith.negf %380 : vector<8x128xf32>
    %382 = math.exp %381 : vector<8x128xf32>
    %cst_93 = arith.constant 1.000000e+00 : f32
    %383 = vector.broadcast %cst_93 : f32 to vector<8x128xf32>
    %384 = arith.addf %383, %382 : vector<8x128xf32>
    %385 = arith.divf %383, %384 : vector<8x128xf32>
    %386 = math.tanh %380 : vector<8x128xf32>
    %387 = vector.extract_strided_slice %385 {offsets = [0, 0], sizes = [8, 32], strides = [1, 1]} : vector<8x128xf32> to vector<8x32xf32>
    %388 = vector.extract_strided_slice %385 {offsets = [0, 32], sizes = [8, 32], strides = [1, 1]} : vector<8x128xf32> to vector<8x32xf32>
    %389 = vector.extract_strided_slice %385 {offsets = [0, 96], sizes = [8, 32], strides = [1, 1]} : vector<8x128xf32> to vector<8x32xf32>
    %390 = vector.extract_strided_slice %386 {offsets = [0, 64], sizes = [8, 32], strides = [1, 1]} : vector<8x128xf32> to vector<8x32xf32>
    %391 = arith.mulf %388, %334 : vector<8x32xf32>
    %392 = arith.mulf %387, %390 : vector<8x32xf32>
    %393 = arith.addf %391, %392 : vector<8x32xf32>
    %394 = math.tanh %393 : vector<8x32xf32>
    %395 = arith.mulf %389, %394 : vector<8x32xf32>
    %cst_94 = arith.constant dense<0.000000e+00> : vector<8x128xf32>
    %396 = tpu.matmul %395, %1, %cst_94 {dimension_numbers = #tpu.dot_dimension_numbers<[1], [0], [0], [1], [0, 0, 1, 1], [], []>} : vector<8x32xf32>, vector<32x128xf32>, vector<8x128xf32> -> vector<8x128xf32>
    %cst_95 = arith.constant dense<0.000000e+00> : vector<8x128xf32>
    %397 = tpu.matmul %355, %4, %cst_95 {dimension_numbers = #tpu.dot_dimension_numbers<[1], [0], [0], [1], [0, 0, 1, 1], [], []>} : vector<8x32xf32>, vector<32x128xf32>, vector<8x128xf32> -> vector<8x128xf32>
    %398 = arith.addf %396, %397 : vector<8x128xf32>
    %399 = arith.addf %398, %11 : vector<8x128xf32>
    %400 = arith.negf %399 : vector<8x128xf32>
    %401 = math.exp %400 : vector<8x128xf32>
    %cst_96 = arith.constant 1.000000e+00 : f32
    %402 = vector.broadcast %cst_96 : f32 to vector<8x128xf32>
    %403 = arith.addf %402, %401 : vector<8x128xf32>
    %404 = arith.divf %402, %403 : vector<8x128xf32>
    %405 = math.tanh %399 : vector<8x128xf32>
    %406 = vector.extract_strided_slice %404 {offsets = [0, 0], sizes = [8, 32], strides = [1, 1]} : vector<8x128xf32> to vector<8x32xf32>
    %407 = vector.extract_strided_slice %404 {offsets = [0, 32], sizes = [8, 32], strides = [1, 1]} : vector<8x128xf32> to vector<8x32xf32>
    %408 = vector.extract_strided_slice %404 {offsets = [0, 96], sizes = [8, 32], strides = [1, 1]} : vector<8x128xf32> to vector<8x32xf32>
    %409 = vector.extract_strided_slice %405 {offsets = [0, 64], sizes = [8, 32], strides = [1, 1]} : vector<8x128xf32> to vector<8x32xf32>
    %410 = arith.mulf %407, %353 : vector<8x32xf32>
    %411 = arith.mulf %406, %409 : vector<8x32xf32>
    %412 = arith.addf %410, %411 : vector<8x32xf32>
    %413 = math.tanh %412 : vector<8x32xf32>
    %414 = arith.mulf %408, %413 : vector<8x32xf32>
    %cst_97 = arith.constant dense<0.000000e+00> : vector<8x128xf32>
    %415 = tpu.matmul %414, %2, %cst_97 {dimension_numbers = #tpu.dot_dimension_numbers<[1], [0], [0], [1], [0, 0, 1, 1], [], []>} : vector<8x32xf32>, vector<32x128xf32>, vector<8x128xf32> -> vector<8x128xf32>
    %cst_98 = arith.constant dense<0.000000e+00> : vector<8x128xf32>
    %416 = tpu.matmul %374, %5, %cst_98 {dimension_numbers = #tpu.dot_dimension_numbers<[1], [0], [0], [1], [0, 0, 1, 1], [], []>} : vector<8x32xf32>, vector<32x128xf32>, vector<8x128xf32> -> vector<8x128xf32>
    %417 = arith.addf %415, %416 : vector<8x128xf32>
    %418 = arith.addf %417, %14 : vector<8x128xf32>
    %419 = arith.negf %418 : vector<8x128xf32>
    %420 = math.exp %419 : vector<8x128xf32>
    %cst_99 = arith.constant 1.000000e+00 : f32
    %421 = vector.broadcast %cst_99 : f32 to vector<8x128xf32>
    %422 = arith.addf %421, %420 : vector<8x128xf32>
    %423 = arith.divf %421, %422 : vector<8x128xf32>
    %424 = math.tanh %418 : vector<8x128xf32>
    %425 = vector.extract_strided_slice %423 {offsets = [0, 0], sizes = [8, 32], strides = [1, 1]} : vector<8x128xf32> to vector<8x32xf32>
    %426 = vector.extract_strided_slice %423 {offsets = [0, 32], sizes = [8, 32], strides = [1, 1]} : vector<8x128xf32> to vector<8x32xf32>
    %427 = vector.extract_strided_slice %423 {offsets = [0, 96], sizes = [8, 32], strides = [1, 1]} : vector<8x128xf32> to vector<8x32xf32>
    %428 = vector.extract_strided_slice %424 {offsets = [0, 64], sizes = [8, 32], strides = [1, 1]} : vector<8x128xf32> to vector<8x32xf32>
    %429 = arith.mulf %426, %372 : vector<8x32xf32>
    %430 = arith.mulf %425, %428 : vector<8x32xf32>
    %431 = arith.addf %429, %430 : vector<8x32xf32>
    %432 = math.tanh %431 : vector<8x32xf32>
    %433 = arith.mulf %427, %432 : vector<8x32xf32>
    %c0_100 = arith.constant 0 : index
    %c7 = arith.constant 7 : index
    %c0_101 = arith.constant 0 : index
    %434 = vector.load %arg0[%c0_100, %c7, %c0_101] : memref<8x8x16xf32, #tpu.memory_space<vmem>>, vector<8x1x16xf32>
    %435 = vector.shape_cast %434 : vector<8x1x16xf32> to vector<8x16xf32>
    %cst_102 = arith.constant dense<0.000000e+00> : vector<8x128xf32>
    %436 = tpu.matmul %435, %0, %cst_102 {dimension_numbers = #tpu.dot_dimension_numbers<[1], [0], [0], [1], [0, 0, 1, 1], [], []>} : vector<8x16xf32>, vector<16x128xf32>, vector<8x128xf32> -> vector<8x128xf32>
    %cst_103 = arith.constant dense<0.000000e+00> : vector<8x128xf32>
    %437 = tpu.matmul %395, %3, %cst_103 {dimension_numbers = #tpu.dot_dimension_numbers<[1], [0], [0], [1], [0, 0, 1, 1], [], []>} : vector<8x32xf32>, vector<32x128xf32>, vector<8x128xf32> -> vector<8x128xf32>
    %438 = arith.addf %436, %437 : vector<8x128xf32>
    %439 = arith.addf %438, %8 : vector<8x128xf32>
    %440 = arith.negf %439 : vector<8x128xf32>
    %441 = math.exp %440 : vector<8x128xf32>
    %cst_104 = arith.constant 1.000000e+00 : f32
    %442 = vector.broadcast %cst_104 : f32 to vector<8x128xf32>
    %443 = arith.addf %442, %441 : vector<8x128xf32>
    %444 = arith.divf %442, %443 : vector<8x128xf32>
    %445 = math.tanh %439 : vector<8x128xf32>
    %446 = vector.extract_strided_slice %444 {offsets = [0, 0], sizes = [8, 32], strides = [1, 1]} : vector<8x128xf32> to vector<8x32xf32>
    %447 = vector.extract_strided_slice %444 {offsets = [0, 32], sizes = [8, 32], strides = [1, 1]} : vector<8x128xf32> to vector<8x32xf32>
    %448 = vector.extract_strided_slice %444 {offsets = [0, 96], sizes = [8, 32], strides = [1, 1]} : vector<8x128xf32> to vector<8x32xf32>
    %449 = vector.extract_strided_slice %445 {offsets = [0, 64], sizes = [8, 32], strides = [1, 1]} : vector<8x128xf32> to vector<8x32xf32>
    %450 = arith.mulf %447, %393 : vector<8x32xf32>
    %451 = arith.mulf %446, %449 : vector<8x32xf32>
    %452 = arith.addf %450, %451 : vector<8x32xf32>
    %453 = math.tanh %452 : vector<8x32xf32>
    %454 = arith.mulf %448, %453 : vector<8x32xf32>
    %cst_105 = arith.constant dense<0.000000e+00> : vector<8x128xf32>
    %455 = tpu.matmul %454, %1, %cst_105 {dimension_numbers = #tpu.dot_dimension_numbers<[1], [0], [0], [1], [0, 0, 1, 1], [], []>} : vector<8x32xf32>, vector<32x128xf32>, vector<8x128xf32> -> vector<8x128xf32>
    %cst_106 = arith.constant dense<0.000000e+00> : vector<8x128xf32>
    %456 = tpu.matmul %414, %4, %cst_106 {dimension_numbers = #tpu.dot_dimension_numbers<[1], [0], [0], [1], [0, 0, 1, 1], [], []>} : vector<8x32xf32>, vector<32x128xf32>, vector<8x128xf32> -> vector<8x128xf32>
    %457 = arith.addf %455, %456 : vector<8x128xf32>
    %458 = arith.addf %457, %11 : vector<8x128xf32>
    %459 = arith.negf %458 : vector<8x128xf32>
    %460 = math.exp %459 : vector<8x128xf32>
    %cst_107 = arith.constant 1.000000e+00 : f32
    %461 = vector.broadcast %cst_107 : f32 to vector<8x128xf32>
    %462 = arith.addf %461, %460 : vector<8x128xf32>
    %463 = arith.divf %461, %462 : vector<8x128xf32>
    %464 = math.tanh %458 : vector<8x128xf32>
    %465 = vector.extract_strided_slice %463 {offsets = [0, 0], sizes = [8, 32], strides = [1, 1]} : vector<8x128xf32> to vector<8x32xf32>
    %466 = vector.extract_strided_slice %463 {offsets = [0, 32], sizes = [8, 32], strides = [1, 1]} : vector<8x128xf32> to vector<8x32xf32>
    %467 = vector.extract_strided_slice %463 {offsets = [0, 96], sizes = [8, 32], strides = [1, 1]} : vector<8x128xf32> to vector<8x32xf32>
    %468 = vector.extract_strided_slice %464 {offsets = [0, 64], sizes = [8, 32], strides = [1, 1]} : vector<8x128xf32> to vector<8x32xf32>
    %469 = arith.mulf %466, %412 : vector<8x32xf32>
    %470 = arith.mulf %465, %468 : vector<8x32xf32>
    %471 = arith.addf %469, %470 : vector<8x32xf32>
    %472 = math.tanh %471 : vector<8x32xf32>
    %473 = arith.mulf %467, %472 : vector<8x32xf32>
    %cst_108 = arith.constant dense<0.000000e+00> : vector<8x128xf32>
    %474 = tpu.matmul %473, %2, %cst_108 {dimension_numbers = #tpu.dot_dimension_numbers<[1], [0], [0], [1], [0, 0, 1, 1], [], []>} : vector<8x32xf32>, vector<32x128xf32>, vector<8x128xf32> -> vector<8x128xf32>
    %cst_109 = arith.constant dense<0.000000e+00> : vector<8x128xf32>
    %475 = tpu.matmul %433, %5, %cst_109 {dimension_numbers = #tpu.dot_dimension_numbers<[1], [0], [0], [1], [0, 0, 1, 1], [], []>} : vector<8x32xf32>, vector<32x128xf32>, vector<8x128xf32> -> vector<8x128xf32>
    %476 = arith.addf %474, %475 : vector<8x128xf32>
    %477 = arith.addf %476, %14 : vector<8x128xf32>
    %478 = arith.negf %477 : vector<8x128xf32>
    %479 = math.exp %478 : vector<8x128xf32>
    %cst_110 = arith.constant 1.000000e+00 : f32
    %480 = vector.broadcast %cst_110 : f32 to vector<8x128xf32>
    %481 = arith.addf %480, %479 : vector<8x128xf32>
    %482 = arith.divf %480, %481 : vector<8x128xf32>
    %483 = math.tanh %477 : vector<8x128xf32>
    %484 = vector.extract_strided_slice %482 {offsets = [0, 0], sizes = [8, 32], strides = [1, 1]} : vector<8x128xf32> to vector<8x32xf32>
    %485 = vector.extract_strided_slice %482 {offsets = [0, 32], sizes = [8, 32], strides = [1, 1]} : vector<8x128xf32> to vector<8x32xf32>
    %486 = vector.extract_strided_slice %482 {offsets = [0, 96], sizes = [8, 32], strides = [1, 1]} : vector<8x128xf32> to vector<8x32xf32>
    %487 = vector.extract_strided_slice %483 {offsets = [0, 64], sizes = [8, 32], strides = [1, 1]} : vector<8x128xf32> to vector<8x32xf32>
    %488 = arith.mulf %485, %431 : vector<8x32xf32>
    %489 = arith.mulf %484, %487 : vector<8x32xf32>
    %490 = arith.addf %488, %489 : vector<8x32xf32>
    %491 = math.tanh %490 : vector<8x32xf32>
    %492 = arith.mulf %486, %491 : vector<8x32xf32>
    %c0_111 = arith.constant 0 : index
    %c0_112 = arith.constant 0 : index
    %493 = vector.load %arg10[%c0_111, %c0_112] : memref<32x8xf32, #tpu.memory_space<vmem>>, vector<32x8xf32>
    %cst_113 = arith.constant dense<0.000000e+00> : vector<8x8xf32>
    %494 = tpu.matmul %492, %493, %cst_113 {dimension_numbers = #tpu.dot_dimension_numbers<[1], [0], [0], [1], [0, 0, 1, 1], [], []>} : vector<8x32xf32>, vector<32x8xf32>, vector<8x8xf32> -> vector<8x8xf32>
    %c0_114 = arith.constant 0 : index
    %c0_115 = arith.constant 0 : index
    %495 = vector.load %arg11[%c0_114, %c0_115] : memref<1x8xf32, #tpu.memory_space<vmem>>, vector<1x8xf32>
    %496 = vector.broadcast %495 : vector<1x8xf32> to vector<8x8xf32>
    %497 = arith.addf %494, %496 : vector<8x8xf32>
    %c0_116 = arith.constant 0 : index
    %c0_117 = arith.constant 0 : index
    %498 = vector.load %arg12[%c0_116, %c0_117] : memref<8x8xf32, #tpu.memory_space<vmem>>, vector<8x8xf32>
    tpu.vector_store %arg12[%c0_116, %c0_117], %497 {strides = array<i32>} : memref<8x8xf32, #tpu.memory_space<vmem>>, vector<8x8xf32>,
    return
  }
}

</mosaic_0001>

<bundles_post_ra>
// kernel: tpu_custom_call.1
= control target key start
LH: loop header
LB: loop body
LE: loop exit
PB: predicated region body
PF: predicated region fallthrough
CT: control target
= control target key end

     0   :  { %17 = vsyncpa [#allocation3], 0  ;;  %s3723_s0 = inlined_call_operand.hbm [shape: f32[8,8,16], index: 0, kind: input, shape index: {}]   ;;  %s3724_s1 = inlined_call_operand.hbm [shape: f32[16,128], index: 1, kind: input, shape index: {}]   ;;  %s3725_s2 = inlined_call_operand.vmem [shape: f32[32,128], index: 2, kind: input, shape index: {}]   ;;  %s3726_s3 = inlined_call_operand.vmem [shape: f32[1,128], index: 3, kind: input, shape index: {}]   ;;  %s3727_s4 = inlined_call_operand.hbm [shape: f32[32,128], index: 4, kind: input, shape index: {}]   ;;  %s3728_s5 = inlined_call_operand.hbm [shape: f32[32,128], index: 5, kind: input, shape index: {}]   ;;  %s3729_s6 = inlined_call_operand.vmem [shape: f32[1,128], index: 6, kind: input, shape index: {}]   ;;  %s3730_s7 = inlined_call_operand.hbm [shape: f32[32,128], index: 7, kind: input, shape index: {}]   ;;  %s3731_s8 = inlined_call_operand.hbm [shape: f32[32,128], index: 8, kind: input, shape index: {}]   ;;  %s3732_s9 = inlined_call_operand.vmem [shape: f32[1,128], index: 9, kind: input, shape index: {}]   ;;  %s3733_s10 = inlined_call_operand.vmem [shape: f32[32,8], index: 10, kind: input, shape index: {}]   ;;  %s3734_s11 = inlined_call_operand.vmem [shape: f32[1,8], index: 11, kind: input, shape index: {}]   ;;  %s3735_s12 = inlined_call_operand.hbm [shape: f32[8,8], index: 12, kind: output, shape index: {}]  }
   0x1   :  { %18 = vsyncpa [#allocation6], 0 }
   0x2   :  { %19 = vsyncpa [#allocation9], 0 }
   0x3   :  { %20 = vsyncpa [#allocation12], 0 }
   0x4   :  { %21 = vsyncpa [#allocation4], 0  ;;  %s39_s23 = sshll.u32 %s3724_s1, 4  ;;  %s2962_s24 = smov [#allocation5]   ;;  %s40_s23 = int_to_ptr.hbm [resolvable:$true] %s39_s23 }
   0x5   :  { %s41_s25 = sshll.u32 %s2962_s24, 4  ;;  %s69_s28 = sshll.u32 %s3728_s5, 4  ;;  %s42_s25 = int_to_ptr.vmem [resolvable:$true] %s41_s25  ;;  %s70_s28 = int_to_ptr.hbm [resolvable:$true] %s69_s28 }
   0x6   :  { %s2963_s29 = smov 128   ;;  %s2964_s30 = smov 8  }
   0x7   :  { %47 = dma.hbm_to_vmem [thread:$0]  %s40_s23, 256, %s42_s25, [#allocation6], %s2963_s29, %s2963_s29, %s2964_s30  }
   0x8   :  { %s2965_s13 = smov [#allocation8]   ;;  %s26_s1 = sshll.u32 %s3723_s0, 4  ;;  %s27_s1 = int_to_ptr.hbm [resolvable:$true] %s26_s1 }
   0x9   :  { %s71_s14 = sshll.u32 %s2965_s13, 4  ;;  %s56_s18 = sshll.u32 %s3727_s4, 4  ;;  %s72_s14 = int_to_ptr.vmem [resolvable:$true] %s71_s14  ;;  %s57_s18 = int_to_ptr.hbm [resolvable:$true] %s56_s18 }
   0xa   :  { %77 = dma.hbm_to_vmem [thread:$0]  %s70_s28, 512, %s72_s14, [#allocation9], %s2963_s29, %s2963_s29, %s2964_s30  }
   0xb   :  { %s2966_s19 = smov [#allocation2]   ;;  %s2967_s21 = smov [#allocation7]  }
   0xc   :  { %s28_s20 = sshll.u32 %s2966_s19, 4  ;;  %s58_s0 = sshll.u32 %s2967_s21, 4  ;;  %s29_s20 = int_to_ptr.vmem [resolvable:$true] %s28_s20  ;;  %s59_s0 = int_to_ptr.vmem [resolvable:$true] %s58_s0 }
   0xd   :  { %34 = dma.hbm_to_vmem [thread:$0]  %s27_s1, 1024, %s29_s20, [#allocation3], %s2963_s29, %s2963_s29, %s2964_s30  }
   0xe   :  { %s84_s24 = sshll.u32 %s3730_s7, 4  ;;  %s97_s26 = sshll.u32 %s3731_s8, 4  ;;  %s85_s24 = int_to_ptr.hbm [resolvable:$true] %s84_s24  ;;  %s98_s26 = int_to_ptr.hbm [resolvable:$true] %s97_s26 }
   0xf   :  { %64 = dma.hbm_to_vmem [thread:$0]  %s57_s18, 512, %s59_s0, [#allocation6], %s2963_s29, %s2963_s29, %s2964_s30  }
  0x10   :  { %s2968_s27 = smov [#allocation10]   ;;  %s2969_s13 = smov [#allocation11]  }
  0x11   :  { %s86_s28 = sshll.u32 %s2968_s27, 4  ;;  %s99_s7 = sshll.u32 %s2969_s13, 4  ;;  %s87_s28 = int_to_ptr.vmem [resolvable:$true] %s86_s28  ;;  %s100_s7 = int_to_ptr.vmem [resolvable:$true] %s99_s7 }
  0x12   :  { %92 = dma.hbm_to_vmem [thread:$0]  %s85_s24, 512, %s87_s28, [#allocation9], %s2963_s29, %s2963_s29, %s2964_s30  }
  0x13   :  { %105 = dma.hbm_to_vmem [thread:$0]  %s98_s26, 512, %s100_s7, [#allocation12], %s2963_s29, %s2963_s29, %s2964_s30  }
  0x14   :  { %2952 = dma.done.wait [#allocation3], 1024  }
  0x15   :  { %2953 = vsyncadd [#allocation3], 4294966272 }
  0x16   :  { %2954 = dma.done.wait [#allocation6], 768  }
  0x17   :  { %2955 = vsyncadd [#allocation6], 4294966528 }
  0x18   :  { %2956 = dma.done.wait [#allocation9], 1024  }
  0x19   :  { %2957 = vsyncadd [#allocation9], 4294966272 }
  0x1a   :  { %2958 = dma.done.wait [#allocation12], 512  }
  0x1b   :  { %2959 = vsyncadd [#allocation12], 4294966784  ;;  %v3078_v0 = vld [vmem:[%s3725_s2 + $0x18] sm:$0xff]  ;;  %v3083_v1 = vld [vmem:[%s3725_s2 + $0x10] sm:$0xff]  ;;  %vm211_vm0 = vcmask 1041409   ;;  %vm214_vm1 = vcmask 1042434  }
  0x1c   :  { %194 = vmatpush.msra.mxu0 %v3078_v0  ;;  %v3089_v2 = vld [vmem:[%s3725_s2 + $0x8] sm:$0xff]  ;;  %v3093_v4 = vld [vmem:[#allocation5] sm:$0xff]  ;;  %v172_v7 = vld [vmem:[#allocation2 + $0x10] sm:$0x1]  ;;  %vm217_vm2 = vcmask 1043459   ;;  %vm220_vm3 = vcmask 1044484  }
  0x1d   :  { %v3091_v3 = vld [vmem:[#allocation5 + $0x8] sm:$0xff]  ;;  %v170_v5 = vld [vmem:[#allocation2] sm:$0x1]  ;;  %v173_v8 = vld [vmem:[#allocation2 + $0x18] sm:$0x1]  ;;  %v213_v14 = vrot.slane %v172_v7, 6 }
  0x1e   :  { %248 = vmatpush.msra.mxu1 %v3091_v3  ;;  %v171_v6 = vld [vmem:[#allocation2 + $0x8] sm:$0x1]  ;;  %195 = vmatpush.msra.mxu0 %v3083_v1  ;;  %v174_v9 = vld [vmem:[#allocation2 + $0x20] sm:$0x1]  ;;  %v176_v12 = vld [vmem:[#allocation2 + $0x30] sm:$0x1] }
  0x1f   :  { %v175_v10 = vld [vmem:[#allocation2 + $0x28] sm:$0x1]  ;;  %v3100_v11 = vld [vmem:[%s3725_s2] sm:$0xff]  ;;  %v210_v13 = vrot.slane %v171_v6, 7  ;;  %v177_v15 = vld [vmem:[#allocation2 + $0x38] sm:$0x1] }
  0x20   :  { %249 = vmatpush.msra.mxu1 %v3093_v4  ;;  %196 = vmatpush.msra.mxu0 %v3089_v2  ;;  %v216_v16 = vrot.slane %v173_v8, 5  ;;  %v219_v17 = vrot.slane %v174_v9, 4  ;;  %v222_v19 = vrot.slane %v175_v10, 3  ;;  %vm223_vm4 = vcmask 1045509   ;;  %v3117_v30 = vld [vmem:[%s3726_s3] ss:$0 sm:$0xff] }
  0x21   :  { %v212_v18 = vsel %vm211_vm0, %v210_v13, %v170_v5  ;;  %v225_v21 = vrot.slane %v176_v12, 2  ;;  %v2970_v22 = vmov 0.0   ;;  %vm226_vm5 = vcmask 1046534   ;;  %s2971_s19 = smov 64   ;;  %s2972_s20 = smov 32   ;;  %v3126_v54 = vld [vmem:[#allocation8 + $0x18] sm:$0xff] }
  0x22   :  { %197 = vmatpush.msra.mxu0 %v3100_v11  ;;  %v215_v20 = vsel %vm214_vm1, %v213_v14, %v212_v18  ;;  %v228_v24 = vrot.slane %v177_v15, 1  ;;  %vm229_vm6 = vcmask 1047559   ;;  %vm3736_vm7 = vcmask 130048   ;;  %v3128_v55 = vld [vmem:[#allocation8 + $0x10] sm:$0xff]  ;;  %304 = vmatpush.msra.mxu2 %v3126_v54  ;;  %v3131_v56 = vld [vmem:[#allocation7 + $0x18] sm:$0xff]  ;;  %v3135_v58 = vld [vmem:[#allocation8 + $0x8] sm:$0xff] }
  0x23   :  { %198 = vmatmul.f32.vlgmr.msra.gmra.mxu0 %v2970_v22  ;;  %v218_v23 = vsel %vm217_vm2, %v216_v16, %v215_v20  ;;  %v3133_v57 = vld [vmem:[#allocation7 + $0x10] sm:$0xff]  ;;  %329 = vmatpush.msra.mxu3 %v3131_v56  ;;  %v3139_v59 = vld [vmem:[#allocation7 + $0x8] sm:$0xff]  ;;  %v3141_v60 = vld [vmem:[#allocation8] sm:$0xff]  ;;  %vm178_vm12 = vcmask 261120   ;;  %s2973_s23 = smov [#allocation13]   ;;  %s2467_s26 = sshll.u32 %s3735_s12, 4  ;;  %s2468_s26 = int_to_ptr.hbm [resolvable:$true] %s2467_s26 }
  0x24   :  { %v221_v25 = vsel %vm220_vm3, %v219_v17, %v218_v23  ;;  %305 = vmatpush.msra.mxu2 %v3128_v55  ;;  %v3145_v61 = vld [vmem:[#allocation7] sm:$0xff]  ;;  %v459_v5 = vld [vmem:[#allocation2 + $0x9] sm:$0x1]  ;;  %v458_v8 = vld [vmem:[#allocation2 + $0x1] sm:$0x1]  ;;  %s2465_s24 = sshll.u32 %s2973_s23, 4  ;;  %s2466_s24 = int_to_ptr.vmem [resolvable:$true] %s2465_s24 }
  0x25   :  { %v224_v26 = vsel %vm223_vm4, %v222_v19, %v221_v25  ;;  %330 = vmatpush.msra.mxu3 %v3133_v57  ;;  %v460_v6 = vld [vmem:[#allocation2 + $0x11] sm:$0x1]  ;;  %v494_v7 = vrot.slane %v459_v5, 7  ;;  %v461_v9 = vld [vmem:[#allocation2 + $0x19] sm:$0x1] }
  0x26   :  { %v227_v27 = vsel %vm226_vm5, %v225_v21, %v224_v26  ;;  %306 = vmatpush.msra.mxu2 %v3135_v58  ;;  %v496_v10 = vrot.slane %v460_v6, 6  ;;  %v462_v13 = vld [vmem:[#allocation2 + $0x21] sm:$0x1]  ;;  %v498_v14 = vrot.slane %v461_v9, 5  ;;  %v463_v16 = vld [vmem:[#allocation2 + $0x29] sm:$0x1] }
  0x27   :  { %v230_v28 = vsel %vm229_vm6, %v228_v24, %v227_v27  ;;  %331 = vmatpush.msra.mxu3 %v3139_v59  ;;  %v495_v12 = vsel %vm211_vm0, %v494_v7, %v458_v8  ;;  %v500_v17 = vrot.slane %v462_v13, 4  ;;  %v464_v19 = vld [vmem:[#allocation2 + $0x31] sm:$0x1]  ;;  %v502_v20 = vrot.slane %v463_v16, 3  ;;  %v465_v23 = vld [vmem:[#allocation2 + $0x39] sm:$0x1] }
  0x28   :  { %2480 = vmatmul.msk.f32.vlgmr.msra.gmra.mxu1 %vm3736_vm7, %v230_v28  ;;  %307 = vmatpush.msra.mxu2 %v3141_v60  ;;  %v497_v15 = vsel %vm214_vm1, %v496_v10, %v495_v12  ;;  %v504_v24 = vrot.slane %v464_v19, 2  ;;  %v506_v27 = vrot.slane %v465_v23, 1 }
  0x29   :  { %308 = vmatmul.f32.vlgmr.msra.gmra.mxu2 %v2970_v22  ;;  %332 = vmatpush.msra.mxu3 %v3145_v61  ;;  %v499_v18 = vsel %vm217_vm2, %v498_v14, %v497_v15 }
  0x2a   :  { %478 = vmatpush.msrb.mxu2 %v3078_v0  ;;  %v501_v21 = vsel %vm220_vm3, %v500_v17, %v499_v18 }
  0x2b   :  { %524 = vmatpush.msrb.mxu3 %v3091_v3  ;;  %v503_v26 = vsel %vm223_vm4, %v502_v20, %v501_v21 }
  0x2c   :  { %479 = vmatpush.msrb.mxu2 %v3083_v1  ;;  %v505_v28 = vsel %vm226_vm5, %v504_v24, %v503_v26 }
  0x2d   :  { %525 = vmatpush.msrb.mxu3 %v3093_v4 }
  0x2e   :  { %480 = vmatpush.msrb.mxu2 %v3089_v2 }
  0x30   :  { %481 = vmatpush.msrb.mxu2 %v3100_v11 }
  0xa0   :  { %v199_v29 = vpop.f32.mrf.mxu0 }
  0xa5   :  { %v251_v31 = vpop.f32.mrf.mxu1 }
  0xa6   :  { %v252_v32 = vadd.f32 %v251_v31, %v199_v29  ;;  %v507_v29 = vsel %vm229_vm6, %v506_v27, %v505_v28 }
  0xa8   :  { %v254_v33 = vadd.f32 %v3117_v30, %v252_v32  ;;  %v3171_v32 = vld [vmem:[%s3729_s6] ss:$0 sm:$0xff] }
  0xaa   :  { %2566 = vtanh.f32 %v254_v33  ;;  %v2481_v35 = vmul.f32 -1.442695, %v254_v33 }
  0xac   :  { %2568 = vpow2.f32 %v2481_v35  ;;  %v309_v31 = vpop.f32.mrf.mxu2 }
  0xb0   :  { %v2567_v34 = vpop.eup %2566 }
  0xb1   :  { %277 = vrot.lane.b32.xlu0 %v2567_v34, %s2971_s19 }
  0xb2   :  { %v2569_v36 = vpop.eup %2568 }
  0xb3   :  { %v258_v37 = vadd.f32 1.0, %v2569_v36 }
  0xb5   :  { %2570 = vrcp.f32 %v258_v37  ;;  %v270_v43 = vand.u32 2147483648, %v258_v37  ;;  %vm264_vm9 = vweird.f32 %v258_v37  ;;  %v268_v44 = vand.u32 2147483647, %v258_v37 }
  0xb7   :  { %v271_v46 = vor.u32 1.1754944e-38, %v270_v43  ;;  %vm269_vm11 = vcmp.eq.f32.partialorder %v268_v44, 8.507059e+37 }
  0xbb   :  { %v2571_v38 = vpop.eup %2570 }
  0xbc   :  { %v260_v39 = vmul.f32 %v2571_v38, %v258_v37  ;;  %vm265_vm8 = vweird.f32 %v2571_v38 }
  0xbd   :  { %vm266_vm10 = vmor %vm264_vm9, %vm265_vm8 }
  0xbe   :  { %v261_v40 = vsub.f32 1.0, %v260_v39 }
  0xc0   :  { %v262_v41 = vmul.f32 %v2571_v38, %v261_v40 }
  0xc2   :  { %v263_v42 = vadd.f32 %v2571_v38, %v262_v41 }
  0xc4   :  { %v267_v45 = vsel %vm266_vm10, %v2571_v38, %v263_v42 }
  0xc5   :  { %v272_v48 = vsel %vm269_vm11, %v271_v46, %v267_v45 }
  0xc6   :  { %v275_v50 = vmul.f32 0.0, %v272_v48 }
 0x123   :  { %v278_v47 = vpop.permute.xlu0 %277 }
 0x124   :  { %v280_v49 = vmul.f32 %v278_v47, %v272_v48 }
 0x126   :  { %282 = vrot.lane.b32.xlu0 %v280_v49, %s2972_s20 }
 0x198   :  { %v283_v51 = vpop.permute.xlu0 %282 }
 0x199   :  { %v3122_v52 = vadd.f32 %v283_v51, %v275_v50 }
 0x19b   :  { %2572 = vtanh.f32 %v3122_v52 }
 0x1a1   :  { %v2573_v53 = vpop.eup %2572 }
 0x1a2   :  { %288 = vrot.lane.b32.xlu1 %v2573_v53, %s2971_s19 }
 0x214   :  { %v289_v62 = vpop.permute.xlu1 %288 }
 0x215   :  { %v291_v63 = vmul.f32 %v289_v62, %v272_v48 }
 0x217   :  { %313 = vrot.lane.b32.xlu1 %v291_v63, %s2972_s20 }
 0x289   :  { %v314_v25 = vpop.permute.xlu1 %313 }
 0x28a   :  { %2482 = vmatmul.msk.f32.vlgmr.msra.gmra.mxu3 %vm178_vm12, %v314_v25  ;;  %2486 = vmatmul.msk.f32.vlgmr.msrb.gmra.mxu2 %vm178_vm12, %v314_v25 }
 0x292   :  { %2487 = vmatmul.msk.f32.vlgmr.msrb.gmra.mxu3 %vm3736_vm7, %v507_v29 }
 0x30d   :  { %v334_v33 = vpop.f32.mrf.mxu3  ;;  %v483_v36 = vpop.f32.mrf.mxu2 }
 0x30e   :  { %v335_v34 = vadd.f32 %v334_v33, %v309_v31 }
 0x310   :  { %v337_v35 = vadd.f32 %v3171_v32, %v335_v34 }
 0x312   :  { %2574 = vtanh.f32 %v337_v35  ;;  %v2483_v42 = vmul.f32 -1.442695, %v337_v35 }
 0x315   :  { %v527_v37 = vpop.f32.mrf.mxu3 }
 0x316   :  { %v528_v38 = vadd.f32 %v527_v37, %v483_v36  ;;  %v3193_v36 = vld [vmem:[#allocation11 + $0x18] sm:$0xff]  ;;  %v3195_v37 = vld [vmem:[#allocation11 + $0x10] sm:$0xff] }
 0x317   :  { %387 = vmatpush.msrb.mxu1 %v3193_v36  ;;  %668 = vmatpush.msra.mxu2 %v3193_v36 }
 0x318   :  { %v2575_v39 = vpop.eup %2574  ;;  %v530_v40 = vadd.f32 %v3117_v30, %v528_v38  ;;  %v3200_v38 = vld [vmem:[#allocation10 + $0x10] sm:$0xff] }
 0x319   :  { %360 = vrot.lane.b32.xlu2 %v2575_v39, %s2971_s19  ;;  %v3203_v39 = vld [vmem:[#allocation11 + $0x8] sm:$0xff]  ;;  %388 = vmatpush.msrb.mxu1 %v3195_v37 }
 0x31a   :  { %2576 = vtanh.f32 %v530_v40  ;;  %v2488_v43 = vmul.f32 -1.442695, %v530_v40  ;;  %v3208_v40 = vld [vmem:[#allocation10 + $0x8] sm:$0xff]  ;;  %669 = vmatpush.msra.mxu2 %v3195_v37 }
 0x31b   :  { %2578 = vpow2.f32 %v2483_v42  ;;  %389 = vmatpush.msrb.mxu1 %v3203_v39  ;;  %v3216_v42 = vld [vmem:[#allocation10] sm:$0xff] }
 0x31c   :  { %2580 = vpow2.f32 %v2488_v43  ;;  %670 = vmatpush.msra.mxu2 %v3203_v39 }
 0x320   :  { %v2577_v41 = vpop.eup %2576 }
 0x321   :  { %553 = vrot.lane.b32.xlu2 %v2577_v41, %s2971_s19  ;;  %v2579_v44 = vpop.eup %2578  ;;  %v3211_v41 = vld [vmem:[#allocation11] sm:$0xff] }
 0x322   :  { %v341_v45 = vadd.f32 1.0, %v2579_v44  ;;  %v2581_v46 = vpop.eup %2580  ;;  %390 = vmatpush.msrb.mxu1 %v3211_v41  ;;  %671 = vmatpush.msra.mxu2 %v3211_v41  ;;  %v740_v44 = vld [vmem:[#allocation2 + $0xa] sm:$0x1] }
 0x323   :  { %v534_v47 = vadd.f32 1.0, %v2581_v46  ;;  %391 = vmatmul.f32.vlgmr.msrb.gmra.mxu1 %v2970_v22  ;;  %v775_v46 = vrot.slane %v740_v44, 7 }
 0x324   :  { %2582 = vrcp.f32 %v341_v45  ;;  %v353_v6 = vand.u32 2147483648, %v341_v45  ;;  %vm347_vm14 = vweird.f32 %v341_v45  ;;  %v351_v7 = vand.u32 2147483647, %v341_v45  ;;  %580 = vmatpush.msra.mxu1 %v3126_v54  ;;  %861 = vmatpush.msrb.mxu2 %v3126_v54 }
 0x325   :  { %2584 = vrcp.f32 %v534_v47  ;;  %v546_v16 = vand.u32 2147483648, %v534_v47  ;;  %vm540_vm10 = vweird.f32 %v534_v47  ;;  %v544_v17 = vand.u32 2147483647, %v534_v47 }
 0x326   :  { %v354_v10 = vor.u32 1.1754944e-38, %v353_v6  ;;  %vm352_vm8 = vcmp.eq.f32.partialorder %v351_v7, 8.507059e+37  ;;  %581 = vmatpush.msra.mxu1 %v3128_v55  ;;  %862 = vmatpush.msrb.mxu2 %v3128_v55 }
 0x327   :  { %v547_v19 = vor.u32 1.1754944e-38, %v546_v16  ;;  %vm545_vm7 = vcmp.eq.f32.partialorder %v544_v17, 8.507059e+37 }
 0x328   :  { %582 = vmatpush.msra.mxu1 %v3135_v58  ;;  %863 = vmatpush.msrb.mxu2 %v3135_v58 }
 0x32a   :  { %v2583_v48 = vpop.eup %2582  ;;  %583 = vmatpush.msra.mxu1 %v3141_v60  ;;  %864 = vmatpush.msrb.mxu2 %v3141_v60 }
 0x32b   :  { %v343_v49 = vmul.f32 %v2583_v48, %v341_v45  ;;  %v2585_v51 = vpop.eup %2584  ;;  %vm348_vm13 = vweird.f32 %v2583_v48  ;;  %v741_v45 = vld [vmem:[#allocation2 + $0x12] sm:$0x1] }
 0x32c   :  { %v536_v62 = vmul.f32 %v2585_v51, %v534_v47  ;;  %vm349_vm15 = vmor %vm347_vm14, %vm348_vm13  ;;  %vm541_vm9 = vweird.f32 %v2585_v51  ;;  %759 = vmatpush.msrb.mxu1 %v3078_v0  ;;  %v739_v47 = vld [vmem:[#allocation2 + $0x2] sm:$0x1] }
 0x32d   :  { %v344_v50 = vsub.f32 1.0, %v343_v49  ;;  %vm542_vm11 = vmor %vm540_vm10, %vm541_vm9  ;;  %v777_v49 = vrot.slane %v741_v45, 6 }
 0x32e   :  { %v537_v5 = vsub.f32 1.0, %v536_v62  ;;  %760 = vmatpush.msrb.mxu1 %v3083_v1 }
 0x32f   :  { %v345_v53 = vmul.f32 %v2583_v48, %v344_v50  ;;  %v776_v50 = vsel %vm211_vm0, %v775_v46, %v739_v47 }
 0x330   :  { %v538_v9 = vmul.f32 %v2585_v51, %v537_v5  ;;  %761 = vmatpush.msrb.mxu1 %v3089_v2  ;;  %v778_v62 = vsel %vm214_vm1, %v777_v49, %v776_v50  ;;  %v744_v5 = vld [vmem:[#allocation2 + $0x2a] sm:$0x1] }
 0x331   :  { %v346_v63 = vadd.f32 %v2583_v48, %v345_v53 }
 0x332   :  { %v539_v15 = vadd.f32 %v2585_v51, %v538_v9  ;;  %762 = vmatpush.msrb.mxu1 %v3100_v11  ;;  %v783_v9 = vrot.slane %v744_v5, 3 }
 0x333   :  { %v350_v8 = vsel %vm349_vm15, %v2583_v48, %v346_v63  ;;  %v742_v48 = vld [vmem:[#allocation2 + $0x1a] sm:$0x1] }
 0x334   :  { %v355_v13 = vsel %vm352_vm8, %v354_v10, %v350_v8  ;;  %v543_v18 = vsel %vm542_vm11, %v2585_v51, %v539_v15  ;;  %v743_v51 = vld [vmem:[#allocation2 + $0x22] sm:$0x1]  ;;  %v779_v53 = vrot.slane %v742_v48, 5  ;;  %v745_v8 = vld [vmem:[#allocation2 + $0x32] sm:$0x1] }
 0x335   :  { %v3178_v20 = vsel %vm545_vm7, %v547_v19, %v543_v18  ;;  %v358_v24 = vmul.f32 0.0, %v355_v13  ;;  %v781_v6 = vrot.slane %v743_v51, 4  ;;  %vm3737_vm7 = vcmask 130048  }
 0x336   :  { %v551_v27 = vmul.f32 %v3178_v20, %v3122_v52  ;;  %v3198_v52 = vld [vmem:[#allocation10 + $0x18] sm:$0xff]  ;;  %v780_v7 = vsel %vm217_vm2, %v779_v53, %v778_v62 }
 0x337   :  { %412 = vmatpush.msrb.mxu0 %v3198_v52  ;;  %693 = vmatpush.msra.mxu3 %v3198_v52  ;;  %v782_v10 = vsel %vm220_vm3, %v781_v6, %v780_v7 }
 0x338   :  { %v784_v15 = vsel %vm223_vm4, %v783_v9, %v782_v10 }
 0x339   :  { %413 = vmatpush.msrb.mxu0 %v3200_v38  ;;  %694 = vmatpush.msra.mxu3 %v3200_v38 }
 0x33b   :  { %414 = vmatpush.msrb.mxu0 %v3208_v40  ;;  %695 = vmatpush.msra.mxu3 %v3208_v40 }
 0x33d   :  { %415 = vmatpush.msrb.mxu0 %v3216_v42  ;;  %696 = vmatpush.msra.mxu3 %v3216_v42 }
 0x33f   :  { %605 = vmatpush.msra.mxu0 %v3131_v56  ;;  %886 = vmatpush.msrb.mxu3 %v3131_v56 }
 0x341   :  { %606 = vmatpush.msra.mxu0 %v3133_v57  ;;  %887 = vmatpush.msrb.mxu3 %v3133_v57 }
 0x343   :  { %607 = vmatpush.msra.mxu0 %v3139_v59  ;;  %888 = vmatpush.msrb.mxu3 %v3139_v59 }
 0x345   :  { %608 = vmatpush.msra.mxu0 %v3145_v61  ;;  %889 = vmatpush.msrb.mxu3 %v3145_v61 }
 0x373   :  { %v361_v12 = vpop.permute.xlu2 %360 }
 0x374   :  { %v363_v14 = vmul.f32 %v361_v12, %v355_v13  ;;  %v746_v12 = vld [vmem:[#allocation2 + $0x3a] sm:$0x1] }
 0x375   :  { %v787_v16 = vrot.slane %v746_v12, 1 }
 0x376   :  { %365 = vrot.lane.b32.xlu0 %v363_v14, %s2972_s20 }
 0x37b   :  { %v554_v21 = vpop.permute.xlu2 %553 }
 0x37c   :  { %v556_v23 = vmul.f32 %v554_v21, %v3178_v20 }
 0x37e   :  { %558 = vrot.lane.b32.xlu1 %v556_v23, %s2972_s20 }
 0x3a0   :  { %v392_v19 = vpop.f32.mrf.mxu1 }
 0x3e8   :  { %v366_v25 = vpop.permute.xlu0 %365 }
 0x3e9   :  { %v3182_v26 = vadd.f32 %v366_v25, %v358_v24 }
 0x3eb   :  { %2586 = vtanh.f32 %v3182_v26 }
 0x3f0   :  { %v559_v28 = vpop.permute.xlu1 %558 }
 0x3f1   :  { %v2587_v29 = vpop.eup %2586  ;;  %v3187_v31 = vadd.f32 %v559_v28, %v551_v27 }
 0x3f2   :  { %371 = vrot.lane.b32.xlu2 %v2587_v29, %s2971_s19 }
 0x3f3   :  { %2588 = vtanh.f32 %v3187_v31 }
 0x3f9   :  { %v2589_v33 = vpop.eup %2588 }
 0x3fa   :  { %564 = vrot.lane.b32.xlu0 %v2589_v33, %s2971_s19 }
 0x44c   :  { %v372_v34 = vpop.permute.xlu2 %371 }
 0x44d   :  { %v374_v35 = vmul.f32 %v372_v34, %v355_v13  ;;  %v785_v13 = vrot.slane %v745_v8, 2 }
 0x44f   :  { %396 = vrot.lane.b32.xlu1 %v374_v35, %s2972_s20  ;;  %v786_v17 = vsel %vm226_vm5, %v785_v13, %v784_v15 }
 0x450   :  { %v788_v18 = vsel %vm229_vm6, %v787_v16, %v786_v17 }
 0x46c   :  { %v565_v22 = vpop.permute.xlu0 %564 }
 0x46d   :  { %v567_v43 = vmul.f32 %v565_v22, %v3178_v20  ;;  %v3281_v20 = vld [vmem:[%s3732_s9] ss:$0 sm:$0xff] }
 0x46f   :  { %589 = vrot.lane.b32.xlu2 %v567_v43, %s2972_s20 }
 0x4c1   :  { %v397_v63 = vpop.permute.xlu1 %396 }
 0x4c2   :  { %2484 = vmatmul.msk.f32.vlgmr.msrb.gmra.mxu0 %vm178_vm12, %v397_v63  ;;  %2489 = vmatmul.msk.f32.vlgmr.msra.gmra.mxu1 %vm178_vm12, %v397_v63 }
 0x4c3   :  { %805 = vmatpush.msrb.mxu0 %v3091_v3  ;;  %949 = vmatpush.msra.mxu1 %v3193_v36 }
 0x4c5   :  { %806 = vmatpush.msrb.mxu0 %v3093_v4  ;;  %950 = vmatpush.msra.mxu1 %v3195_v37 }
 0x4c7   :  { %951 = vmatpush.msra.mxu1 %v3203_v39 }
 0x4c9   :  { %v590_v14 = vpop.permute.xlu2 %589  ;;  %952 = vmatpush.msra.mxu1 %v3211_v41 }
 0x4ca   :  { %2490 = vmatmul.msk.f32.vlgmr.msra.gmra.mxu0 %vm178_vm12, %v590_v14  ;;  %2495 = vmatmul.msk.f32.vlgmr.msrb.gmra.mxu1 %vm178_vm12, %v590_v14 }
 0x4cb   :  { %974 = vmatpush.msra.mxu0 %v3198_v52  ;;  %1142 = vmatpush.msrb.mxu1 %v3126_v54 }
 0x4cd   :  { %975 = vmatpush.msra.mxu0 %v3200_v38  ;;  %1143 = vmatpush.msrb.mxu1 %v3128_v55 }
 0x4cf   :  { %976 = vmatpush.msra.mxu0 %v3208_v40  ;;  %1144 = vmatpush.msrb.mxu1 %v3135_v58 }
 0x4d1   :  { %977 = vmatpush.msra.mxu0 %v3216_v42  ;;  %1145 = vmatpush.msrb.mxu1 %v3141_v60 }
 0x4d2   :  { %2496 = vmatmul.msk.f32.vlgmr.msrb.gmra.mxu0 %vm3737_vm7, %v788_v18 }
 0x4d3   :  { %1167 = vmatpush.msrb.mxu0 %v3131_v56 }
 0x4d5   :  { %1168 = vmatpush.msrb.mxu0 %v3133_v57 }
 0x4d7   :  { %1169 = vmatpush.msrb.mxu0 %v3139_v59 }
 0x4d9   :  { %1170 = vmatpush.msrb.mxu0 %v3145_v61 }
 0x53f   :  { %v417_v21 = vpop.f32.mrf.mxu0  ;;  %v585_v25 = vpop.f32.mrf.mxu1 }
 0x540   :  { %v418_v23 = vadd.f32 %v417_v21, %v392_v19 }
 0x542   :  { %v420_v24 = vadd.f32 %v3281_v20, %v418_v23 }
 0x544   :  { %2590 = vtanh.f32 %v420_v24  ;;  %v2485_v47 = vmul.f32 -1.442695, %v420_v24 }
 0x547   :  { %v610_v27 = vpop.f32.mrf.mxu0  ;;  %v764_v34 = vpop.f32.mrf.mxu1 }
 0x548   :  { %v611_v28 = vadd.f32 %v610_v27, %v585_v25 }
 0x54a   :  { %v2591_v29 = vpop.eup %2590  ;;  %v613_v33 = vadd.f32 %v3171_v32, %v611_v28 }
 0x54b   :  { %443 = vrot.lane.b32.xlu0 %v2591_v29, %s2971_s19 }
 0x54c   :  { %2592 = vtanh.f32 %v613_v33  ;;  %v2491_v50 = vmul.f32 -1.442695, %v613_v33 }
 0x54f   :  { %v808_v35 = vpop.f32.mrf.mxu0 }
 0x550   :  { %v809_v22 = vadd.f32 %v808_v35, %v764_v34 }
 0x552   :  { %v2593_v43 = vpop.eup %2592  ;;  %v811_v44 = vadd.f32 %v3117_v30, %v809_v22 }
 0x553   :  { %636 = vrot.lane.b32.xlu1 %v2593_v43, %s2971_s19 }
 0x554   :  { %2594 = vtanh.f32 %v811_v44  ;;  %v2497_v46 = vmul.f32 -1.442695, %v811_v44 }
 0x556   :  { %2596 = vpow2.f32 %v2497_v46 }
 0x557   :  { %2598 = vpow2.f32 %v2485_v47 }
 0x55a   :  { %v2595_v45 = vpop.eup %2594 }
 0x55b   :  { %834 = vrot.lane.b32.xlu2 %v2595_v45, %s2971_s19 }
 0x55c   :  { %v2597_v48 = vpop.eup %2596 }
 0x55d   :  { %v815_v49 = vadd.f32 1.0, %v2597_v48  ;;  %v2599_v51 = vpop.eup %2598 }
 0x55e   :  { %v424_v53 = vadd.f32 1.0, %v2599_v51 }
 0x55f   :  { %2600 = vrcp.f32 %v815_v49  ;;  %v827_v15 = vand.u32 2147483648, %v815_v49  ;;  %vm821_vm14 = vweird.f32 %v815_v49  ;;  %v825_v16 = vand.u32 2147483647, %v815_v49 }
 0x560   :  { %2602 = vpow2.f32 %v2491_v50  ;;  %v436_v29 = vand.u32 2147483648, %v424_v53  ;;  %vm430_vm10 = vweird.f32 %v424_v53  ;;  %v434_v33 = vand.u32 2147483647, %v424_v53 }
 0x561   :  { %2604 = vrcp.f32 %v424_v53  ;;  %v828_v21 = vor.u32 1.1754944e-38, %v827_v15  ;;  %vm826_vm8 = vcmp.eq.f32.partialorder %v825_v16, 8.507059e+37 }
 0x562   :  { %v437_v22 = vor.u32 1.1754944e-38, %v436_v29  ;;  %vm435_vm7 = vcmp.eq.f32.partialorder %v434_v33, 8.507059e+37  ;;  %v1020_v29 = vld [vmem:[#allocation2 + $0x3] sm:$0x1] }
 0x565   :  { %v2601_v62 = vpop.eup %2600 }
 0x566   :  { %v2603_v63 = vpop.eup %2602  ;;  %v817_v5 = vmul.f32 %v2601_v62, %v815_v49  ;;  %vm822_vm13 = vweird.f32 %v2601_v62 }
 0x567   :  { %v617_v6 = vadd.f32 1.0, %v2603_v63  ;;  %v2605_v8 = vpop.eup %2604  ;;  %vm823_vm15 = vmor %vm821_vm14, %vm822_vm13 }
 0x568   :  { %v818_v7 = vsub.f32 1.0, %v817_v5  ;;  %v426_v10 = vmul.f32 %v2605_v8, %v424_v53  ;;  %vm431_vm9 = vweird.f32 %v2605_v8 }
 0x569   :  { %2606 = vrcp.f32 %v617_v6  ;;  %vm432_vm11 = vmor %vm430_vm10, %vm431_vm9  ;;  %v629_v47 = vand.u32 2147483648, %v617_v6  ;;  %vm623_vm14 = vweird.f32 %v617_v6  ;;  %v627_v48 = vand.u32 2147483647, %v617_v6 }
 0x56a   :  { %v819_v9 = vmul.f32 %v2601_v62, %v818_v7  ;;  %v427_v13 = vsub.f32 1.0, %v426_v10  ;;  %vm3738_vm9 = vcmask 130048  }
 0x56b   :  { %v630_v50 = vor.u32 1.1754944e-38, %v629_v47  ;;  %v1027_v47 = vld [vmem:[#allocation2 + $0x3b] sm:$0x1] }
 0x56c   :  { %v820_v12 = vadd.f32 %v2601_v62, %v819_v9  ;;  %v428_v18 = vmul.f32 %v2605_v8, %v427_v13 }
 0x56e   :  { %v824_v17 = vsel %vm823_vm15, %v2601_v62, %v820_v12  ;;  %v429_v27 = vadd.f32 %v2605_v8, %v428_v18 }
 0x56f   :  { %v2607_v14 = vpop.eup %2606  ;;  %v829_v24 = vsel %vm826_vm8, %v828_v21, %v824_v17  ;;  %vm628_vm8 = vcmp.eq.f32.partialorder %v627_v48, 8.507059e+37 }
 0x570   :  { %v619_v19 = vmul.f32 %v2607_v14, %v617_v6  ;;  %v433_v34 = vsel %vm432_vm11, %v2605_v8, %v429_v27  ;;  %vm624_vm13 = vweird.f32 %v2607_v14  ;;  %v832_v63 = vmul.f32 %v829_v24, %v3187_v31  ;;  %v1022_v27 = vld [vmem:[#allocation2 + $0x13] sm:$0x1] }
 0x571   :  { %v438_v44 = vsel %vm435_vm7, %v437_v22, %v433_v34  ;;  %vm625_vm15 = vmor %vm623_vm14, %vm624_vm13  ;;  %v1058_v33 = vrot.slane %v1022_v27, 6 }
 0x572   :  { %v620_v28 = vsub.f32 1.0, %v619_v19  ;;  %v441_v6 = vmul.f32 0.0, %v438_v44 }
 0x574   :  { %v621_v35 = vmul.f32 %v2607_v14, %v620_v28 }
 0x576   :  { %v622_v46 = vadd.f32 %v2607_v14, %v621_v35  ;;  %v1024_v35 = vld [vmem:[#allocation2 + $0x23] sm:$0x1] }
 0x578   :  { %v626_v49 = vsel %vm625_vm15, %v2607_v14, %v622_v46 }
 0x579   :  { %v631_v53 = vsel %vm628_vm8, %v630_v50, %v626_v49 }
 0x57a   :  { %v634_v12 = vmul.f32 %v631_v53, %v3182_v26 }
 0x5b5   :  { %v835_v23 = vpop.permute.xlu2 %834 }
 0x5b6   :  { %v837_v25 = vmul.f32 %v835_v23, %v829_v24  ;;  %v1021_v23 = vld [vmem:[#allocation2 + $0xb] sm:$0x1] }
 0x5b7   :  { %v1056_v28 = vrot.slane %v1021_v23, 7 }
 0x5b8   :  { %839 = vrot.lane.b32.xlu2 %v837_v25, %s2972_s20 }
 0x5b9   :  { %v1057_v34 = vsel %vm211_vm0, %v1056_v28, %v1020_v29 }
 0x5bd   :  { %v444_v43 = vpop.permute.xlu0 %443 }
 0x5be   :  { %v446_v45 = vmul.f32 %v444_v43, %v438_v44  ;;  %v1059_v43 = vsel %vm214_vm1, %v1058_v33, %v1057_v34 }
 0x5c0   :  { %448 = vrot.lane.b32.xlu0 %v446_v45, %s2972_s20  ;;  %v1062_v45 = vrot.slane %v1024_v35, 4 }
 0x5c5   :  { %v637_v51 = vpop.permute.xlu1 %636 }
 0x5c6   :  { %v639_v62 = vmul.f32 %v637_v51, %v631_v53 }
 0x5c8   :  { %641 = vrot.lane.b32.xlu1 %v639_v62, %s2972_s20 }
 0x612   :  { %v840_v5 = vpop.permute.xlu2 %839 }
 0x613   :  { %v3293_v7 = vadd.f32 %v840_v5, %v832_v63 }
 0x615   :  { %2608 = vtanh.f32 %v3293_v7 }
 0x61b   :  { %v2609_v8 = vpop.eup %2608 }
 0x61c   :  { %845 = vrot.lane.b32.xlu2 %v2609_v8, %s2971_s19 }
 0x632   :  { %v449_v9 = vpop.permute.xlu0 %448 }
 0x633   :  { %v3297_v10 = vadd.f32 %v449_v9, %v441_v6 }
 0x635   :  { %2610 = vtanh.f32 %v3297_v10 }
 0x63a   :  { %v642_v13 = vpop.permute.xlu1 %641 }
 0x63b   :  { %v2611_v14 = vpop.eup %2610  ;;  %v3301_v15 = vadd.f32 %v642_v13, %v634_v12 }
 0x63c   :  { %454 = vrot.lane.b32.xlu0 %v2611_v14, %s2971_s19 }
 0x63d   :  { %2612 = vtanh.f32 %v3301_v15 }
 0x643   :  { %v2613_v31 = vpop.eup %2612 }
 0x644   :  { %647 = vrot.lane.b32.xlu1 %v2613_v31, %s2971_s19 }
 0x676   :  { %v846_v16 = vpop.permute.xlu2 %845 }
 0x677   :  { %v848_v17 = vmul.f32 %v846_v16, %v829_v24  ;;  %v1023_v24 = vld [vmem:[#allocation2 + $0x1b] sm:$0x1] }
 0x678   :  { %v1060_v22 = vrot.slane %v1023_v24, 5 }
 0x679   :  { %870 = vrot.lane.b32.xlu2 %v848_v17, %s2972_s20 }
 0x6ae   :  { %v455_v18 = vpop.permute.xlu0 %454 }
 0x6af   :  { %v457_v19 = vmul.f32 %v455_v18, %v438_v44 }
 0x6b1   :  { %652 = vrot.lane.b32.xlu0 %v457_v19, %s2972_s20 }
 0x6b6   :  { %v648_v26 = vpop.permute.xlu1 %647 }
 0x6b7   :  { %v650_v21 = vmul.f32 %v648_v26, %v631_v53 }
 0x6b9   :  { %677 = vrot.lane.b32.xlu1 %v650_v21, %s2972_s20 }
 0x6d3   :  { %v871_v49 = vpop.permute.xlu2 %870 }
 0x723   :  { %v653_v25 = vpop.permute.xlu0 %652 }
 0x724   :  { %2492 = vmatmul.msk.f32.vlgmr.msra.gmra.mxu2 %vm178_vm12, %v653_v25 }
 0x725   :  { %1040 = vmatpush.msra.mxu2 %v3078_v0  ;;  %v1025_v0 = vld [vmem:[#allocation2 + $0x2b] sm:$0x1] }
 0x726   :  { %v1064_v46 = vrot.slane %v1025_v0, 3 }
 0x727   :  { %1041 = vmatpush.msra.mxu2 %v3083_v1  ;;  %v1061_v1 = vsel %vm217_vm2, %v1060_v22, %v1059_v43 }
 0x729   :  { %1042 = vmatpush.msra.mxu2 %v3089_v2  ;;  %v1026_v2 = vld [vmem:[#allocation2 + $0x33] sm:$0x1] }
 0x72a   :  { %v1066_v48 = vrot.slane %v1026_v2, 2 }
 0x72b   :  { %v678_v44 = vpop.permute.xlu1 %677  ;;  %1043 = vmatpush.msra.mxu2 %v3100_v11  ;;  %v1063_v11 = vsel %vm220_vm3, %v1062_v45, %v1061_v1 }
 0x72c   :  { %2493 = vmatmul.msk.f32.vlgmr.msra.gmra.mxu3 %vm178_vm12, %v678_v44  ;;  %2498 = vmatmul.msk.f32.vlgmr.msrb.gmra.mxu2 %vm178_vm12, %v678_v44  ;;  %v1065_v50 = vsel %vm223_vm4, %v1064_v46, %v1063_v11 }
 0x72d   :  { %1086 = vmatpush.msra.mxu3 %v3091_v3  ;;  %1230 = vmatpush.msrb.mxu2 %v3193_v36  ;;  %v1068_v3 = vrot.slane %v1027_v47, 1 }
 0x72f   :  { %1087 = vmatpush.msra.mxu3 %v3093_v4  ;;  %1231 = vmatpush.msrb.mxu2 %v3195_v37  ;;  %v1067_v4 = vsel %vm226_vm5, %v1066_v48, %v1065_v50 }
 0x730   :  { %v1069_v51 = vsel %vm229_vm6, %v1068_v3, %v1067_v4 }
 0x731   :  { %1232 = vmatpush.msrb.mxu2 %v3203_v39 }
 0x733   :  { %1233 = vmatpush.msrb.mxu2 %v3211_v41 }
 0x734   :  { %2499 = vmatmul.msk.f32.vlgmr.msrb.gmra.mxu3 %vm178_vm12, %v871_v49  ;;  %2504 = vmatmul.msk.f32.vlgmr.msra.gmra.mxu2 %vm178_vm12, %v871_v49 }
 0x735   :  { %1255 = vmatpush.msrb.mxu3 %v3198_v52  ;;  %1423 = vmatpush.msra.mxu2 %v3126_v54 }
 0x737   :  { %1256 = vmatpush.msrb.mxu3 %v3200_v38  ;;  %1424 = vmatpush.msra.mxu2 %v3128_v55 }
 0x739   :  { %1257 = vmatpush.msrb.mxu3 %v3208_v40  ;;  %1425 = vmatpush.msra.mxu2 %v3135_v58 }
 0x73b   :  { %1258 = vmatpush.msrb.mxu3 %v3216_v42  ;;  %1426 = vmatpush.msra.mxu2 %v3141_v60 }
 0x73c   :  { %2505 = vmatmul.msk.f32.vlgmr.msra.gmra.mxu3 %vm3738_vm9, %v1069_v51 }
 0x73d   :  { %1448 = vmatpush.msra.mxu3 %v3131_v56 }
 0x73f   :  { %1449 = vmatpush.msra.mxu3 %v3133_v57 }
 0x741   :  { %1450 = vmatpush.msra.mxu3 %v3139_v59 }
 0x743   :  { %1451 = vmatpush.msra.mxu3 %v3145_v61 }
 0x7a7   :  { %v673_v54 = vpop.f32.mrf.mxu2 }
 0x7af   :  { %v698_v55 = vpop.f32.mrf.mxu3  ;;  %v866_v58 = vpop.f32.mrf.mxu2 }
 0x7b0   :  { %v699_v53 = vadd.f32 %v698_v55, %v673_v54 }
 0x7b2   :  { %v701_v62 = vadd.f32 %v3281_v20, %v699_v53 }
 0x7b4   :  { %2614 = vtanh.f32 %v701_v62  ;;  %v2494_v13 = vmul.f32 -1.442695, %v701_v62 }
 0x7b7   :  { %v891_v63 = vpop.f32.mrf.mxu3  ;;  %v1045_v56 = vpop.f32.mrf.mxu2 }
 0x7b8   :  { %v892_v5 = vadd.f32 %v891_v63, %v866_v58 }
 0x7ba   :  { %v2615_v60 = vpop.eup %2614  ;;  %v894_v8 = vadd.f32 %v3171_v32, %v892_v5 }
 0x7bb   :  { %724 = vrot.lane.b32.xlu0 %v2615_v60, %s2971_s19 }
 0x7bc   :  { %2616 = vtanh.f32 %v894_v8  ;;  %v2500_v31 = vmul.f32 -1.442695, %v894_v8 }
 0x7bf   :  { %v1089_v57 = vpop.f32.mrf.mxu3 }
 0x7c0   :  { %v1090_v59 = vadd.f32 %v1089_v57, %v1045_v56 }
 0x7c2   :  { %v2617_v6 = vpop.eup %2616  ;;  %v1092_v61 = vadd.f32 %v3117_v30, %v1090_v59 }
 0x7c3   :  { %917 = vrot.lane.b32.xlu1 %v2617_v6, %s2971_s19 }
 0x7c4   :  { %2618 = vtanh.f32 %v1092_v61  ;;  %v2506_v12 = vmul.f32 -1.442695, %v1092_v61 }
 0x7c6   :  { %2620 = vpow2.f32 %v2506_v12 }
 0x7c7   :  { %2622 = vpow2.f32 %v2494_v13 }
 0x7ca   :  { %v2619_v9 = vpop.eup %2618 }
 0x7cb   :  { %1115 = vrot.lane.b32.xlu2 %v2619_v9, %s2971_s19 }
 0x7cc   :  { %v2621_v14 = vpop.eup %2620 }
 0x7cd   :  { %v1096_v32 = vadd.f32 1.0, %v2621_v14  ;;  %v2623_v16 = vpop.eup %2622 }
 0x7ce   :  { %v705_v17 = vadd.f32 1.0, %v2623_v16 }
 0x7cf   :  { %2624 = vrcp.f32 %v1096_v32  ;;  %v1108_v33 = vand.u32 2147483648, %v1096_v32  ;;  %vm1102_vm11 = vweird.f32 %v1096_v32  ;;  %v1106_v34 = vand.u32 2147483647, %v1096_v32 }
 0x7d0   :  { %2626 = vpow2.f32 %v2500_v31  ;;  %v717_v11 = vand.u32 2147483648, %v705_v17  ;;  %vm711_vm15 = vweird.f32 %v705_v17  ;;  %v715_v47 = vand.u32 2147483647, %v705_v17 }
 0x7d1   :  { %2628 = vrcp.f32 %v705_v17  ;;  %v1109_v44 = vor.u32 1.1754944e-38, %v1108_v33  ;;  %vm1107_vm13 = vcmp.eq.f32.partialorder %v1106_v34, 8.507059e+37  ;;  %v3388_v33 = vld [vmem:[%s3725_s2 + $0x8] sm:$0xff]  ;;  %v1305_v34 = vld [vmem:[#allocation2 + $0x24] sm:$0x1] }
 0x7d2   :  { %v718_v50 = vor.u32 1.1754944e-38, %v717_v11  ;;  %vm716_vm9 = vcmp.eq.f32.partialorder %v715_v47, 8.507059e+37  ;;  %v1307_v11 = vld [vmem:[#allocation2 + $0x34] sm:$0x1] }
 0x7d5   :  { %v2625_v18 = vpop.eup %2624 }
 0x7d6   :  { %v2627_v30 = vpop.eup %2626  ;;  %v1098_v19 = vmul.f32 %v2625_v18, %v1096_v32  ;;  %vm1103_vm10 = vweird.f32 %v2625_v18 }
 0x7d7   :  { %v898_v26 = vadd.f32 1.0, %v2627_v30  ;;  %v2629_v23 = vpop.eup %2628  ;;  %vm1104_vm7 = vmor %vm1102_vm11, %vm1103_vm10  ;;  %v1302_v30 = vld [vmem:[#allocation2 + $0xc] sm:$0x1] }
 0x7d8   :  { %v1099_v21 = vsub.f32 1.0, %v1098_v19  ;;  %v707_v27 = vmul.f32 %v2629_v23, %v705_v17  ;;  %vm712_vm14 = vweird.f32 %v2629_v23 }
 0x7d9   :  { %2630 = vrcp.f32 %v898_v26  ;;  %vm713_vm8 = vmor %vm711_vm15, %vm712_vm14  ;;  %v910_v55 = vand.u32 2147483648, %v898_v26  ;;  %vm904_vm11 = vweird.f32 %v898_v26  ;;  %v908_v53 = vand.u32 2147483647, %v898_v26 }
 0x7da   :  { %v1100_v25 = vmul.f32 %v2625_v18, %v1099_v21  ;;  %v708_v29 = vsub.f32 1.0, %v707_v27  ;;  %v1337_v21 = vrot.slane %v1302_v30, 7  ;;  %v1304_v27 = vld [vmem:[#allocation2 + $0x1c] sm:$0x1]  ;;  %vm3739_vm14 = vcmask 130048  }
 0x7db   :  { %v911_v58 = vor.u32 1.1754944e-38, %v910_v55  ;;  %v3437_v55 = vld [vmem:[#allocation7 + $0x10] sm:$0xff] }
 0x7dc   :  { %v1101_v28 = vadd.f32 %v2625_v18, %v1100_v25  ;;  %v709_v22 = vmul.f32 %v2629_v23, %v708_v29  ;;  %v3375_v25 = vld [vmem:[%s3725_s2 + $0x18] sm:$0xff]  ;;  %v3381_v29 = vld [vmem:[%s3725_s2 + $0x10] sm:$0xff] }
 0x7de   :  { %v1105_v35 = vsel %vm1104_vm7, %v2625_v18, %v1101_v28  ;;  %v710_v2 = vadd.f32 %v2629_v23, %v709_v22 }
 0x7df   :  { %v2631_v24 = vpop.eup %2630  ;;  %v1110_v45 = vsel %vm1107_vm13, %v1109_v44, %v1105_v35  ;;  %vm909_vm13 = vcmp.eq.f32.partialorder %v908_v53, 8.507059e+37  ;;  %v1341_v35 = vrot.slane %v1304_v27, 5  ;;  %v3395_v44 = vld [vmem:[%s3725_s2] sm:$0xff]  ;;  %v3443_v53 = vld [vmem:[#allocation7] sm:$0xff] }
 0x7e0   :  { %v900_v43 = vmul.f32 %v2631_v24, %v898_v26  ;;  %v714_v48 = vsel %vm713_vm8, %v2629_v23, %v710_v2  ;;  %vm905_vm10 = vweird.f32 %v2631_v24  ;;  %v1113_v8 = vmul.f32 %v1110_v45, %v3293_v7  ;;  %v1303_v26 = vld [vmem:[#allocation2 + $0x14] sm:$0x1]  ;;  %v1301_v23 = vld [vmem:[#allocation2 + $0x4] sm:$0x1] }
 0x7e1   :  { %v719_v4 = vsel %vm716_vm9, %v718_v50, %v714_v48  ;;  %vm906_vm7 = vmor %vm904_vm11, %vm905_vm10  ;;  %v1339_v28 = vrot.slane %v1303_v26, 6  ;;  %v1347_v50 = vrot.slane %v1307_v11, 2 }
 0x7e2   :  { %v901_v46 = vsub.f32 1.0, %v900_v43  ;;  %v722_v6 = vmul.f32 %v719_v4, %v3297_v10 }
 0x7e4   :  { %v902_v49 = vmul.f32 %v2631_v24, %v901_v46  ;;  %v3405_v46 = vld [vmem:[#allocation5] sm:$0xff] }
 0x7e6   :  { %v903_v54 = vadd.f32 %v2631_v24, %v902_v49  ;;  %v1308_v49 = vld [vmem:[#allocation2 + $0x3c] sm:$0x1] }
 0x7e8   :  { %v907_v62 = vsel %vm906_vm7, %v2631_v24, %v903_v54  ;;  %v1338_v24 = vsel %vm211_vm0, %v1337_v21, %v1301_v23  ;;  %v3426_v54 = vld [vmem:[#allocation8 + $0x8] sm:$0xff] }
 0x7e9   :  { %v912_v5 = vsel %vm909_vm13, %v911_v58, %v907_v62  ;;  %v1340_v22 = vsel %vm214_vm1, %v1339_v28, %v1338_v24 }
 0x7ea   :  { %v915_v12 = vmul.f32 %v912_v5, %v3301_v15  ;;  %v1342_v2 = vsel %vm217_vm2, %v1341_v35, %v1340_v22 }
 0x825   :  { %v1116_v0 = vpop.permute.xlu2 %1115 }
 0x826   :  { %v1118_v1 = vmul.f32 %v1116_v0, %v1110_v45  ;;  %v1306_v0 = vld [vmem:[#allocation2 + $0x2c] sm:$0x1] }
 0x827   :  { %v1345_v47 = vrot.slane %v1306_v0, 3 }
 0x828   :  { %1120 = vrot.lane.b32.xlu2 %v1118_v1, %s2972_s20  ;;  %v3400_v1 = vld [vmem:[#allocation5 + $0x8] sm:$0xff] }
 0x82d   :  { %v725_v3 = vpop.permute.xlu0 %724 }
 0x82e   :  { %v727_v51 = vmul.f32 %v725_v3, %v719_v4 }
 0x830   :  { %729 = vrot.lane.b32.xlu0 %v727_v51, %s2972_s20  ;;  %v3416_v51 = vld [vmem:[#allocation8 + $0x18] sm:$0xff] }
 0x835   :  { %v918_v63 = vpop.permute.xlu1 %917 }
 0x836   :  { %v920_v60 = vmul.f32 %v918_v63, %v912_v5 }
 0x838   :  { %922 = vrot.lane.b32.xlu1 %v920_v60, %s2972_s20 }
 0x882   :  { %v1121_v56 = vpop.permute.xlu2 %1120 }
 0x883   :  { %v3354_v57 = vadd.f32 %v1121_v56, %v1113_v8 }
 0x885   :  { %2632 = vtanh.f32 %v3354_v57 }
 0x88b   :  { %v2633_v59 = vpop.eup %2632 }
 0x88c   :  { %1126 = vrot.lane.b32.xlu2 %v2633_v59, %s2971_s19  ;;  %v3450_v59 = vld [vmem:[%s3729_s6] ss:$0 sm:$0xff] }
 0x8a2   :  { %v730_v61 = vpop.permute.xlu0 %729 }
 0x8a3   :  { %v3359_v9 = vadd.f32 %v730_v61, %v722_v6 }
 0x8a5   :  { %2634 = vtanh.f32 %v3359_v9 }
 0x8aa   :  { %v923_v13 = vpop.permute.xlu1 %922 }
 0x8ab   :  { %v2635_v14 = vpop.eup %2634  ;;  %v3363_v7 = vadd.f32 %v923_v13, %v915_v12 }
 0x8ac   :  { %735 = vrot.lane.b32.xlu0 %v2635_v14, %s2971_s19 }
 0x8ad   :  { %2636 = vtanh.f32 %v3363_v7 }
 0x8b3   :  { %v2637_v32 = vpop.eup %2636 }
 0x8b4   :  { %928 = vrot.lane.b32.xlu1 %v2637_v32, %s2971_s19  ;;  %v3457_v32 = vld [vmem:[%s3726_s3] ss:$0 sm:$0xff] }
 0x8e6   :  { %v1127_v31 = vpop.permute.xlu2 %1126 }
 0x8e7   :  { %v1129_v10 = vmul.f32 %v1127_v31, %v1110_v45  ;;  %v1343_v45 = vrot.slane %v1305_v34, 4 }
 0x8e9   :  { %1151 = vrot.lane.b32.xlu2 %v1129_v10, %s2972_s20  ;;  %v1344_v48 = vsel %vm220_vm3, %v1343_v45, %v1342_v2 }
 0x91e   :  { %v736_v16 = vpop.permute.xlu0 %735 }
 0x91f   :  { %v738_v17 = vmul.f32 %v736_v16, %v719_v4  ;;  %v1346_v4 = vsel %vm223_vm4, %v1345_v47, %v1344_v48 }
 0x921   :  { %933 = vrot.lane.b32.xlu0 %v738_v17, %s2972_s20 }
 0x926   :  { %v929_v15 = vpop.permute.xlu1 %928 }
 0x927   :  { %v931_v18 = vmul.f32 %v929_v15, %v912_v5 }
 0x929   :  { %958 = vrot.lane.b32.xlu1 %v931_v18, %s2972_s20 }
 0x943   :  { %v1152_v3 = vpop.permute.xlu2 %1151 }
 0x993   :  { %v934_v19 = vpop.permute.xlu0 %933 }
 0x994   :  { %2501 = vmatmul.msk.f32.vlgmr.msra.gmra.mxu1 %vm178_vm12, %v934_v19 }
 0x995   :  { %1321 = vmatpush.msra.mxu1 %v3375_v25 }
 0x997   :  { %1322 = vmatpush.msra.mxu1 %v3381_v29 }
 0x999   :  { %1323 = vmatpush.msra.mxu1 %v3388_v33 }
 0x99b   :  { %v959_v43 = vpop.permute.xlu1 %958  ;;  %1324 = vmatpush.msra.mxu1 %v3395_v44 }
 0x99c   :  { %2502 = vmatmul.msk.f32.vlgmr.msra.gmra.mxu0 %vm178_vm12, %v959_v43  ;;  %2507 = vmatmul.msk.f32.vlgmr.msrb.gmra.mxu1 %vm178_vm12, %v959_v43 }
 0x99d   :  { %1367 = vmatpush.msra.mxu0 %v3400_v1  ;;  %1511 = vmatpush.msrb.mxu1 %v3193_v36  ;;  %v1349_v36 = vrot.slane %v1308_v49, 1 }
 0x99f   :  { %1368 = vmatpush.msra.mxu0 %v3405_v46  ;;  %1512 = vmatpush.msrb.mxu1 %v3195_v37  ;;  %v1348_v37 = vsel %vm226_vm5, %v1347_v50, %v1346_v4 }
 0x9a1   :  { %1513 = vmatpush.msrb.mxu1 %v3203_v39  ;;  %v3421_v39 = vld [vmem:[#allocation8 + $0x10] sm:$0xff] }
 0x9a3   :  { %1514 = vmatpush.msrb.mxu1 %v3211_v41  ;;  %v1350_v41 = vsel %vm229_vm6, %v1349_v36, %v1348_v37 }
 0x9a4   :  { %2508 = vmatmul.msk.f32.vlgmr.msrb.gmra.mxu0 %vm178_vm12, %v1152_v3  ;;  %2513 = vmatmul.msk.f32.vlgmr.msra.gmra.mxu1 %vm178_vm12, %v1152_v3 }
 0x9a5   :  { %1536 = vmatpush.msrb.mxu0 %v3198_v52  ;;  %1704 = vmatpush.msra.mxu1 %v3416_v51  ;;  %v3430_v52 = vld [vmem:[#allocation8] sm:$0xff] }
 0x9a7   :  { %1537 = vmatpush.msrb.mxu0 %v3200_v38  ;;  %1705 = vmatpush.msra.mxu1 %v3421_v39  ;;  %v3434_v38 = vld [vmem:[#allocation7 + $0x18] sm:$0xff] }
 0x9a9   :  { %1538 = vmatpush.msrb.mxu0 %v3208_v40  ;;  %1706 = vmatpush.msra.mxu1 %v3426_v54  ;;  %v3440_v40 = vld [vmem:[#allocation7 + $0x8] sm:$0xff] }
 0x9ab   :  { %1539 = vmatpush.msrb.mxu0 %v3216_v42  ;;  %1707 = vmatpush.msra.mxu1 %v3430_v52 }
 0x9ac   :  { %2514 = vmatmul.msk.f32.vlgmr.msra.gmra.mxu0 %vm3739_vm14, %v1350_v41 }
 0x9ad   :  { %1729 = vmatpush.msra.mxu0 %v3434_v38 }
 0x9af   :  { %1730 = vmatpush.msra.mxu0 %v3437_v55 }
 0x9b1   :  { %1731 = vmatpush.msra.mxu0 %v3440_v40 }
 0x9b3   :  { %1732 = vmatpush.msra.mxu0 %v3443_v53 }
 0xa11   :  { %v954_v42 = vpop.f32.mrf.mxu1 }
 0xa19   :  { %v979_v62 = vpop.f32.mrf.mxu0  ;;  %v1147_v5 = vpop.f32.mrf.mxu1 }
 0xa1a   :  { %v980_v58 = vadd.f32 %v979_v62, %v954_v42 }
 0xa1c   :  { %v982_v63 = vadd.f32 %v3281_v20, %v980_v58 }
 0xa1e   :  { %2638 = vtanh.f32 %v982_v63  ;;  %v2503_v17 = vmul.f32 -1.442695, %v982_v63 }
 0xa21   :  { %v1172_v60 = vpop.f32.mrf.mxu0  ;;  %v1326_v61 = vpop.f32.mrf.mxu1 }
 0xa22   :  { %v1173_v8 = vadd.f32 %v1172_v60, %v1147_v5 }
 0xa24   :  { %v2639_v56 = vpop.eup %2638  ;;  %v1175_v6 = vadd.f32 %v3450_v59, %v1173_v8 }
 0xa25   :  { %1005 = vrot.lane.b32.xlu0 %v2639_v56, %s2971_s19 }
 0xa26   :  { %2640 = vtanh.f32 %v1175_v6  ;;  %v2509_v30 = vmul.f32 -1.442695, %v1175_v6 }
 0xa29   :  { %v1370_v12 = vpop.f32.mrf.mxu0 }
 0xa2a   :  { %v1371_v13 = vadd.f32 %v1370_v12, %v1326_v61 }
 0xa2c   :  { %v2641_v14 = vpop.eup %2640  ;;  %v1373_v31 = vadd.f32 %v3457_v32, %v1371_v13 }
 0xa2d   :  { %1198 = vrot.lane.b32.xlu1 %v2641_v14, %s2971_s19 }
 0xa2e   :  { %2642 = vtanh.f32 %v1373_v31  ;;  %v2515_v16 = vmul.f32 -1.442695, %v1373_v31 }
 0xa30   :  { %2644 = vpow2.f32 %v2515_v16 }
 0xa31   :  { %2646 = vpow2.f32 %v2503_v17 }
 0xa34   :  { %v2643_v10 = vpop.eup %2642 }
 0xa35   :  { %1396 = vrot.lane.b32.xlu2 %v2643_v10, %s2971_s19 }
 0xa36   :  { %v2645_v15 = vpop.eup %2644 }
 0xa37   :  { %v1377_v18 = vadd.f32 1.0, %v2645_v15  ;;  %v2647_v19 = vpop.eup %2646 }
 0xa38   :  { %v986_v26 = vadd.f32 1.0, %v2647_v19 }
 0xa39   :  { %2648 = vrcp.f32 %v1377_v18  ;;  %v1389_v2 = vand.u32 2147483648, %v1377_v18  ;;  %vm1383_vm8 = vweird.f32 %v1377_v18  ;;  %v1387_v11 = vand.u32 2147483647, %v1377_v18 }
 0xa3a   :  { %2650 = vpow2.f32 %v2509_v30  ;;  %v998_v42 = vand.u32 2147483648, %v986_v26  ;;  %vm992_vm7 = vweird.f32 %v986_v26  ;;  %v996_v62 = vand.u32 2147483647, %v986_v26 }
 0xa3b   :  { %2652 = vrcp.f32 %v986_v26  ;;  %v1390_v50 = vor.u32 1.1754944e-38, %v1389_v2  ;;  %vm1388_vm10 = vcmp.eq.f32.partialorder %v1387_v11, 8.507059e+37  ;;  %v1584_v2 = vld [vmem:[#allocation2 + $0x15] sm:$0x1] }
 0xa3c   :  { %v999_v5 = vor.u32 1.1754944e-38, %v998_v42  ;;  %vm997_vm14 = vcmp.eq.f32.partialorder %v996_v62, 8.507059e+37 }
 0xa3f   :  { %v2649_v21 = vpop.eup %2648 }
 0xa40   :  { %v2651_v23 = vpop.eup %2650  ;;  %v1379_v27 = vmul.f32 %v2649_v21, %v1377_v18  ;;  %vm1384_vm15 = vweird.f32 %v2649_v21 }
 0xa41   :  { %v1179_v28 = vadd.f32 1.0, %v2651_v23  ;;  %v2653_v34 = vpop.eup %2652  ;;  %vm1385_vm9 = vmor %vm1383_vm8, %vm1384_vm15 }
 0xa42   :  { %v1380_v24 = vsub.f32 1.0, %v1379_v27  ;;  %v988_v22 = vmul.f32 %v2653_v34, %v986_v26  ;;  %vm993_vm11 = vweird.f32 %v2653_v34 }
 0xa43   :  { %2654 = vrcp.f32 %v1179_v28  ;;  %vm994_vm13 = vmor %vm992_vm7, %vm993_vm11  ;;  %v1191_v61 = vand.u32 2147483648, %v1179_v28  ;;  %vm1185_vm8 = vweird.f32 %v1179_v28  ;;  %v1189_v12 = vand.u32 2147483647, %v1179_v28 }
 0xa44   :  { %v1381_v35 = vmul.f32 %v2649_v21, %v1380_v24  ;;  %v989_v0 = vsub.f32 1.0, %v988_v22  ;;  %vm3740_vm11 = vcmask 130048  }
 0xa45   :  { %v1192_v14 = vor.u32 1.1754944e-38, %v1191_v61 }
 0xa46   :  { %v1382_v43 = vadd.f32 %v2649_v21, %v1381_v35  ;;  %v990_v48 = vmul.f32 %v2653_v34, %v989_v0  ;;  %v1583_v0 = vld [vmem:[#allocation2 + $0xd] sm:$0x1] }
 0xa47   :  { %v1618_v11 = vrot.slane %v1583_v0, 7 }
 0xa48   :  { %v1386_v47 = vsel %vm1385_vm9, %v2649_v21, %v1382_v43  ;;  %v991_v37 = vadd.f32 %v2653_v34, %v990_v48  ;;  %v1585_v48 = vld [vmem:[#allocation2 + $0x1d] sm:$0x1] }
 0xa49   :  { %v2655_v45 = vpop.eup %2654  ;;  %v1391_v4 = vsel %vm1388_vm10, %v1390_v50, %v1386_v47  ;;  %vm1190_vm10 = vcmp.eq.f32.partialorder %v1189_v12, 8.507059e+37  ;;  %v1582_v47 = vld [vmem:[#allocation2 + $0x5] sm:$0x1] }
 0xa4a   :  { %v1181_v49 = vmul.f32 %v2655_v45, %v1179_v28  ;;  %v995_v58 = vsel %vm994_vm13, %v2653_v34, %v991_v37  ;;  %vm1186_vm15 = vweird.f32 %v2655_v45  ;;  %v1394_v17 = vmul.f32 %v1391_v4, %v3354_v57 }
 0xa4b   :  { %v1000_v8 = vsel %vm997_vm14, %v999_v5, %v995_v58  ;;  %vm1187_vm9 = vmor %vm1185_vm8, %vm1186_vm15  ;;  %v1619_v50 = vsel %vm211_vm0, %v1618_v11, %v1582_v47  ;;  %v3494_v58 = vld [vmem:[#allocation11 + $0x18] sm:$0xff] }
 0xa4c   :  { %v1182_v41 = vsub.f32 1.0, %v1181_v49  ;;  %v1003_v19 = vmul.f32 %v1000_v8, %v3359_v9  ;;  %v1620_v49 = vrot.slane %v1584_v2, 6 }
 0xa4e   :  { %v1183_v63 = vmul.f32 %v2655_v45, %v1182_v41  ;;  %v1587_v41 = vld [vmem:[#allocation2 + $0x2d] sm:$0x1] }
 0xa4f   :  { %v1626_v5 = vrot.slane %v1587_v41, 3 }
 0xa50   :  { %v1184_v6 = vadd.f32 %v2655_v45, %v1183_v63  ;;  %v1588_v63 = vld [vmem:[#allocation2 + $0x35] sm:$0x1] }
 0xa51   :  { %v1628_v61 = vrot.slane %v1588_v63, 2 }
 0xa52   :  { %v1188_v13 = vsel %vm1187_vm9, %v2655_v45, %v1184_v6  ;;  %v1589_v6 = vld [vmem:[#allocation2 + $0x3d] sm:$0x1] }
 0xa53   :  { %v1193_v10 = vsel %vm1190_vm10, %v1192_v14, %v1188_v13  ;;  %v3506_v14 = vld [vmem:[#allocation11] sm:$0xff] }
 0xa54   :  { %v1196_v23 = vmul.f32 %v1193_v10, %v3363_v7 }
 0xa8f   :  { %v1397_v3 = vpop.permute.xlu2 %1396 }
 0xa90   :  { %v1399_v36 = vmul.f32 %v1397_v3, %v1391_v4  ;;  %v1586_v3 = vld [vmem:[#allocation2 + $0x25] sm:$0x1] }
 0xa91   :  { %v1624_v42 = vrot.slane %v1586_v3, 4 }
 0xa92   :  { %1401 = vrot.lane.b32.xlu2 %v1399_v36, %s2972_s20  ;;  %v1621_v36 = vsel %vm214_vm1, %v1620_v49, %v1619_v50 }
 0xa97   :  { %v1006_v60 = vpop.permute.xlu0 %1005 }
 0xa98   :  { %v1008_v56 = vmul.f32 %v1006_v60, %v1000_v8  ;;  %v3498_v60 = vld [vmem:[#allocation11 + $0x10] sm:$0xff] }
 0xa9a   :  { %1010 = vrot.lane.b32.xlu0 %v1008_v56, %s2972_s20  ;;  %v3502_v56 = vld [vmem:[#allocation11 + $0x8] sm:$0xff] }
 0xa9f   :  { %v1199_v31 = vpop.permute.xlu1 %1198 }
 0xaa0   :  { %v1201_v16 = vmul.f32 %v1199_v31, %v1193_v10  ;;  %v1630_v31 = vrot.slane %v1589_v6, 1 }
 0xaa2   :  { %1203 = vrot.lane.b32.xlu1 %v1201_v16, %s2972_s20 }
 0xaec   :  { %v1402_v15 = vpop.permute.xlu2 %1401 }
 0xaed   :  { %v3466_v18 = vadd.f32 %v1402_v15, %v1394_v17  ;;  %v3516_v17 = vld [vmem:[#allocation10 + $0x10] sm:$0xff] }
 0xaef   :  { %2656 = vtanh.f32 %v3466_v18 }
 0xaf5   :  { %v2657_v30 = vpop.eup %2656 }
 0xaf6   :  { %1407 = vrot.lane.b32.xlu2 %v2657_v30, %s2971_s19  ;;  %v3521_v30 = vld [vmem:[#allocation10 + $0x8] sm:$0xff] }
 0xb0c   :  { %v1011_v26 = vpop.permute.xlu0 %1010 }
 0xb0d   :  { %v3471_v21 = vadd.f32 %v1011_v26, %v1003_v19  ;;  %v3525_v19 = vld [vmem:[#allocation10] sm:$0xff] }
 0xb0f   :  { %2658 = vtanh.f32 %v3471_v21 }
 0xb14   :  { %v1204_v27 = vpop.permute.xlu1 %1203 }
 0xb15   :  { %v2659_v28 = vpop.eup %2658  ;;  %v3475_v57 = vadd.f32 %v1204_v27, %v1196_v23 }
 0xb16   :  { %1016 = vrot.lane.b32.xlu0 %v2659_v28, %s2971_s19 }
 0xb17   :  { %2660 = vtanh.f32 %v3475_v57 }
 0xb1d   :  { %v2661_v24 = vpop.eup %2660 }
 0xb1e   :  { %1209 = vrot.lane.b32.xlu1 %v2661_v24, %s2971_s19 }
 0xb50   :  { %v1408_v34 = vpop.permute.xlu2 %1407 }
 0xb51   :  { %v1410_v9 = vmul.f32 %v1408_v34, %v1391_v4  ;;  %v1622_v4 = vrot.slane %v1585_v48, 5 }
 0xb53   :  { %1432 = vrot.lane.b32.xlu2 %v1410_v9, %s2972_s20  ;;  %v1623_v62 = vsel %vm217_vm2, %v1622_v4, %v1621_v36 }
 0xb88   :  { %v1017_v35 = vpop.permute.xlu0 %1016 }
 0xb89   :  { %v1019_v22 = vmul.f32 %v1017_v35, %v1000_v8  ;;  %v1625_v8 = vsel %vm220_vm3, %v1624_v42, %v1623_v62 }
 0xb8a   :  { %v1627_v13 = vsel %vm223_vm4, %v1626_v5, %v1625_v8 }
 0xb8b   :  { %1214 = vrot.lane.b32.xlu0 %v1019_v22, %s2972_s20  ;;  %v1629_v16 = vsel %vm226_vm5, %v1628_v61, %v1627_v13 }
 0xb8c   :  { %v1631_v15 = vsel %vm229_vm6, %v1630_v31, %v1629_v16 }
 0xb90   :  { %v1210_v7 = vpop.permute.xlu1 %1209 }
 0xb91   :  { %v1212_v43 = vmul.f32 %v1210_v7, %v1193_v10  ;;  %v3511_v10 = vld [vmem:[#allocation10 + $0x18] sm:$0xff] }
 0xb93   :  { %1239 = vrot.lane.b32.xlu1 %v1212_v43, %s2972_s20 }
 0xbad   :  { %v1433_v12 = vpop.permute.xlu2 %1432 }
 0xbfd   :  { %v1215_v45 = vpop.permute.xlu0 %1214 }
 0xbfe   :  { %2510 = vmatmul.msk.f32.vlgmr.msrb.gmra.mxu2 %vm178_vm12, %v1215_v45 }
 0xbff   :  { %1602 = vmatpush.msrb.mxu2 %v3375_v25 }
 0xc01   :  { %1603 = vmatpush.msrb.mxu2 %v3381_v29 }
 0xc03   :  { %1604 = vmatpush.msrb.mxu2 %v3388_v33 }
 0xc05   :  { %v1240_v37 = vpop.permute.xlu1 %1239  ;;  %1605 = vmatpush.msrb.mxu2 %v3395_v44 }
 0xc06   :  { %2511 = vmatmul.msk.f32.vlgmr.msrb.gmra.mxu3 %vm178_vm12, %v1240_v37  ;;  %2516 = vmatmul.msk.f32.vlgmr.msra.gmra.mxu2 %vm178_vm12, %v1240_v37 }
 0xc07   :  { %1648 = vmatpush.msrb.mxu3 %v3400_v1  ;;  %1792 = vmatpush.msra.mxu2 %v3494_v58 }
 0xc09   :  { %1649 = vmatpush.msrb.mxu3 %v3405_v46  ;;  %1793 = vmatpush.msra.mxu2 %v3498_v60 }
 0xc0b   :  { %1794 = vmatpush.msra.mxu2 %v3502_v56 }
 0xc0d   :  { %1795 = vmatpush.msra.mxu2 %v3506_v14 }
 0xc0e   :  { %2517 = vmatmul.msk.f32.vlgmr.msra.gmra.mxu3 %vm178_vm12, %v1433_v12  ;;  %2522 = vmatmul.msk.f32.vlgmr.msrb.gmra.mxu2 %vm178_vm12, %v1433_v12 }
 0xc0f   :  { %1817 = vmatpush.msra.mxu3 %v3511_v10  ;;  %1985 = vmatpush.msrb.mxu2 %v3416_v51 }
 0xc11   :  { %1818 = vmatpush.msra.mxu3 %v3516_v17  ;;  %1986 = vmatpush.msrb.mxu2 %v3421_v39 }
 0xc13   :  { %1819 = vmatpush.msra.mxu3 %v3521_v30  ;;  %1987 = vmatpush.msrb.mxu2 %v3426_v54 }
 0xc15   :  { %1820 = vmatpush.msra.mxu3 %v3525_v19  ;;  %1988 = vmatpush.msrb.mxu2 %v3430_v52 }
 0xc16   :  { %2523 = vmatmul.msk.f32.vlgmr.msrb.gmra.mxu3 %vm3740_vm11, %v1631_v15 }
 0xc17   :  { %2010 = vmatpush.msrb.mxu3 %v3434_v38 }
 0xc19   :  { %2011 = vmatpush.msrb.mxu3 %v3437_v55 }
 0xc1b   :  { %2012 = vmatpush.msrb.mxu3 %v3440_v40 }
 0xc1d   :  { %2013 = vmatpush.msrb.mxu3 %v3443_v53 }
 0xc81   :  { %v1235_v26 = vpop.f32.mrf.mxu2 }
 0xc89   :  { %v1260_v23 = vpop.f32.mrf.mxu3  ;;  %v1428_v24 = vpop.f32.mrf.mxu2 }
 0xc8a   :  { %v1261_v27 = vadd.f32 %v1260_v23, %v1235_v26 }
 0xc8c   :  { %v1263_v28 = vadd.f32 %v3281_v20, %v1261_v27 }
 0xc8e   :  { %2662 = vtanh.f32 %v1263_v28  ;;  %v2512_v47 = vmul.f32 -1.442695, %v1263_v28 }
 0xc91   :  { %v1453_v34 = vpop.f32.mrf.mxu3  ;;  %v1607_v7 = vpop.f32.mrf.mxu2 }
 0xc92   :  { %v1454_v9 = vadd.f32 %v1453_v34, %v1428_v24 }
 0xc94   :  { %v2663_v35 = vpop.eup %2662  ;;  %v1456_v22 = vadd.f32 %v3450_v59, %v1454_v9 }
 0xc95   :  { %1286 = vrot.lane.b32.xlu0 %v2663_v35, %s2971_s19 }
 0xc96   :  { %2664 = vtanh.f32 %v1456_v22  ;;  %v2518_v50 = vmul.f32 -1.442695, %v1456_v22 }
 0xc99   :  { %v1651_v43 = vpop.f32.mrf.mxu3 }
 0xc9a   :  { %v1652_v0 = vadd.f32 %v1651_v43, %v1607_v7 }
 0xc9c   :  { %v2665_v45 = vpop.eup %2664  ;;  %v1654_v2 = vadd.f32 %v3457_v32, %v1652_v0 }
 0xc9d   :  { %1479 = vrot.lane.b32.xlu1 %v2665_v45, %s2971_s19 }
 0xc9e   :  { %2666 = vtanh.f32 %v1654_v2  ;;  %v2524_v11 = vmul.f32 -1.442695, %v1654_v2 }
 0xca0   :  { %2668 = vpow2.f32 %v2524_v11 }
 0xca1   :  { %2670 = vpow2.f32 %v2512_v47 }
 0xca4   :  { %v2667_v20 = vpop.eup %2666 }
 0xca5   :  { %1677 = vrot.lane.b32.xlu2 %v2667_v20, %s2971_s19 }
 0xca6   :  { %v2669_v48 = vpop.eup %2668 }
 0xca7   :  { %v1658_v49 = vadd.f32 1.0, %v2669_v48  ;;  %v2671_v3 = vpop.eup %2670 }
 0xca8   :  { %v1267_v4 = vadd.f32 1.0, %v2671_v3 }
 0xca9   :  { %2672 = vrcp.f32 %v1658_v49  ;;  %v1670_v13 = vand.u32 2147483648, %v1658_v49  ;;  %vm1664_vm13 = vweird.f32 %v1658_v49  ;;  %v1668_v31 = vand.u32 2147483647, %v1658_v49 }
 0xcaa   :  { %2674 = vpow2.f32 %v2518_v50  ;;  %v1279_v35 = vand.u32 2147483648, %v1267_v4  ;;  %vm1273_vm9 = vweird.f32 %v1267_v4  ;;  %v1277_v22 = vand.u32 2147483647, %v1267_v4 }
 0xcab   :  { %2676 = vrcp.f32 %v1267_v4  ;;  %v1671_v23 = vor.u32 1.1754944e-38, %v1670_v13  ;;  %vm1669_vm15 = vcmp.eq.f32.partialorder %v1668_v31, 8.507059e+37 }
 0xcac   :  { %v1280_v0 = vor.u32 1.1754944e-38, %v1279_v35  ;;  %vm1278_vm11 = vcmp.eq.f32.partialorder %v1277_v22, 8.507059e+37 }
 0xcaf   :  { %v2673_v36 = vpop.eup %2672 }
 0xcb0   :  { %v2675_v37 = vpop.eup %2674  ;;  %v1660_v41 = vmul.f32 %v2673_v36, %v1658_v49  ;;  %vm1665_vm7 = vweird.f32 %v2673_v36 }
 0xcb1   :  { %v1460_v42 = vadd.f32 1.0, %v2675_v37  ;;  %v2677_v63 = vpop.eup %2676  ;;  %vm1666_vm14 = vmor %vm1664_vm13, %vm1665_vm7 }
 0xcb2   :  { %v1661_v62 = vsub.f32 1.0, %v1660_v41  ;;  %v1269_v8 = vmul.f32 %v2677_v63, %v1267_v4  ;;  %vm1274_vm8 = vweird.f32 %v2677_v63 }
 0xcb3   :  { %2678 = vrcp.f32 %v1460_v42  ;;  %vm1275_vm10 = vmor %vm1273_vm9, %vm1274_vm8  ;;  %v1472_v47 = vand.u32 2147483648, %v1460_v42  ;;  %vm1466_vm13 = vweird.f32 %v1460_v42  ;;  %v1470_v48 = vand.u32 2147483647, %v1460_v42 }
 0xcb4   :  { %v1662_v5 = vmul.f32 %v2673_v36, %v1661_v62  ;;  %v1270_v61 = vsub.f32 1.0, %v1269_v8  ;;  %vm3741_vm8 = vcmask 130048  }
 0xcb5   :  { %v1473_v50 = vor.u32 1.1754944e-38, %v1472_v47  ;;  %v1869_v47 = vld [vmem:[#allocation2 + $0x36] sm:$0x1] }
 0xcb6   :  { %v1663_v6 = vadd.f32 %v2673_v36, %v1662_v5  ;;  %v1271_v15 = vmul.f32 %v2677_v63, %v1270_v61 }
 0xcb8   :  { %v1667_v16 = vsel %vm1666_vm14, %v2673_v36, %v1663_v6  ;;  %v1272_v34 = vadd.f32 %v2677_v63, %v1271_v15 }
 0xcb9   :  { %v2679_v12 = vpop.eup %2678  ;;  %v1672_v28 = vsel %vm1669_vm15, %v1671_v23, %v1667_v16  ;;  %vm1471_vm15 = vcmp.eq.f32.partialorder %v1470_v48, 8.507059e+37  ;;  %v1864_v23 = vld [vmem:[#allocation2 + $0xe] sm:$0x1] }
 0xcba   :  { %v1462_v26 = vmul.f32 %v2679_v12, %v1460_v42  ;;  %v1276_v7 = vsel %vm1275_vm10, %v2677_v63, %v1272_v34  ;;  %vm1467_vm7 = vweird.f32 %v2679_v12  ;;  %v1675_v37 = vmul.f32 %v1672_v28, %v3466_v18 }
 0xcbb   :  { %v1281_v2 = vsel %vm1278_vm11, %v1280_v0, %v1276_v7  ;;  %vm1468_vm14 = vmor %vm1466_vm13, %vm1467_vm7  ;;  %v1899_v34 = vrot.slane %v1864_v23, 7  ;;  %v1867_v7 = vld [vmem:[#allocation2 + $0x26] sm:$0x1] }
 0xcbc   :  { %v1463_v9 = vsub.f32 1.0, %v1462_v26  ;;  %v1284_v42 = vmul.f32 %v1281_v2, %v3471_v21 }
 0xcbe   :  { %v1464_v43 = vmul.f32 %v2679_v12, %v1463_v9  ;;  %v1863_v9 = vld [vmem:[#allocation2 + $0x6] sm:$0x1] }
 0xcbf   :  { %v1900_v22 = vsel %vm211_vm0, %v1899_v34, %v1863_v9 }
 0xcc0   :  { %v1465_v11 = vadd.f32 %v2679_v12, %v1464_v43 }
 0xcc2   :  { %v1469_v49 = vsel %vm1468_vm14, %v2679_v12, %v1465_v11 }
 0xcc3   :  { %v1474_v4 = vsel %vm1471_vm15, %v1473_v50, %v1469_v49  ;;  %v1870_v50 = vld [vmem:[#allocation2 + $0x3e] sm:$0x1] }
 0xcc4   :  { %v1477_v6 = vmul.f32 %v1474_v4, %v3475_v57 }
 0xcff   :  { %v1678_v27 = vpop.permute.xlu2 %1677 }
 0xd00   :  { %v1680_v24 = vmul.f32 %v1678_v27, %v1672_v28 }
 0xd02   :  { %1682 = vrot.lane.b32.xlu2 %v1680_v24, %s2972_s20  ;;  %v1865_v24 = vld [vmem:[#allocation2 + $0x16] sm:$0x1] }
 0xd03   :  { %v1901_v35 = vrot.slane %v1865_v24, 6 }
 0xd05   :  { %v1902_v0 = vsel %vm214_vm1, %v1901_v35, %v1900_v22 }
 0xd07   :  { %v1287_v45 = vpop.permute.xlu0 %1286 }
 0xd08   :  { %v1289_v20 = vmul.f32 %v1287_v45, %v1281_v2 }
 0xd0a   :  { %1291 = vrot.lane.b32.xlu0 %v1289_v20, %s2972_s20  ;;  %v1905_v20 = vrot.slane %v1867_v7, 4 }
 0xd0f   :  { %v1480_v3 = vpop.permute.xlu1 %1479 }
 0xd10   :  { %v1482_v36 = vmul.f32 %v1480_v3, %v1474_v4  ;;  %v1909_v3 = vrot.slane %v1869_v47, 2 }
 0xd12   :  { %1484 = vrot.lane.b32.xlu1 %v1482_v36, %s2972_s20 }
 0xd5c   :  { %v1683_v41 = vpop.permute.xlu2 %1682 }
 0xd5d   :  { %v3544_v62 = vadd.f32 %v1683_v41, %v1675_v37  ;;  %v1911_v37 = vrot.slane %v1870_v50, 1 }
 0xd5f   :  { %2680 = vtanh.f32 %v3544_v62 }
 0xd65   :  { %v2681_v63 = vpop.eup %2680 }
 0xd66   :  { %1688 = vrot.lane.b32.xlu2 %v2681_v63, %s2971_s19 }
 0xd7c   :  { %v1292_v5 = vpop.permute.xlu0 %1291 }
 0xd7d   :  { %v3549_v8 = vadd.f32 %v1292_v5, %v1284_v42 }
 0xd7f   :  { %2682 = vtanh.f32 %v3549_v8 }
 0xd84   :  { %v1485_v61 = vpop.permute.xlu1 %1484 }
 0xd85   :  { %v2683_v12 = vpop.eup %2682  ;;  %v3553_v18 = vadd.f32 %v1485_v61, %v1477_v6 }
 0xd86   :  { %1297 = vrot.lane.b32.xlu0 %v2683_v12, %s2971_s19 }
 0xd87   :  { %2684 = vtanh.f32 %v3553_v18 }
 0xd8d   :  { %v2685_v13 = vpop.eup %2684 }
 0xd8e   :  { %1490 = vrot.lane.b32.xlu1 %v2685_v13, %s2971_s19 }
 0xdc0   :  { %v1689_v31 = vpop.permute.xlu2 %1688 }
 0xdc1   :  { %v1691_v21 = vmul.f32 %v1689_v31, %v1672_v28  ;;  %v1866_v28 = vld [vmem:[#allocation2 + $0x1e] sm:$0x1] }
 0xdc2   :  { %v1903_v43 = vrot.slane %v1866_v28, 5 }
 0xdc3   :  { %1713 = vrot.lane.b32.xlu2 %v1691_v21, %s2972_s20 }
 0xdc4   :  { %v1904_v11 = vsel %vm217_vm2, %v1903_v43, %v1902_v0 }
 0xdc5   :  { %v1906_v49 = vsel %vm220_vm3, %v1905_v20, %v1904_v11 }
 0xdf8   :  { %v1298_v16 = vpop.permute.xlu0 %1297 }
 0xdf9   :  { %v1300_v15 = vmul.f32 %v1298_v16, %v1281_v2  ;;  %v1868_v2 = vld [vmem:[#allocation2 + $0x2e] sm:$0x1] }
 0xdfa   :  { %v1907_v48 = vrot.slane %v1868_v2, 3 }
 0xdfb   :  { %1495 = vrot.lane.b32.xlu0 %v1300_v15, %s2972_s20 }
 0xdfc   :  { %v1908_v36 = vsel %vm223_vm4, %v1907_v48, %v1906_v49 }
 0xdfd   :  { %v1910_v41 = vsel %vm226_vm5, %v1909_v3, %v1908_v36 }
 0xdfe   :  { %v1912_v63 = vsel %vm229_vm6, %v1911_v37, %v1910_v41 }
 0xe00   :  { %v1491_v57 = vpop.permute.xlu1 %1490 }
 0xe01   :  { %v1493_v26 = vmul.f32 %v1491_v57, %v1474_v4 }
 0xe03   :  { %1520 = vrot.lane.b32.xlu1 %v1493_v26, %s2972_s20 }
 0xe1d   :  { %v1714_v4 = vpop.permute.xlu2 %1713 }
 0xe6d   :  { %v1496_v27 = vpop.permute.xlu0 %1495 }
 0xe6e   :  { %2519 = vmatmul.msk.f32.vlgmr.msrb.gmra.mxu1 %vm178_vm12, %v1496_v27 }
 0xe6f   :  { %1883 = vmatpush.msrb.mxu1 %v3375_v25 }
 0xe71   :  { %1884 = vmatpush.msrb.mxu1 %v3381_v29 }
 0xe73   :  { %1885 = vmatpush.msrb.mxu1 %v3388_v33 }
 0xe75   :  { %v1521_v45 = vpop.permute.xlu1 %1520  ;;  %1886 = vmatpush.msrb.mxu1 %v3395_v44 }
 0xe76   :  { %2520 = vmatmul.msk.f32.vlgmr.msrb.gmra.mxu0 %vm178_vm12, %v1521_v45  ;;  %2525 = vmatmul.msk.f32.vlgmr.msra.gmra.mxu1 %vm178_vm12, %v1521_v45 }
 0xe77   :  { %1929 = vmatpush.msrb.mxu0 %v3400_v1  ;;  %2073 = vmatpush.msra.mxu1 %v3494_v58 }
 0xe79   :  { %1930 = vmatpush.msrb.mxu0 %v3405_v46  ;;  %2074 = vmatpush.msra.mxu1 %v3498_v60 }
 0xe7b   :  { %2075 = vmatpush.msra.mxu1 %v3502_v56 }
 0xe7d   :  { %2076 = vmatpush.msra.mxu1 %v3506_v14 }
 0xe7e   :  { %2526 = vmatmul.msk.f32.vlgmr.msra.gmra.mxu0 %vm178_vm12, %v1714_v4  ;;  %2531 = vmatmul.msk.f32.vlgmr.msrb.gmra.mxu1 %vm178_vm12, %v1714_v4 }
 0xe7f   :  { %2098 = vmatpush.msra.mxu0 %v3511_v10  ;;  %2266 = vmatpush.msrb.mxu1 %v3416_v51 }
 0xe81   :  { %2099 = vmatpush.msra.mxu0 %v3516_v17  ;;  %2267 = vmatpush.msrb.mxu1 %v3421_v39 }
 0xe83   :  { %2100 = vmatpush.msra.mxu0 %v3521_v30  ;;  %2268 = vmatpush.msrb.mxu1 %v3426_v54  ;;  %v3599_v54 = vld [vmem:[%s3732_s9] ss:$0 sm:$0xff] }
 0xe85   :  { %2101 = vmatpush.msra.mxu0 %v3525_v19  ;;  %2269 = vmatpush.msrb.mxu1 %v3430_v52 }
 0xe86   :  { %2532 = vmatmul.msk.f32.vlgmr.msrb.gmra.mxu0 %vm3741_vm8, %v1912_v63 }
 0xe87   :  { %2291 = vmatpush.msrb.mxu0 %v3434_v38 }
 0xe89   :  { %2292 = vmatpush.msrb.mxu0 %v3437_v55 }
 0xe8b   :  { %2293 = vmatpush.msrb.mxu0 %v3440_v40 }
 0xe8d   :  { %2294 = vmatpush.msrb.mxu0 %v3443_v53 }
 0xeeb   :  { %v1516_v51 = vpop.f32.mrf.mxu1 }
 0xef3   :  { %v1541_v39 = vpop.f32.mrf.mxu0  ;;  %v1709_v5 = vpop.f32.mrf.mxu1 }
 0xef4   :  { %v1542_v42 = vadd.f32 %v1541_v39, %v1516_v51 }
 0xef6   :  { %v1544_v52 = vadd.f32 %v3599_v54, %v1542_v42 }
 0xef8   :  { %2686 = vtanh.f32 %v1544_v52  ;;  %v2521_v15 = vmul.f32 -1.442695, %v1544_v52 }
 0xefb   :  { %v1734_v6 = vpop.f32.mrf.mxu0  ;;  %v1888_v40 = vpop.f32.mrf.mxu1 }
 0xefc   :  { %v1735_v38 = vadd.f32 %v1734_v6, %v1709_v5 }
 0xefe   :  { %v2687_v61 = vpop.eup %2686  ;;  %v1737_v55 = vadd.f32 %v3450_v59, %v1735_v38 }
 0xeff   :  { %1567 = vrot.lane.b32.xlu0 %v2687_v61, %s2971_s19 }
 0xf00   :  { %2688 = vtanh.f32 %v1737_v55  ;;  %v2527_v23 = vmul.f32 -1.442695, %v1737_v55 }
 0xf03   :  { %v1932_v53 = vpop.f32.mrf.mxu0 }
 0xf04   :  { %v1933_v12 = vadd.f32 %v1932_v53, %v1888_v40 }
 0xf06   :  { %v2689_v13 = vpop.eup %2688  ;;  %v1935_v31 = vadd.f32 %v3457_v32, %v1933_v12 }
 0xf07   :  { %1760 = vrot.lane.b32.xlu1 %v2689_v13, %s2971_s19 }
 0xf08   :  { %2690 = vtanh.f32 %v1935_v31  ;;  %v2533_v16 = vmul.f32 -1.442695, %v1935_v31 }
 0xf0a   :  { %2692 = vpow2.f32 %v2533_v16 }
 0xf0b   :  { %2694 = vpow2.f32 %v2521_v15 }
 0xf0e   :  { %v2691_v21 = vpop.eup %2690 }
 0xf0f   :  { %1958 = vrot.lane.b32.xlu2 %v2691_v21, %s2971_s19 }
 0xf10   :  { %v2693_v57 = vpop.eup %2692 }
 0xf11   :  { %v1939_v26 = vadd.f32 1.0, %v2693_v57  ;;  %v2695_v27 = vpop.eup %2694 }
 0xf12   :  { %v1548_v24 = vadd.f32 1.0, %v2695_v27 }
 0xf13   :  { %2696 = vrcp.f32 %v1939_v26  ;;  %v1951_v11 = vand.u32 2147483648, %v1939_v26  ;;  %vm1945_vm10 = vweird.f32 %v1939_v26  ;;  %v1949_v47 = vand.u32 2147483647, %v1939_v26 }
 0xf14   :  { %2698 = vpow2.f32 %v2527_v23  ;;  %v1560_v51 = vand.u32 2147483648, %v1548_v24  ;;  %vm1554_vm14 = vweird.f32 %v1548_v24  ;;  %v1558_v39 = vand.u32 2147483647, %v1548_v24 }
 0xf15   :  { %2700 = vrcp.f32 %v1548_v24  ;;  %v1952_v3 = vor.u32 1.1754944e-38, %v1951_v11  ;;  %vm1950_vm7 = vcmp.eq.f32.partialorder %v1949_v47, 8.507059e+37  ;;  %v2146_v11 = vld [vmem:[#allocation2 + $0x17] sm:$0x1] }
 0xf16   :  { %v1561_v5 = vor.u32 1.1754944e-38, %v1560_v51  ;;  %vm1559_vm8 = vcmp.eq.f32.partialorder %v1558_v39, 8.507059e+37  ;;  %v2151_v39 = vld [vmem:[#allocation2 + $0x3f] sm:$0x1] }
 0xf19   :  { %v2697_v34 = vpop.eup %2696 }
 0xf1a   :  { %v2699_v9 = vpop.eup %2698  ;;  %v1941_v28 = vmul.f32 %v2697_v34, %v1939_v26  ;;  %vm1946_vm9 = vweird.f32 %v2697_v34 }
 0xf1b   :  { %v1741_v35 = vadd.f32 1.0, %v2699_v9  ;;  %v2701_v7 = vpop.eup %2700  ;;  %vm1947_vm11 = vmor %vm1945_vm10, %vm1946_vm9 }
 0xf1c   :  { %v1942_v22 = vsub.f32 1.0, %v1941_v28  ;;  %v1550_v0 = vmul.f32 %v2701_v7, %v1548_v24  ;;  %vm1555_vm13 = vweird.f32 %v2701_v7 }
 0xf1d   :  { %2702 = vrcp.f32 %v1741_v35  ;;  %vm1556_vm15 = vmor %vm1554_vm14, %vm1555_vm13  ;;  %v1753_v40 = vand.u32 2147483648, %v1741_v35  ;;  %vm1747_vm10 = vweird.f32 %v1741_v35  ;;  %v1751_v53 = vand.u32 2147483647, %v1741_v35 }
 0xf1e   :  { %v1943_v43 = vmul.f32 %v2697_v34, %v1942_v22  ;;  %v1551_v2 = vsub.f32 1.0, %v1550_v0 }
 0xf1f   :  { %v1754_v13 = vor.u32 1.1754944e-38, %v1753_v40 }
 0xf20   :  { %v1944_v45 = vadd.f32 %v2697_v34, %v1943_v43  ;;  %v1552_v49 = vmul.f32 %v2701_v7, %v1551_v2  ;;  %v2145_v2 = vld [vmem:[#allocation2 + $0xf] sm:$0x1] }
 0xf21   :  { %v2180_v47 = vrot.slane %v2145_v2, 7 }
 0xf22   :  { %v1948_v48 = vsel %vm1947_vm11, %v2697_v34, %v1944_v45  ;;  %v1553_v41 = vadd.f32 %v2701_v7, %v1552_v49  ;;  %v2147_v49 = vld [vmem:[#allocation2 + $0x1f] sm:$0x1] }
 0xf23   :  { %v2703_v20 = vpop.eup %2702  ;;  %v1953_v36 = vsel %vm1950_vm7, %v1952_v3, %v1948_v48  ;;  %vm1752_vm7 = vcmp.eq.f32.partialorder %v1751_v53, 8.507059e+37  ;;  %v2144_v48 = vld [vmem:[#allocation2 + $0x7] sm:$0x1] }
 0xf24   :  { %v1743_v50 = vmul.f32 %v2703_v20, %v1741_v35  ;;  %v1557_v42 = vsel %vm1556_vm15, %v2701_v7, %v1553_v41  ;;  %vm1748_vm9 = vweird.f32 %v2703_v20  ;;  %v1956_v15 = vmul.f32 %v1953_v36, %v3544_v62 }
 0xf25   :  { %v1562_v38 = vsel %vm1559_vm8, %v1561_v5, %v1557_v42  ;;  %vm1749_vm11 = vmor %vm1747_vm10, %vm1748_vm9  ;;  %v2181_v3 = vsel %vm211_vm0, %v2180_v47, %v2144_v48  ;;  %vm3742_vm0 = vcmask 130048  }
 0xf26   :  { %v1744_v63 = vsub.f32 1.0, %v1743_v50  ;;  %v1565_v27 = vmul.f32 %v1562_v38, %v3549_v8  ;;  %v2182_v50 = vrot.slane %v2146_v11, 6 }
 0xf28   :  { %v1745_v52 = vmul.f32 %v2703_v20, %v1744_v63 }
 0xf2a   :  { %v1746_v55 = vadd.f32 %v2703_v20, %v1745_v52 }
 0xf2c   :  { %v1750_v12 = vsel %vm1749_vm11, %v2703_v20, %v1746_v55 }
 0xf2d   :  { %v1755_v21 = vsel %vm1752_vm7, %v1754_v13, %v1750_v12 }
 0xf2e   :  { %v1758_v9 = vmul.f32 %v1755_v21, %v3553_v18 }
 0xf69   :  { %v1959_v4 = vpop.permute.xlu2 %1958 }
 0xf6a   :  { %v1961_v37 = vmul.f32 %v1959_v4, %v1953_v36  ;;  %v2148_v4 = vld [vmem:[#allocation2 + $0x27] sm:$0x1] }
 0xf6b   :  { %v2186_v63 = vrot.slane %v2148_v4, 4 }
 0xf6c   :  { %1963 = vrot.lane.b32.xlu2 %v1961_v37, %s2972_s20  ;;  %v2183_v37 = vsel %vm214_vm1, %v2182_v50, %v2181_v3 }
 0xf71   :  { %v1568_v6 = vpop.permute.xlu0 %1567 }
 0xf72   :  { %v1570_v61 = vmul.f32 %v1568_v6, %v1562_v38 }
 0xf74   :  { %1572 = vrot.lane.b32.xlu0 %v1570_v61, %s2972_s20 }
 0xf79   :  { %v1761_v31 = vpop.permute.xlu1 %1760 }
 0xf7a   :  { %v1763_v16 = vmul.f32 %v1761_v31, %v1755_v21 }
 0xf7c   :  { %1765 = vrot.lane.b32.xlu1 %v1763_v16, %s2972_s20 }
 0xfc6   :  { %v1964_v57 = vpop.permute.xlu2 %1963 }
 0xfc7   :  { %v3611_v26 = vadd.f32 %v1964_v57, %v1956_v15 }
 0xfc9   :  { %2704 = vtanh.f32 %v3611_v26 }
 0xfcf   :  { %v2705_v23 = vpop.eup %2704 }
 0xfd0   :  { %1969 = vrot.lane.b32.xlu2 %v2705_v23, %s2971_s19 }
 0xfe6   :  { %v1573_v24 = vpop.permute.xlu0 %1572 }
 0xfe7   :  { %v3616_v34 = vadd.f32 %v1573_v24, %v1565_v27 }
 0xfe9   :  { %2706 = vtanh.f32 %v3616_v34 }
 0xfee   :  { %v1766_v28 = vpop.permute.xlu1 %1765 }
 0xfef   :  { %v2707_v35 = vpop.eup %2706  ;;  %v3620_v62 = vadd.f32 %v1766_v28, %v1758_v9 }
 0xff0   :  { %1578 = vrot.lane.b32.xlu0 %v2707_v35, %s2971_s19 }
 0xff1   :  { %2708 = vtanh.f32 %v3620_v62 }
 0xff7   :  { %v2709_v22 = vpop.eup %2708 }
 0xff8   :  { %1771 = vrot.lane.b32.xlu1 %v2709_v22, %s2971_s19 }
0x102a   :  { %v1970_v7 = vpop.permute.xlu2 %1969 }
0x102b   :  { %v1972_v8 = vmul.f32 %v1970_v7, %v1953_v36  ;;  %v2184_v36 = vrot.slane %v2147_v49, 5 }
0x102d   :  { %1994 = vrot.lane.b32.xlu2 %v1972_v8, %s2972_s20 }
0x1062   :  { %v1579_v43 = vpop.permute.xlu0 %1578 }
0x1063   :  { %v1581_v0 = vmul.f32 %v1579_v43, %v1562_v38 }
0x1065   :  { %1776 = vrot.lane.b32.xlu0 %v1581_v0, %s2972_s20 }
0x106a   :  { %v1772_v18 = vpop.permute.xlu1 %1771 }
0x106b   :  { %v1774_v45 = vmul.f32 %v1772_v18, %v1755_v21 }
0x106d   :  { %1801 = vrot.lane.b32.xlu1 %v1774_v45, %s2972_s20 }
0x1087   :  { %v1995_v52 = vpop.permute.xlu2 %1994 }
0x10d7   :  { %v1777_v20 = vpop.permute.xlu0 %1776 }
0x10d8   :  { %2528 = vmatmul.msk.f32.vlgmr.msra.gmra.mxu2 %vm178_vm12, %v1777_v20 }
0x10d9   :  { %2164 = vmatpush.msra.mxu2 %v3375_v25  ;;  %v2149_v25 = vld [vmem:[#allocation2 + $0x2f] sm:$0x1] }
0x10da   :  { %v2188_v51 = vrot.slane %v2149_v25, 3 }
0x10db   :  { %2165 = vmatpush.msra.mxu2 %v3381_v29  ;;  %v2185_v29 = vsel %vm217_vm2, %v2184_v36, %v2183_v37 }
0x10dd   :  { %2166 = vmatpush.msra.mxu2 %v3388_v33  ;;  %v2150_v33 = vld [vmem:[#allocation2 + $0x37] sm:$0x1] }
0x10de   :  { %v2190_v42 = vrot.slane %v2150_v33, 2 }
0x10df   :  { %v1802_v41 = vpop.permute.xlu1 %1801  ;;  %2167 = vmatpush.msra.mxu2 %v3395_v44  ;;  %v2187_v44 = vsel %vm220_vm3, %v2186_v63, %v2185_v29 }
0x10e0   :  { %2529 = vmatmul.msk.f32.vlgmr.msra.gmra.mxu3 %vm178_vm12, %v1802_v41  ;;  %2534 = vmatmul.msk.f32.vlgmr.msrb.gmra.mxu2 %vm178_vm12, %v1802_v41  ;;  %v2189_v5 = vsel %vm223_vm4, %v2188_v51, %v2187_v44 }
0x10e1   :  { %2210 = vmatpush.msra.mxu3 %v3400_v1  ;;  %2354 = vmatpush.msrb.mxu2 %v3494_v58  ;;  %v2192_v1 = vrot.slane %v2151_v39, 1 }
0x10e3   :  { %2211 = vmatpush.msra.mxu3 %v3405_v46  ;;  %2355 = vmatpush.msrb.mxu2 %v3498_v60  ;;  %v2191_v46 = vsel %vm226_vm5, %v2190_v42, %v2189_v5 }
0x10e4   :  { %v2193_v58 = vsel %vm229_vm6, %v2192_v1, %v2191_v46 }
0x10e5   :  { %2356 = vmatpush.msrb.mxu2 %v3502_v56 }
0x10e7   :  { %2357 = vmatpush.msrb.mxu2 %v3506_v14 }
0x10e8   :  { %2535 = vmatmul.msk.f32.vlgmr.msrb.gmra.mxu3 %vm178_vm12, %v1995_v52  ;;  %2540 = vmatmul.msk.f32.vlgmr.msra.gmra.mxu2 %vm178_vm12, %v1995_v52 }
0x10e9   :  { %2379 = vmatpush.msrb.mxu3 %v3511_v10 }
0x10eb   :  { %2380 = vmatpush.msrb.mxu3 %v3516_v17 }
0x10ed   :  { %2381 = vmatpush.msrb.mxu3 %v3521_v30 }
0x10ef   :  { %2382 = vmatpush.msrb.mxu3 %v3525_v19 }
0x10f0   :  { %2541 = vmatmul.msk.f32.vlgmr.msra.gmra.mxu3 %vm3742_vm0, %v2193_v58 }
0x115b   :  { %v1797_v60 = vpop.f32.mrf.mxu2 }
0x1163   :  { %v1822_v56 = vpop.f32.mrf.mxu3  ;;  %v1990_v38 = vpop.f32.mrf.mxu2 }
0x1164   :  { %v1823_v14 = vadd.f32 %v1822_v56, %v1797_v60 }
0x1166   :  { %v1825_v6 = vadd.f32 %v3599_v54, %v1823_v14 }
0x1168   :  { %2710 = vtanh.f32 %v1825_v6  ;;  %v2530_v21 = vmul.f32 -1.442695, %v1825_v6 }
0x116b   :  { %v2015_v10 = vpop.f32.mrf.mxu3  ;;  %v2169_v30 = vpop.f32.mrf.mxu2 }
0x116c   :  { %v2016_v61 = vadd.f32 %v2015_v10, %v1990_v38 }
0x116e   :  { %v2711_v55 = vpop.eup %2710  ;;  %v2018_v17 = vadd.f32 %v3450_v59, %v2016_v61 }
0x116f   :  { %1848 = vrot.lane.b32.xlu0 %v2711_v55, %s2971_s19 }
0x1170   :  { %2712 = vtanh.f32 %v2018_v17  ;;  %v2536_v15 = vmul.f32 -1.442695, %v2018_v17 }
0x1173   :  { %v2213_v40 = vpop.f32.mrf.mxu3 }
0x1174   :  { %v2214_v19 = vadd.f32 %v2213_v40, %v2169_v30 }
0x1176   :  { %v2713_v53 = vpop.eup %2712  ;;  %v2216_v12 = vadd.f32 %v3457_v32, %v2214_v19 }
0x1177   :  { %2041 = vrot.lane.b32.xlu1 %v2713_v53, %s2971_s19 }
0x1178   :  { %2714 = vtanh.f32 %v2216_v12  ;;  %v2542_v31 = vmul.f32 -1.442695, %v2216_v12 }
0x117a   :  { %2716 = vpow2.f32 %v2542_v31 }
0x117b   :  { %2718 = vpow2.f32 %v2530_v21 }
0x117e   :  { %v2715_v13 = vpop.eup %2714 }
0x117f   :  { %2239 = vrot.lane.b32.xlu2 %v2715_v13, %s2971_s19 }
0x1180   :  { %v2717_v16 = vpop.eup %2716 }
0x1181   :  { %v2220_v59 = vadd.f32 1.0, %v2717_v16  ;;  %v2719_v57 = vpop.eup %2718 }
0x1182   :  { %v1829_v23 = vadd.f32 1.0, %v2719_v57 }
0x1183   :  { %2720 = vrcp.f32 %v2220_v59  ;;  %v2232_v18 = vand.u32 2147483648, %v2220_v59  ;;  %vm2226_vm2 = vweird.f32 %v2220_v59  ;;  %v2230_v45 = vand.u32 2147483647, %v2220_v59 }
0x1184   :  { %2722 = vpow2.f32 %v2536_v15  ;;  %v1841_v36 = vand.u32 2147483648, %v1829_v23  ;;  %vm1835_vm6 = vweird.f32 %v1829_v23  ;;  %v1839_v37 = vand.u32 2147483647, %v1829_v23 }
0x1185   :  { %2724 = vrcp.f32 %v1829_v23  ;;  %v2233_v47 = vor.u32 1.1754944e-38, %v2232_v18  ;;  %vm2231_vm4 = vcmp.eq.f32.partialorder %v2230_v45, 8.507059e+37 }
0x1186   :  { %v1842_v63 = vor.u32 1.1754944e-38, %v1841_v36  ;;  %vm1840_vm14 = vcmp.eq.f32.partialorder %v1839_v37, 8.507059e+37 }
0x1189   :  { %v2721_v27 = vpop.eup %2720 }
0x118a   :  { %v2723_v32 = vpop.eup %2722  ;;  %v2222_v24 = vmul.f32 %v2721_v27, %v2220_v59  ;;  %vm2227_vm1 = vweird.f32 %v2721_v27 }
0x118b   :  { %v2022_v9 = vadd.f32 1.0, %v2723_v32  ;;  %v2725_v35 = vpop.eup %2724  ;;  %vm2228_vm3 = vmor %vm2226_vm2, %vm2227_vm1 }
0x118c   :  { %v2223_v28 = vsub.f32 1.0, %v2222_v24  ;;  %v1831_v7 = vmul.f32 %v2725_v35, %v1829_v23  ;;  %vm1836_vm5 = vweird.f32 %v2725_v35 }
0x118d   :  { %2726 = vrcp.f32 %v2022_v9  ;;  %vm1837_vm13 = vmor %vm1835_vm6, %vm1836_vm5  ;;  %v2034_v39 = vand.u32 2147483648, %v2022_v9  ;;  %vm2028_vm8 = vweird.f32 %v2022_v9  ;;  %v2032_v42 = vand.u32 2147483647, %v2022_v9 }
0x118e   :  { %v2224_v22 = vmul.f32 %v2721_v27, %v2223_v28  ;;  %v1832_v43 = vsub.f32 1.0, %v1831_v7  ;;  %v2783_v28 = vld [vmem:[%s3729_s6] ss:$0 sm:$0xff] }
0x118f   :  { %v2035_v5 = vor.u32 1.1754944e-38, %v2034_v39  ;;  %vm2033_vm10 = vcmp.eq.f32.partialorder %v2032_v42, 8.507059e+37 }
0x1190   :  { %v2225_v8 = vadd.f32 %v2721_v27, %v2224_v22  ;;  %v1833_v20 = vmul.f32 %v2725_v35, %v1832_v43 }
0x1192   :  { %v2229_v2 = vsel %vm2228_vm3, %v2721_v27, %v2225_v8  ;;  %v1834_v3 = vadd.f32 %v2725_v35, %v1833_v20 }
0x1193   :  { %v2727_v0 = vpop.eup %2726  ;;  %v2234_v49 = vsel %vm2231_vm4, %v2233_v47, %v2229_v2 }
0x1194   :  { %v2024_v11 = vmul.f32 %v2727_v0, %v2022_v9  ;;  %v1838_v41 = vsel %vm1837_vm13, %v2725_v35, %v1834_v3  ;;  %vm2029_vm15 = vweird.f32 %v2727_v0  ;;  %v2237_v60 = vmul.f32 %v2234_v49, %v3611_v26 }
0x1195   :  { %v1843_v33 = vsel %vm1840_vm14, %v1842_v63, %v1838_v41  ;;  %vm2030_vm9 = vmor %vm2028_vm8, %vm2029_vm15  ;;  %vm2458_vm8 = vcmask 64512  }
0x1196   :  { %v2025_v4 = vsub.f32 1.0, %v2024_v11  ;;  %v1846_v38 = vmul.f32 %v1843_v33, %v3616_v34 }
0x1198   :  { %v2026_v25 = vmul.f32 %v2727_v0, %v2025_v4 }
0x119a   :  { %v2027_v44 = vadd.f32 %v2727_v0, %v2026_v25 }
0x119c   :  { %v2031_v52 = vsel %vm2030_vm9, %v2727_v0, %v2027_v44 }
0x119d   :  { %v2036_v46 = vsel %vm2033_vm10, %v2035_v5, %v2031_v52 }
0x119e   :  { %v2039_v55 = vmul.f32 %v2036_v46, %v3620_v62 }
0x11d9   :  { %v2240_v48 = vpop.permute.xlu2 %2239 }
0x11da   :  { %v2242_v50 = vmul.f32 %v2240_v48, %v2234_v49 }
0x11dc   :  { %2244 = vrot.lane.b32.xlu2 %v2242_v50, %s2972_s20 }
0x11e1   :  { %v1849_v29 = vpop.permute.xlu0 %1848 }
0x11e2   :  { %v1851_v51 = vmul.f32 %v1849_v29, %v1843_v33 }
0x11e4   :  { %1853 = vrot.lane.b32.xlu0 %v1851_v51, %s2972_s20 }
0x11e9   :  { %v2042_v1 = vpop.permute.xlu1 %2041 }
0x11ea   :  { %v2044_v58 = vmul.f32 %v2042_v1, %v2036_v46 }
0x11ec   :  { %2046 = vrot.lane.b32.xlu1 %v2044_v58, %s2972_s20 }
0x1236   :  { %v2245_v56 = vpop.permute.xlu2 %2244 }
0x1237   :  { %v2247_v14 = vadd.f32 %v2245_v56, %v2237_v60 }
0x1239   :  { %2728 = vtanh.f32 %v2247_v14 }
0x123f   :  { %v2729_v6 = vpop.eup %2728 }
0x1240   :  { %2250 = vrot.lane.b32.xlu2 %v2729_v6, %s2971_s19 }
0x1256   :  { %v1854_v10 = vpop.permute.xlu0 %1853 }
0x1257   :  { %v3667_v61 = vadd.f32 %v1854_v10, %v1846_v38 }
0x1259   :  { %2730 = vtanh.f32 %v3667_v61 }
0x125e   :  { %v2047_v17 = vpop.permute.xlu1 %2046 }
0x125f   :  { %v2731_v30 = vpop.eup %2730  ;;  %v3671_v40 = vadd.f32 %v2047_v17, %v2039_v55 }
0x1260   :  { %1859 = vrot.lane.b32.xlu0 %v2731_v30, %s2971_s19 }
0x1261   :  { %2732 = vtanh.f32 %v3671_v40 }
0x1267   :  { %v2733_v26 = vpop.eup %2732 }
0x1268   :  { %2052 = vrot.lane.b32.xlu1 %v2733_v26, %s2971_s19 }
0x129a   :  { %v2251_v19 = vpop.permute.xlu2 %2250 }
0x129b   :  { %v2253_v34 = vmul.f32 %v2251_v19, %v2234_v49 }
0x129d   :  { %2275 = vrot.lane.b32.xlu2 %v2253_v34, %s2972_s20 }
0x12d2   :  { %v1860_v53 = vpop.permute.xlu0 %1859 }
0x12d3   :  { %v1862_v12 = vmul.f32 %v1860_v53, %v1843_v33 }
0x12d5   :  { %2057 = vrot.lane.b32.xlu0 %v1862_v12, %s2972_s20 }
0x12da   :  { %v2053_v62 = vpop.permute.xlu1 %2052 }
0x12db   :  { %v2055_v13 = vmul.f32 %v2053_v62, %v2036_v46 }
0x12dd   :  { %2082 = vrot.lane.b32.xlu1 %v2055_v13, %s2972_s20 }
0x12f7   :  { %v2276_v16 = vpop.permute.xlu2 %2275 }
0x1347   :  { %v2058_v31 = vpop.permute.xlu0 %2057 }
0x1348   :  { %2537 = vmatmul.msk.f32.vlgmr.msra.gmra.mxu1 %vm178_vm12, %v2058_v31 }
0x134f   :  { %v2083_v21 = vpop.permute.xlu1 %2082 }
0x1350   :  { %2538 = vmatmul.msk.f32.vlgmr.msra.gmra.mxu0 %vm178_vm12, %v2083_v21  ;;  %2543 = vmatmul.msk.f32.vlgmr.msrb.gmra.mxu1 %vm178_vm12, %v2083_v21 }
0x1358   :  { %2544 = vmatmul.msk.f32.vlgmr.msrb.gmra.mxu0 %vm178_vm12, %v2276_v16 }
0x13c5   :  { %v2078_v59 = vpop.f32.mrf.mxu1 }
0x13cd   :  { %v2103_v15 = vpop.f32.mrf.mxu0  ;;  %v2271_v27 = vpop.f32.mrf.mxu1 }
0x13ce   :  { %v2104_v57 = vadd.f32 %v2103_v15, %v2078_v59 }
0x13d0   :  { %v2106_v23 = vadd.f32 %v3599_v54, %v2104_v57 }
0x13d2   :  { %2734 = vtanh.f32 %v2106_v23  ;;  %v2539_v7 = vmul.f32 -1.442695, %v2106_v23 }
0x13d5   :  { %v2296_v32 = vpop.f32.mrf.mxu0 }
0x13d6   :  { %v2297_v24 = vadd.f32 %v2296_v32, %v2271_v27 }
0x13d8   :  { %v2735_v9 = vpop.eup %2734  ;;  %v2299_v35 = vadd.f32 %v2783_v28, %v2297_v24 }
0x13d9   :  { %2129 = vrot.lane.b32.xlu0 %v2735_v9, %s2971_s19 }
0x13da   :  { %2736 = vtanh.f32 %v2299_v35  ;;  %v2545_v8 = vmul.f32 -1.442695, %v2299_v35 }
0x13db   :  { %2738 = vpow2.f32 %v2539_v7 }
0x13dc   :  { %2740 = vpow2.f32 %v2545_v8 }
0x13e0   :  { %v2737_v22 = vpop.eup %2736 }
0x13e1   :  { %2322 = vrot.lane.b32.xlu1 %v2737_v22, %s2971_s19  ;;  %v2739_v43 = vpop.eup %2738 }
0x13e2   :  { %v2110_v0 = vadd.f32 1.0, %v2739_v43  ;;  %v2741_v18 = vpop.eup %2740 }
0x13e3   :  { %v2303_v45 = vadd.f32 1.0, %v2741_v18  ;;  %v2428_v18 = vld [vmem:[%s3733_s10 + $0x18] sm:$0xff] }
0x13e4   :  { %2742 = vrcp.f32 %v2110_v0  ;;  %v2122_v4 = vand.u32 2147483648, %v2110_v0  ;;  %vm2116_vm7 = vweird.f32 %v2110_v0  ;;  %v2120_v36 = vand.u32 2147483647, %v2110_v0  ;;  %2450 = vmatpush.msra.mxu1 %v2428_v18 }
0x13e5   :  { %2744 = vrcp.f32 %v2303_v45  ;;  %v2315_v44 = vand.u32 2147483648, %v2303_v45  ;;  %vm2309_vm3 = vweird.f32 %v2303_v45  ;;  %v2313_v39 = vand.u32 2147483647, %v2303_v45 }
0x13e6   :  { %v2123_v25 = vor.u32 1.1754944e-38, %v2122_v4  ;;  %vm2121_vm1 = vcmp.eq.f32.partialorder %v2120_v36, 8.507059e+37 }
0x13e7   :  { %v2316_v52 = vor.u32 1.1754944e-38, %v2315_v44  ;;  %vm2314_vm5 = vcmp.eq.f32.partialorder %v2313_v39, 8.507059e+37 }
0x13ea   :  { %v2743_v2 = vpop.eup %2742 }
0x13eb   :  { %v2112_v20 = vmul.f32 %v2743_v2, %v2110_v0  ;;  %v2745_v47 = vpop.eup %2744  ;;  %vm2117_vm11 = vweird.f32 %v2743_v2 }
0x13ec   :  { %v2305_v49 = vmul.f32 %v2745_v47, %v2303_v45  ;;  %vm2118_vm0 = vmor %vm2116_vm7, %vm2117_vm11  ;;  %vm2310_vm2 = vweird.f32 %v2745_v47  ;;  %v2427_v45 = vld [vmem:[%s3733_s10 + $0x10] sm:$0xff] }
0x13ed   :  { %v2113_v11 = vsub.f32 1.0, %v2112_v20  ;;  %vm2311_vm4 = vmor %vm2309_vm3, %vm2310_vm2  ;;  %2451 = vmatpush.msra.mxu1 %v2427_v45  ;;  %v2425_v20 = vld [vmem:[%s3733_s10] sm:$0xff] }
0x13ee   :  { %v2306_v3 = vsub.f32 1.0, %v2305_v49  ;;  %v2565_v49 = vld [vmem:[%s3734_s11] ss:$0 sm:$0xff] }
0x13ef   :  { %v2114_v48 = vmul.f32 %v2743_v2, %v2113_v11 }
0x13f0   :  { %v2307_v41 = vmul.f32 %v2745_v47, %v2306_v3 }
0x13f1   :  { %v2115_v50 = vadd.f32 %v2743_v2, %v2114_v48 }
0x13f2   :  { %v2308_v51 = vadd.f32 %v2745_v47, %v2307_v41 }
0x13f3   :  { %v2119_v37 = vsel %vm2118_vm0, %v2743_v2, %v2115_v50  ;;  %v2426_v2 = vld [vmem:[%s3733_s10 + $0x8] sm:$0xff] }
0x13f4   :  { %v2124_v29 = vsel %vm2121_vm1, %v2123_v25, %v2119_v37  ;;  %v2312_v42 = vsel %vm2311_vm4, %v2745_v47, %v2308_v51  ;;  %2452 = vmatpush.msra.mxu1 %v2426_v2 }
0x13f5   :  { %v2317_v1 = vsel %vm2314_vm5, %v2316_v52, %v2312_v42  ;;  %v2127_v58 = vmul.f32 %v2124_v29, %v3667_v61 }
0x13f6   :  { %v2320_v6 = vmul.f32 %v2317_v1, %v3671_v40  ;;  %2453 = vmatpush.msra.mxu1 %v2425_v20 }
0x144b   :  { %v2130_v63 = vpop.permute.xlu0 %2129 }
0x144c   :  { %v2132_v33 = vmul.f32 %v2130_v63, %v2124_v29 }
0x144e   :  { %2134 = vrot.lane.b32.xlu2 %v2132_v33, %s2972_s20 }
0x1453   :  { %v2323_v5 = vpop.permute.xlu1 %2322 }
0x1454   :  { %v2325_v46 = vmul.f32 %v2323_v5, %v2317_v1 }
0x1456   :  { %2327 = vrot.lane.b32.xlu0 %v2325_v46, %s2972_s20 }
0x14a8   :  { %v2135_v60 = vpop.permute.xlu2 %2134 }
0x14a9   :  { %v2137_v56 = vadd.f32 %v2135_v60, %v2127_v58 }
0x14ab   :  { %2746 = vtanh.f32 %v2137_v56 }
0x14b1   :  { %v2747_v14 = vpop.eup %2746 }
0x14b2   :  { %2140 = vrot.lane.b32.xlu1 %v2747_v14, %s2971_s19 }
0x14c8   :  { %v2328_v38 = vpop.permute.xlu0 %2327 }
0x14c9   :  { %v2330_v10 = vadd.f32 %v2328_v38, %v2320_v6 }
0x14cb   :  { %2748 = vtanh.f32 %v2330_v10 }
0x14d1   :  { %v2749_v55 = vpop.eup %2748 }
0x14d2   :  { %2333 = vrot.lane.b32.xlu2 %v2749_v55, %s2971_s19 }
0x1524   :  { %v2141_v17 = vpop.permute.xlu1 %2140 }
0x1525   :  { %v2143_v30 = vmul.f32 %v2141_v17, %v2124_v29 }
0x1527   :  { %2338 = vrot.lane.b32.xlu0 %v2143_v30, %s2972_s20 }
0x152c   :  { %v2334_v26 = vpop.permute.xlu2 %2333 }
0x152d   :  { %v2336_v61 = vmul.f32 %v2334_v26, %v2317_v1 }
0x152f   :  { %2363 = vrot.lane.b32.xlu1 %v2336_v61, %s2972_s20 }
0x1599   :  { %v2339_v19 = vpop.permute.xlu0 %2338 }
0x159a   :  { %2546 = vmatmul.msk.f32.vlgmr.msrb.gmra.mxu2 %vm178_vm12, %v2339_v19 }
0x15a1   :  { %v2364_v34 = vpop.permute.xlu1 %2363 }
0x15a2   :  { %2547 = vmatmul.msk.f32.vlgmr.msrb.gmra.mxu3 %vm178_vm12, %v2364_v34 }
0x161d   :  { %v2359_v40 = vpop.f32.mrf.mxu2 }
0x1625   :  { %v2384_v53 = vpop.f32.mrf.mxu3 }
0x1626   :  { %v2385_v12 = vadd.f32 %v2384_v53, %v2359_v40 }
0x1628   :  { %v2387_v62 = vadd.f32 %v3599_v54, %v2385_v12 }
0x162a   :  { %2750 = vtanh.f32 %v2387_v62  ;;  %v2548_v31 = vmul.f32 -1.442695, %v2387_v62 }
0x162c   :  { %2752 = vpow2.f32 %v2548_v31 }
0x1630   :  { %v2751_v13 = vpop.eup %2750 }
0x1631   :  { %2410 = vrot.lane.b32.xlu2 %v2751_v13, %s2971_s19 }
0x1632   :  { %v2753_v21 = vpop.eup %2752 }
0x1633   :  { %v2391_v16 = vadd.f32 1.0, %v2753_v21 }
0x1635   :  { %2754 = vrcp.f32 %v2391_v16  ;;  %v2403_v32 = vand.u32 2147483648, %v2391_v16  ;;  %vm2397_vm13 = vweird.f32 %v2391_v16  ;;  %v2401_v24 = vand.u32 2147483647, %v2391_v16 }
0x1637   :  { %v2404_v9 = vor.u32 1.1754944e-38, %v2403_v32  ;;  %vm2402_vm15 = vcmp.eq.f32.partialorder %v2401_v24, 8.507059e+37 }
0x163b   :  { %v2755_v59 = vpop.eup %2754 }
0x163c   :  { %v2393_v15 = vmul.f32 %v2755_v59, %v2391_v16  ;;  %vm2398_vm6 = vweird.f32 %v2755_v59 }
0x163d   :  { %vm2399_vm14 = vmor %vm2397_vm13, %vm2398_vm6 }
0x163e   :  { %v2394_v57 = vsub.f32 1.0, %v2393_v15 }
0x1640   :  { %v2395_v23 = vmul.f32 %v2755_v59, %v2394_v57 }
0x1642   :  { %v2396_v27 = vadd.f32 %v2755_v59, %v2395_v23 }
0x1644   :  { %v2400_v54 = vsel %vm2399_vm14, %v2755_v59, %v2396_v27 }
0x1645   :  { %v2405_v35 = vsel %vm2402_vm15, %v2404_v9, %v2400_v54 }
0x1646   :  { %v2408_v7 = vmul.f32 %v2405_v35, %v2137_v56 }
0x168b   :  { %v2411_v28 = vpop.permute.xlu2 %2410 }
0x168c   :  { %v2413_v22 = vmul.f32 %v2411_v28, %v2405_v35 }
0x168e   :  { %2415 = vrot.lane.b32.xlu0 %v2413_v22, %s2972_s20 }
0x1700   :  { %v2416_v8 = vpop.permute.xlu0 %2415 }
0x1701   :  { %v2418_v43 = vadd.f32 %v2416_v8, %v2408_v7 }
0x1703   :  { %2756 = vtanh.f32 %v2418_v43 }
0x1709   :  { %v2757_v0 = vpop.eup %2756 }
0x170a   :  { %2421 = vrot.lane.b32.xlu1 %v2757_v0, %s2971_s19 }
0x177c   :  { %v2422_v11 = vpop.permute.xlu1 %2421 }
0x177d   :  { %v2424_v47 = vmul.f32 %v2422_v11, %v2405_v35 }
0x177f   :  { %2434 = vrot.lane.b32.xlu2 %v2424_v47, %s2972_s20 }
0x17d9   :  { %v2435_v48 = vpop.permute.xlu2 %2434 }
0x17da   :  { %2549 = vmatmul.msk.f32.vlgmr.msra.gmra.mxu1 %vm178_vm12, %v2435_v48 }
0x1857   :  { %v2455_v50 = vpop.f32.mrf.mxu1 }
0x1858   :  { %v2456_v3 = vadd.f32 %v2565_v49, %v2455_v50 }
0x185a   :  { %2459 = vst.msk [vmem:[#allocation13] sm:$0xff] %vm2458_vm8, %v2456_v3 }
0x185b   :  { %2470 = dma.vmem_to_hbm [thread:$0]  %s2466_s24, 128, %s2468_s26, [#allocation4]  }
0x185c   :  { %2960 = dma.done.wait [#allocation4], 128  }
0x185d   :  { %2961 = vsyncadd [#allocation4], 4294967168 }
0x185e   :  { %2475 = vsyncpa [#allocation3], 1 }
0x185f   :  { %2476 = vsyncpa [#allocation6], 1 }
0x1860   :  { %2477 = vsyncpa [#allocation9], 1 }
0x1861   :  { %2478 = vsyncpa [#allocation12], 1 }
0x1862   :  { %2479 = vsyncpa [#allocation4], 1 }

</bundles_post_ra>
